<compile_context>
chip_gen: v7x
topology: tpu7x:2x2x1
jax: 0.10.0
libtpu: 0.0.40
codegen_flags: <defaults>
</compile_context>

<pallas_src>
import functools

import jax
import jax.numpy as jnp
import numpy as np
from jax import lax
from jax.experimental import pallas as pl
from jax.experimental.pallas import tpu as pltpu

EPS = 1e-5
LANE = 128


# ---------------------------------------------------------------------------
# small helpers
# ---------------------------------------------------------------------------
def _round_up(x, m):
    return (x + m - 1) // m * m


def _divisors_desc(h):
    return [d for d in range(h, 0, -1) if h % d == 0]


def _vmem_limit_bytes():
    # Generation-aware VMEM budget: ~100 MiB on v5e/v6e (128 MiB physical),
    # ~51 MiB on v7x (64 MiB physical); conservative fallback if the query
    # is unavailable.
    try:
        cap = int(pltpu.get_tpu_info().vmem_capacity_bytes)
    except Exception:
        cap = 64 * 1024 * 1024
    cap = max(cap, 32 * 1024 * 1024)
    return min(int(cap * 0.8), 100 * 1024 * 1024)


def _conv_step_bytes(t, w, cin, cout, in_bytes):
    """Rough per-grid-step VMEM footprint of the conv kernel (with fudge)."""
    m = t * w
    mid = t * w * cin * in_bytes * 2           # double-buffered activation tile
    halo = 2 * w * cin * in_bytes * 2          # two 1-row halo blocks
    wts = 9 * cin * cout * 2                   # bf16 weights (single-buffered)
    yout = m * cout * 2 * 2                    # bf16 output tile, double-buffered
    tmp = ((t + 2) * w * cin * 4               # prepped f32 rows
           + m * 3 * cin * 2                   # K-packed bf16 LHS
           + 3 * m * cout * 4                  # 3 f32 taps
           + 2 * m * cout * 4)                 # combine / store staging
    return int(1.5 * (mid + halo + wts + yout + tmp))


def _pick_conv_tile_h(n, h, w, cin, cout, in_bytes, vmem_limit):
    """Largest H tile (divisor of H) that fits the VMEM budget."""
    budget = vmem_limit // 2
    m_cap = max(1, 4096 // max(w, 1))          # bound MXU M dim / temporaries
    cands = _divisors_desc(h)
    if n == 1 and h > 1:
        # keep >= 2 H-tiles so the extra parallel grid axis can feed both
        # TensorCores on v7x when the batch axis has extent 1.
        halved = [d for d in cands if d <= h // 2]
        cands = halved or cands
    for t in cands:
        if t <= m_cap and _conv_step_bytes(t, w, cin, cout, in_bytes) <= budget:
            return t
    return 1
    # TODO(synk): for H with no usable divisor (large primes) switch to a
    # pl.cdiv grid with masked partial tiles in both the conv and the stats.


def _pick_bnrelu_tile_h(h, w, cpad, cout, vmem_limit):
    budget = vmem_limit // 2
    for t in _divisors_desc(h):
        need = t * w * (cpad * 2 * 2 + cout * 4 * 2 + cpad * 4)
        if int(1.5 * need) <= budget:
            return t
    return 1


# ---------------------------------------------------------------------------
# runtime capability probes (run eagerly once, outside jit)
# ---------------------------------------------------------------------------
_ROLL_MODE = None       # "np" (matches np.roll), "rev" (opposite), or "off"
_BUFFERED_OK = None     # pl.Buffered(1) pipeline_mode accepted


def _probe_roll():
    global _ROLL_MODE
    if _ROLL_MODE is not None:
        return _ROLL_MODE
    try:
        def k(x_ref, o_ref):
            o_ref[...] = pltpu.roll(x_ref[...], 1, 0)

        x = jnp.arange(16 * 128, dtype=jnp.float32).reshape(16, 128)
        out = np.asarray(
            pl.pallas_call(
                k, out_shape=jax.ShapeDtypeStruct((16, 128), jnp.float32))(x))
        xs = np.asarray(x)
        if np.array_equal(out, np.roll(xs, 1, axis=0)):
            _ROLL_MODE = "np"
        elif np.array_equal(out, np.roll(xs, -1, axis=0)):
            _ROLL_MODE = "rev"
        else:
            _ROLL_MODE = "off"
    except Exception:
        _ROLL_MODE = "off"
    return _ROLL_MODE


def _single_buffer_supported():
    global _BUFFERED_OK
    if _BUFFERED_OK is not None:
        return _BUFFERED_OK
    try:
        def k(x_ref, o_ref):
            o_ref[...] = x_ref[...] + 1.0

        spec = pl.BlockSpec((8, 128), lambda i: (0, 0),
                            pipeline_mode=pl.Buffered(1))
        x = jnp.zeros((8, 128), jnp.float32)
        out = pl.pallas_call(
            k, grid=(2,),
            in_specs=[spec],
            out_specs=pl.BlockSpec((8, 128), lambda i: (0, 0)),
            out_shape=jax.ShapeDtypeStruct((8, 128), jnp.float32),
        )(x)
        _BUFFERED_OK = bool(np.all(np.asarray(out) == 1.0))
    except Exception:
        _BUFFERED_OK = False
    return _BUFFERED_OK


def _const_spec(shape):
    """BlockSpec for a grid-invariant operand; single-buffered when supported."""
    imap = lambda *args: (0,) * len(shape)
    if _single_buffer_supported():
        return pl.BlockSpec(shape, imap, pipeline_mode=pl.Buffered(1))
    return pl.BlockSpec(shape, imap)


# ---------------------------------------------------------------------------
# kernels
# ---------------------------------------------------------------------------
def _conv3x3_bn_stats_kernel(top_ref, mid_ref, bot_ref, w_ref, b_ref,
                             scale_ref, shift_ref,
                             y_ref, sum_ref, sumsq_ref,
                             *, tile_h, n_h_per, n_h_total, width,
                             fuse_affine, roll_mode):
    s = pl.program_id(1)
    jj = pl.program_id(2)
    jg = s * n_h_per + jj                      # global H-tile index

    def prep(rows):
        z = rows.astype(jnp.float32)
        if fuse_affine:
            # previous block's BN + ReLU fused into the load path
            z = jnp.maximum(z * scale_ref[0] + shift_ref[0], 0.0)
        return z

    top = prep(top_ref[0])                     # (1, W, Cin)
    mid = prep(mid_ref[0])                     # (tile_h, W, Cin)
    bot = prep(bot_ref[0])                     # (1, W, Cin)
    # SAME padding: only the boundary tiles zero their 1-row halo.
    top = jnp.where(jg == 0, 0.0, top)
    bot = jnp.where(jg == n_h_total - 1, 0.0, bot)

    xt = jnp.concatenate([top, mid, bot], axis=0).astype(jnp.bfloat16)

    cin = xt.shape[-1]
    cout = w_ref.shape[-1]
    w = width
    m = tile_h * w

    # K-packing: stack the 3 vertical taps along channels once, then run
    # 3 MXU matmuls of depth K = 3*Cin instead of 9 of depth Cin.
    lhs = jnp.concatenate(
        [xt[0:tile_h], xt[1:tile_h + 1], xt[2:tile_h + 2]], axis=-1
    ).reshape(m, 3 * cin)

    taps = [jnp.dot(lhs, w_ref[dw], preferred_element_type=jnp.float32)
            for dw in range(3)]                # each (m, cout)

    if roll_mode != "off":
        # Horizontal taps combined via XLU rotates on the flattened row axis;
        # wrapped-around rows land exactly in the columns SAME padding zeroes.
        fwd = 1 if roll_mode == "np" else m - 1        # == np.roll(+1)
        bwd = m - 1 if roll_mode == "np" else 1        # == np.roll(-1)
        ridx = lax.broadcasted_iota(jnp.int32, (m, 1), 0)
        col = ridx % w
        left = jnp.where(col == 0, 0.0, pltpu.roll(taps[0], fwd, 0))
        right = jnp.where(col == w - 1, 0.0, pltpu.roll(taps[2], bwd, 0))
        y = (taps[1] + left + right).reshape(tile_h, w, cout)
    else:
        t0 = taps[0].reshape(tile_h, w, cout)
        t1 = taps[1].reshape(tile_h, w, cout)
        t2 = taps[2].reshape(tile_h, w, cout)
        zcol = jnp.zeros((tile_h, 1, cout), jnp.float32)
        y = (jnp.concatenate([zcol, t0[:, :w - 1, :]], axis=1) + t1
             + jnp.concatenate([t2[:, 1:, :], zcol], axis=1))

    y = y + b_ref[0]                           # conv bias
    y_ref[0] = y.astype(y_ref.dtype)           # bf16 intermediate to HBM

    # Per-channel batch statistics (f32, pre-cast), resident over the H axis.
    @pl.when(jj == 0)
    def _():
        sum_ref[...] = jnp.zeros_like(sum_ref)
        sumsq_ref[...] = jnp.zeros_like(sumsq_ref)

    sum_ref[...] += jnp.sum(y, axis=(0, 1)).reshape(1, 1, 1, cout)
    sumsq_ref[...] += jnp.sum(y * y, axis=(0, 1)).reshape(1, 1, 1, cout)


def _bn_relu_kernel(y_ref, scale_ref, shift_ref, o_ref, *, out_ch):
    y = y_ref[0].astype(jnp.float32)
    z = jnp.maximum(y * scale_ref[0] + shift_ref[0], 0.0)
    o_ref[0] = z[..., :out_ch]                 # fused channel un-pad


# ---------------------------------------------------------------------------
# pallas_call wrappers
# ---------------------------------------------------------------------------
def conv3x3_bn_stats(x, w_packed, b, scale_in, shift_in, *, tile_h, n_split,
                     fuse_affine, vmem_limit):
    n, hgt, wdt, cin = x.shape
    cout = w_packed.shape[-1]
    n_h = hgt // tile_h
    n_h_per = n_h // n_split

    roll_mode = _probe_roll() if (wdt % 8 == 0) else "off"

    kernel = functools.partial(
        _conv3x3_bn_stats_kernel, tile_h=tile_h, n_h_per=n_h_per,
        n_h_total=n_h, width=wdt, fuse_affine=fuse_affine, roll_mode=roll_mode)

    def jg(s, jj):
        return s * n_h_per + jj

    top_map = lambda i, s, jj: (i, jnp.maximum(jg(s, jj) * tile_h - 1, 0), 0, 0)
    mid_map = lambda i, s, jj: (i, jg(s, jj), 0, 0)
    bot_map = lambda i, s, jj: (i, jnp.minimum((jg(s, jj) + 1) * tile_h, hgt - 1), 0, 0)
    y_map = lambda i, s, jj: (i, jg(s, jj), 0, 0)
    stat_map = lambda i, s, jj: (i, s, 0, 0)   # constant over jj -> accumulator

    return pl.pallas_call(
        kernel,
        grid=(n, n_split, n_h_per),
        in_specs=[
            pl.BlockSpec((1, 1, wdt, cin), top_map),
            pl.BlockSpec((1, tile_h, wdt, cin), mid_map),
            pl.BlockSpec((1, 1, wdt, cin), bot_map),
            _const_spec((3, 3 * cin, cout)),   # K-packed weights
            _const_spec((1, cout)),            # conv bias
            _const_spec((1, cin)),             # fused BN scale of previous block
            _const_spec((1, cin)),             # fused BN shift of previous block
        ],
        out_specs=(
            pl.BlockSpec((1, tile_h, wdt, cout), y_map),
            pl.BlockSpec((1, 1, 1, cout), stat_map),
            pl.BlockSpec((1, 1, 1, cout), stat_map),
        ),
        out_shape=(
            jax.ShapeDtypeStruct((n, hgt, wdt, cout), jnp.bfloat16),
            jax.ShapeDtypeStruct((n, n_split, 1, cout), jnp.float32),
            jax.ShapeDtypeStruct((n, n_split, 1, cout), jnp.float32),
        ),
        compiler_params=pltpu.CompilerParams(
            dimension_semantics=("parallel", "parallel", "arbitrary"),
            vmem_limit_bytes=vmem_limit,
        ),
    )(x, x, x, w_packed, b, scale_in, shift_in)


def bn_relu_slice(y, scale, shift, *, out_ch, tile_h, vmem_limit):
    n, hgt, wdt, c = y.shape
    kernel = functools.partial(_bn_relu_kernel, out_ch=out_ch)
    return pl.pallas_call(
        kernel,
        grid=(n, hgt // tile_h),
        in_specs=[
            pl.BlockSpec((1, tile_h, wdt, c), lambda i, j: (i, j, 0, 0)),
            _const_spec((1, c)),
            _const_spec((1, c)),
        ],
        out_specs=pl.BlockSpec((1, tile_h, wdt, out_ch),
                               lambda i, j: (i, j, 0, 0)),
        out_shape=jax.ShapeDtypeStruct((n, hgt, wdt, out_ch), jnp.float32),
        compiler_params=pltpu.CompilerParams(
            dimension_semantics=("parallel", "parallel"),
            vmem_limit_bytes=vmem_limit,
        ),
    )(y, scale, shift)


# ---------------------------------------------------------------------------
# module forward
# ---------------------------------------------------------------------------
def double_conv_apply(x_nchw, params):
    x = jnp.transpose(x_nchw, (0, 2, 3, 1)).astype(jnp.float32)   # NCHW -> NHWC
    n, hgt, wdt, cin = x.shape
    out_ch = params["w1"].shape[-1]
    cpi = _round_up(cin, LANE)
    cpo = _round_up(out_ch, LANE)
    count = float(n * hgt * wdt)
    vmem_limit = _vmem_limit_bytes()

    # Lane-dense channel padding, once on the (small) input.
    xp = jnp.pad(x, ((0, 0), (0, 0), (0, 0), (0, cpi - cin)))

    def prep_w(wk, ci_p, co_p):
        # HWIO (3,3,ci,co) -> K-packed (dw, 3*ci_p, co_p), bf16 for the MXU.
        wp = jnp.pad(wk, ((0, 0), (0, 0),
                          (0, ci_p - wk.shape[2]), (0, co_p - wk.shape[3])))
        wp = jnp.transpose(wp, (1, 0, 2, 3)).reshape(3, 3 * ci_p, co_p)
        return wp.astype(jnp.bfloat16)

    def prep_vec(v, c_p):
        v = v.reshape(-1)
        return jnp.pad(v, (0, c_p - v.shape[0])).reshape(1, c_p).astype(jnp.float32)

    w1 = prep_w(params["w1"], cpi, cpo)
    w2 = prep_w(params["w2"], cpo, cpo)
    b1, b2 = prep_vec(params["b1"], cpo), prep_vec(params["b2"], cpo)
    g1, g2 = prep_vec(params["gamma1"], cpo), prep_vec(params["gamma2"], cpo)
    be1, be2 = prep_vec(params["beta1"], cpo), prep_vec(params["beta2"], cpo)

    def plan(cin_p, in_bytes):
        t = _pick_conv_tile_h(n, hgt, wdt, cin_p, cpo, in_bytes, vmem_limit)
        n_h = hgt // t
        n_split = 2 if (n == 1 and n_h >= 2 and n_h % 2 == 0) else 1
        return t, n_split

    def bn_affine(s, ss, gamma, beta):
        mean = jnp.sum(s, axis=(0, 1, 2)) / count
        # TODO(synk): E[x^2]-mean^2 can cancel for large activations; switch to
        # a shifted two-pass / Welford reduction if BN accuracy matters at scale.
        var = jnp.maximum(jnp.sum(ss, axis=(0, 1, 2)) / count - mean * mean, 0.0)
        scale = gamma.reshape(-1) * lax.rsqrt(var + EPS)
        shift = beta.reshape(-1) - mean * scale
        return scale.reshape(1, -1), shift.reshape(1, -1)

    ident_s = jnp.ones((1, cpi), jnp.float32)
    ident_b = jnp.zeros((1, cpi), jnp.float32)

    # Block 1: conv + bias + batch stats (its BN/ReLU is fused into block 2).
    t1, sp1 = plan(cpi, 4)
    y1, s1, ss1 = conv3x3_bn_stats(xp, w1, b1, ident_s, ident_b,
                                   tile_h=t1, n_split=sp1, fuse_affine=False,
                                   vmem_limit=vmem_limit)
    sc1, sh1 = bn_affine(s1, ss1, g1, be1)

    # Block 2: fused (BN1 + ReLU1) on load -> conv + bias + batch stats.
    t2, sp2 = plan(cpo, 2)
    y2, s2, ss2 = conv3x3_bn_stats(y1, w2, b2, sc1, sh1,
                                   tile_h=t2, n_split=sp2, fuse_affine=True,
                                   vmem_limit=vmem_limit)
    sc2, sh2 = bn_affine(s2, ss2, g2, be2)

    # Final BN2 + ReLU2, channel un-pad fused into the store.
    t3 = _pick_bnrelu_tile_h(hgt, wdt, cpo, out_ch, vmem_limit)
    out = bn_relu_slice(y2, sc2, sh2, out_ch=out_ch, tile_h=t3,
                        vmem_limit=vmem_limit)
    # TODO(synk): for W >= 128 the NHWC->NCHW transpose could also be fused
    # into bn_relu's out_spec; at small W it stays a cheap XLA transpose.
    return jnp.transpose(out, (0, 3, 1, 2))                       # NHWC -> NCHW


# ---------------------------------------------------------------------------
# params (deterministic, matches nn.Module shapes; values synthetic)
# ---------------------------------------------------------------------------
def init_params(key, in_ch, out_ch):
    k1, k2, k3, k4 = jax.random.split(key, 4)
    # Conv2d weights kept in HWIO layout.
    w1 = jax.random.normal(k1, (3, 3, in_ch, out_ch), jnp.float32) / np.sqrt(9 * in_ch)
    b1 = 0.1 * jax.random.normal(k2, (1, out_ch), jnp.float32)
    w2 = jax.random.normal(k3, (3, 3, out_ch, out_ch), jnp.float32) / np.sqrt(9 * out_ch)
    b2 = 0.1 * jax.random.normal(k4, (1, out_ch), jnp.float32)
    # BatchNorm2d defaults: weight=1, bias=0.
    return dict(
        w1=w1, b1=b1,
        gamma1=jnp.ones((1, out_ch), jnp.float32), beta1=jnp.zeros((1, out_ch), jnp.float32),
        w2=w2, b2=b2,
        gamma2=jnp.ones((1, out_ch), jnp.float32), beta2=jnp.zeros((1, out_ch), jnp.float32),
    )


# ---------------------------------------------------------------------------
# pure-JAX reference (mirrors bf16 matmul operands, f32 accumulation, f32
# batch statistics, and bf16 intermediate storage)
# ---------------------------------------------------------------------------
def ref_forward(x_nchw, params):
    x = jnp.transpose(x_nchw, (0, 2, 3, 1)).astype(jnp.float32)

    def conv(z, wk, bk):
        y = lax.conv_general_dilated(
            z.astype(jnp.bfloat16), wk.astype(jnp.bfloat16),
            window_strides=(1, 1), padding="SAME",
            dimension_numbers=("NHWC", "HWIO", "NHWC"),
            preferred_element_type=jnp.float32)
        return y + bk.reshape(1, 1, 1, -1)

    def bn_relu_ref(y, g, be):
        # stats from the f32 conv output (as the kernel accumulates them),
        # BN applied to the bf16-stored activation (as the kernel reloads it).
        m = jnp.mean(y, axis=(0, 1, 2))
        v = jnp.var(y, axis=(0, 1, 2))
        yq = y.astype(jnp.bfloat16).astype(jnp.float32)
        yn = (yq - m) * lax.rsqrt(v + EPS) * g.reshape(-1) + be.reshape(-1)
        return jnp.maximum(yn, 0.0)

    y1 = conv(x, params["w1"], params["b1"])
    a1 = bn_relu_ref(y1, params["gamma1"], params["beta1"])
    y2 = conv(a1, params["w2"], params["b2"])
    a2 = bn_relu_ref(y2, params["gamma2"], params["beta2"])
    return jnp.transpose(a2, (0, 3, 1, 2))


if __name__ == "__main__":
    key = jax.random.PRNGKey(0)
    kx, kp = jax.random.split(key)

    in_ch, out_ch = 4, 8
    x = jax.random.normal(kx, (2, in_ch, 16, 16), jnp.float32)   # NCHW like PyTorch
    params = init_params(kp, in_ch, out_ch)

    # Warm the capability probes eagerly (outside jit tracing).
    _probe_roll()
    _single_buffer_supported()

    out = jax.block_until_ready(jax.jit(double_conv_apply)(x, params))
    assert out.shape == (2, out_ch, 16, 16), out.shape

    ref = jax.block_until_ready(ref_forward(x, params))
    err = float(jnp.max(jnp.abs(out - ref)))
    assert err < 3e-2, err

    print("KERNEL_OK")
</pallas_src>

<mosaic_0001>
module attributes {stable_mosaic.version = 11 : i64} {
  func.func @k(%arg0: memref<16x128xf32, #tpu.memory_space<vmem>>, %arg1: memref<16x128xf32, #tpu.memory_space<vmem>>) attributes {dimension_semantics = [], scalar_prefetch = 0 : i64, scratch_operands = 0 : i64, tpu.core_type = #tpu.core_type<tc>} {
    %c0 = arith.constant 0 : index
    %c0_0 = arith.constant 0 : index
    %0 = vector.load %arg0[%c0, %c0_0] : memref<16x128xf32, #tpu.memory_space<vmem>>, vector<16x128xf32>
    %c1_i32 = arith.constant 1 : i32
    %1 = tpu.dynamic_rotate %0 by %c1_i32 dim 0 : vector<16x128xf32>, i32 -> vector<16x128xf32>
    %c0_1 = arith.constant 0 : index
    %c0_2 = arith.constant 0 : index
    %2 = vector.load %arg1[%c0_1, %c0_2] : memref<16x128xf32, #tpu.memory_space<vmem>>, vector<16x128xf32>
    tpu.vector_store %arg1[%c0_1, %c0_2], %1 {strides = array<i32>} : memref<16x128xf32, #tpu.memory_space<vmem>>, vector<16x128xf32>,
    return
  }
}

module attributes {stable_mosaic.version = 11 : i64} {
  func.func @k(%arg0: i32, %arg1: memref<8x128xf32, #tpu.memory_space<vmem>>, %arg2: memref<8x128xf32, #tpu.memory_space<vmem>>) attributes {dimension_semantics = [#tpu.dimension_semantics<arbitrary>], iteration_bounds = array<i64: 2>, scalar_prefetch = 0 : i64, scratch_operands = 0 : i64, tpu.core_type = #tpu.core_type<tc>, window_params = [{pipeline_mode = #tpu.pipeline_mode<synchronous>, transform_indices = @transform_0, window_bounds = array<i64: 8, 128>}, {pipeline_mode = #tpu.pipeline_mode<synchronous>, transform_indices = @transform_1, window_bounds = array<i64: 8, 128>}]} {
    %c0 = arith.constant 0 : index
    %c0_0 = arith.constant 0 : index
    %0 = vector.load %arg1[%c0, %c0_0] : memref<8x128xf32, #tpu.memory_space<vmem>>, vector<8x128xf32>
    %cst = arith.constant 1.000000e+00 : f32
    %1 = vector.broadcast %cst : f32 to vector<8x128xf32>
    %2 = arith.addf %0, %1 : vector<8x128xf32>
    %c0_1 = arith.constant 0 : index
    %c0_2 = arith.constant 0 : index
    %3 = vector.load %arg2[%c0_1, %c0_2] : memref<8x128xf32, #tpu.memory_space<vmem>>, vector<8x128xf32>
    tpu.vector_store %arg2[%c0_1, %c0_2], %2 {strides = array<i32>} : memref<8x128xf32, #tpu.memory_space<vmem>>, vector<8x128xf32>,
    return
  }
  func.func @transform_0(%arg0: i32) -> (i32, i32) {
    %c0_i32 = arith.constant 0 : i32
    %c0_i32_0 = arith.constant 0 : i32
    %c0_i32_1 = arith.constant 0 : i32
    return %c0_i32, %c0_i32_0 : i32, i32
  }
  func.func @transform_1(%arg0: i32) -> (i32, i32) {
    %c0_i32 = arith.constant 0 : i32
    %c0_i32_0 = arith.constant 0 : i32
    %c0_i32_1 = arith.constant 0 : i32
    return %c0_i32, %c0_i32_0 : i32, i32
  }
}

module attributes {stable_mosaic.version = 11 : i64} {
  func.func @_conv3x3_bn_stats_kernel(%arg0: i32, %arg1: i32, %arg2: i32, %arg3: memref<1x1x16x128xbf16, #tpu.memory_space<vmem>>, %arg4: memref<1x16x16x128xbf16, #tpu.memory_space<vmem>>, %arg5: memref<1x1x16x128xbf16, #tpu.memory_space<vmem>>, %arg6: memref<3x384x128xbf16, #tpu.memory_space<vmem>>, %arg7: memref<1x128xf32, #tpu.memory_space<vmem>>, %arg8: memref<1x128xf32, #tpu.memory_space<vmem>>, %arg9: memref<1x128xf32, #tpu.memory_space<vmem>>, %arg10: memref<1x16x16x128xbf16, #tpu.memory_space<vmem>>, %arg11: memref<1x1x1x128xf32, #tpu.memory_space<vmem>>, %arg12: memref<1x1x1x128xf32, #tpu.memory_space<vmem>>) attributes {dimension_semantics = [#tpu.dimension_semantics<parallel>, #tpu.dimension_semantics<parallel>, #tpu.dimension_semantics<arbitrary>], iteration_bounds = array<i64: 2, 1, 1>, scalar_prefetch = 0 : i64, scratch_operands = 0 : i64, tpu.core_type = #tpu.core_type<tc>, window_params = [{transform_indices = @transform_0, window_bounds = array<i64: 1, 1, 16, 128>}, {transform_indices = @transform_1, window_bounds = array<i64: 1, 16, 16, 128>}, {transform_indices = @transform_2, window_bounds = array<i64: 1, 1, 16, 128>}, {pipeline_mode = #tpu.pipeline_mode<synchronous>, transform_indices = @transform_3, window_bounds = array<i64: 3, 384, 128>}, {pipeline_mode = #tpu.pipeline_mode<synchronous>, transform_indices = @transform_4, window_bounds = array<i64: 1, 128>}, {pipeline_mode = #tpu.pipeline_mode<synchronous>, transform_indices = @transform_5, window_bounds = array<i64: 1, 128>}, {pipeline_mode = #tpu.pipeline_mode<synchronous>, transform_indices = @transform_6, window_bounds = array<i64: 1, 128>}, {transform_indices = @transform_7, window_bounds = array<i64: 1, 16, 16, 128>}, {transform_indices = @transform_8, window_bounds = array<i64: 1, 1, 1, 128>}, {transform_indices = @transform_9, window_bounds = array<i64: 1, 1, 1, 128>}]} {
    %c1_i32 = arith.constant 1 : i32
    %0 = arith.muli %arg1, %c1_i32 : i32
    %1 = arith.addi %0, %arg2 : i32
    %c0 = arith.constant 0 : index
    %c0_0 = arith.constant 0 : index
    %c0_1 = arith.constant 0 : index
    %c0_2 = arith.constant 0 : index
    %2 = vector.load %arg3[%c0, %c0_0, %c0_1, %c0_2] : memref<1x1x16x128xbf16, #tpu.memory_space<vmem>>, vector<1x1x16x128xbf16>
    %3 = vector.shape_cast %2 : vector<1x1x16x128xbf16> to vector<1x16x128xbf16>
    %4 = arith.extf %3 : vector<1x16x128xbf16> to vector<1x16x128xf32>
    %c0_3 = arith.constant 0 : index
    %c0_4 = arith.constant 0 : index
    %5 = vector.load %arg8[%c0_3, %c0_4] : memref<1x128xf32, #tpu.memory_space<vmem>>, vector<1x128xf32>
    %6 = vector.shape_cast %5 : vector<1x128xf32> to vector<128xf32>
    %7 = vector.shape_cast %6 : vector<128xf32> to vector<1x1x128xf32>
    %8 = vector.broadcast %7 : vector<1x1x128xf32> to vector<1x16x128xf32>
    %9 = arith.mulf %4, %8 : vector<1x16x128xf32>
    %c0_5 = arith.constant 0 : index
    %c0_6 = arith.constant 0 : index
    %10 = vector.load %arg9[%c0_5, %c0_6] : memref<1x128xf32, #tpu.memory_space<vmem>>, vector<1x128xf32>
    %11 = vector.shape_cast %10 : vector<1x128xf32> to vector<128xf32>
    %12 = vector.shape_cast %11 : vector<128xf32> to vector<1x1x128xf32>
    %13 = vector.broadcast %12 : vector<1x1x128xf32> to vector<1x16x128xf32>
    %14 = arith.addf %9, %13 : vector<1x16x128xf32>
    %cst = arith.constant 0.000000e+00 : f32
    %15 = vector.broadcast %cst : f32 to vector<1x16x128xf32>
    %16 = arith.maximumf %14, %15 : vector<1x16x128xf32>
    %c0_7 = arith.constant 0 : index
    %c0_8 = arith.constant 0 : index
    %c0_9 = arith.constant 0 : index
    %c0_10 = arith.constant 0 : index
    %17 = vector.load %arg4[%c0_7, %c0_8, %c0_9, %c0_10] : memref<1x16x16x128xbf16, #tpu.memory_space<vmem>>, vector<1x16x16x128xbf16>
    %18 = vector.shape_cast %17 : vector<1x16x16x128xbf16> to vector<16x16x128xbf16>
    %19 = arith.extf %18 : vector<16x16x128xbf16> to vector<16x16x128xf32>
    %c0_11 = arith.constant 0 : index
    %c0_12 = arith.constant 0 : index
    %20 = vector.load %arg8[%c0_11, %c0_12] : memref<1x128xf32, #tpu.memory_space<vmem>>, vector<1x128xf32>
    %21 = vector.shape_cast %20 : vector<1x128xf32> to vector<128xf32>
    %22 = vector.shape_cast %21 : vector<128xf32> to vector<1x1x128xf32>
    %23 = vector.broadcast %22 : vector<1x1x128xf32> to vector<16x16x128xf32>
    %24 = arith.mulf %19, %23 : vector<16x16x128xf32>
    %c0_13 = arith.constant 0 : index
    %c0_14 = arith.constant 0 : index
    %25 = vector.load %arg9[%c0_13, %c0_14] : memref<1x128xf32, #tpu.memory_space<vmem>>, vector<1x128xf32>
    %26 = vector.shape_cast %25 : vector<1x128xf32> to vector<128xf32>
    %27 = vector.shape_cast %26 : vector<128xf32> to vector<1x1x128xf32>
    %28 = vector.broadcast %27 : vector<1x1x128xf32> to vector<16x16x128xf32>
    %29 = arith.addf %24, %28 : vector<16x16x128xf32>
    %cst_15 = arith.constant 0.000000e+00 : f32
    %30 = vector.broadcast %cst_15 : f32 to vector<16x16x128xf32>
    %31 = arith.maximumf %29, %30 : vector<16x16x128xf32>
    %c0_16 = arith.constant 0 : index
    %c0_17 = arith.constant 0 : index
    %c0_18 = arith.constant 0 : index
    %c0_19 = arith.constant 0 : index
    %32 = vector.load %arg5[%c0_16, %c0_17, %c0_18, %c0_19] : memref<1x1x16x128xbf16, #tpu.memory_space<vmem>>, vector<1x1x16x128xbf16>
    %33 = vector.shape_cast %32 : vector<1x1x16x128xbf16> to vector<1x16x128xbf16>
    %34 = arith.extf %33 : vector<1x16x128xbf16> to vector<1x16x128xf32>
    %c0_20 = arith.constant 0 : index
    %c0_21 = arith.constant 0 : index
    %35 = vector.load %arg8[%c0_20, %c0_21] : memref<1x128xf32, #tpu.memory_space<vmem>>, vector<1x128xf32>
    %36 = vector.shape_cast %35 : vector<1x128xf32> to vector<128xf32>
    %37 = vector.shape_cast %36 : vector<128xf32> to vector<1x1x128xf32>
    %38 = vector.broadcast %37 : vector<1x1x128xf32> to vector<1x16x128xf32>
    %39 = arith.mulf %34, %38 : vector<1x16x128xf32>
    %c0_22 = arith.constant 0 : index
    %c0_23 = arith.constant 0 : index
    %40 = vector.load %arg9[%c0_22, %c0_23] : memref<1x128xf32, #tpu.memory_space<vmem>>, vector<1x128xf32>
    %41 = vector.shape_cast %40 : vector<1x128xf32> to vector<128xf32>
    %42 = vector.shape_cast %41 : vector<128xf32> to vector<1x1x128xf32>
    %43 = vector.broadcast %42 : vector<1x1x128xf32> to vector<1x16x128xf32>
    %44 = arith.addf %39, %43 : vector<1x16x128xf32>
    %cst_24 = arith.constant 0.000000e+00 : f32
    %45 = vector.broadcast %cst_24 : f32 to vector<1x16x128xf32>
    %46 = arith.maximumf %44, %45 : vector<1x16x128xf32>
    %c0_i32 = arith.constant 0 : i32
    %47 = arith.cmpi eq, %1, %c0_i32 : i32
    %cst_25 = arith.constant 0.000000e+00 : f32
    %48 = vector.broadcast %cst_25 : f32 to vector<1x16x128xf32>
    %49 = arith.select %47, %48, %16 : vector<1x16x128xf32>
    %c0_i32_26 = arith.constant 0 : i32
    %50 = arith.cmpi eq, %1, %c0_i32_26 : i32
    %cst_27 = arith.constant 0.000000e+00 : f32
    %51 = vector.broadcast %cst_27 : f32 to vector<1x16x128xf32>
    %52 = arith.select %50, %51, %46 : vector<1x16x128xf32>
    %53 = tpu.concatenate %49, %31, %52 in 0 : vector<1x16x128xf32>, vector<16x16x128xf32>, vector<1x16x128xf32> -> vector<18x16x128xf32>
    %54 = arith.truncf %53 : vector<18x16x128xf32> to vector<18x16x128xbf16>
    %55 = vector.extract_strided_slice %54 {offsets = [0, 0, 0], sizes = [16, 16, 128], strides = [1, 1, 1]} : vector<18x16x128xbf16> to vector<16x16x128xbf16>
    %56 = vector.extract_strided_slice %54 {offsets = [1, 0, 0], sizes = [16, 16, 128], strides = [1, 1, 1]} : vector<18x16x128xbf16> to vector<16x16x128xbf16>
    %57 = vector.extract_strided_slice %54 {offsets = [2, 0, 0], sizes = [16, 16, 128], strides = [1, 1, 1]} : vector<18x16x128xbf16> to vector<16x16x128xbf16>
    %58 = tpu.concatenate %55, %56, %57 in 2 : vector<16x16x128xbf16>, vector<16x16x128xbf16>, vector<16x16x128xbf16> -> vector<16x16x384xbf16>
    %59 = vector.shape_cast %58 : vector<16x16x384xbf16> to vector<256x384xbf16>
    %c0_28 = arith.constant 0 : index
    %c0_29 = arith.constant 0 : index
    %c0_30 = arith.constant 0 : index
    %60 = vector.load %arg6[%c0_28, %c0_29, %c0_30] : memref<3x384x128xbf16, #tpu.memory_space<vmem>>, vector<1x384x128xbf16>
    %61 = vector.shape_cast %60 : vector<1x384x128xbf16> to vector<384x128xbf16>
    %cst_31 = arith.constant dense<0.000000e+00> : vector<256x128xf32>
    %62 = tpu.matmul %59, %61, %cst_31 {dimension_numbers = #tpu.dot_dimension_numbers<[1], [0], [0], [1], [0, 0, 1, 1], [], []>} : vector<256x384xbf16>, vector<384x128xbf16>, vector<256x128xf32> -> vector<256x128xf32>
    %c1 = arith.constant 1 : index
    %c0_32 = arith.constant 0 : index
    %c0_33 = arith.constant 0 : index
    %63 = vector.load %arg6[%c1, %c0_32, %c0_33] : memref<3x384x128xbf16, #tpu.memory_space<vmem>>, vector<1x384x128xbf16>
    %64 = vector.shape_cast %63 : vector<1x384x128xbf16> to vector<384x128xbf16>
    %cst_34 = arith.constant dense<0.000000e+00> : vector<256x128xf32>
    %65 = tpu.matmul %59, %64, %cst_34 {dimension_numbers = #tpu.dot_dimension_numbers<[1], [0], [0], [1], [0, 0, 1, 1], [], []>} : vector<256x384xbf16>, vector<384x128xbf16>, vector<256x128xf32> -> vector<256x128xf32>
    %c2 = arith.constant 2 : index
    %c0_35 = arith.constant 0 : index
    %c0_36 = arith.constant 0 : index
    %66 = vector.load %arg6[%c2, %c0_35, %c0_36] : memref<3x384x128xbf16, #tpu.memory_space<vmem>>, vector<1x384x128xbf16>
    %67 = vector.shape_cast %66 : vector<1x384x128xbf16> to vector<384x128xbf16>
    %cst_37 = arith.constant dense<0.000000e+00> : vector<256x128xf32>
    %68 = tpu.matmul %59, %67, %cst_37 {dimension_numbers = #tpu.dot_dimension_numbers<[1], [0], [0], [1], [0, 0, 1, 1], [], []>} : vector<256x384xbf16>, vector<384x128xbf16>, vector<256x128xf32> -> vector<256x128xf32>
    %69 = vector.shape_cast %62 : vector<256x128xf32> to vector<16x16x128xf32>
    %70 = vector.shape_cast %65 : vector<256x128xf32> to vector<16x16x128xf32>
    %71 = vector.shape_cast %68 : vector<256x128xf32> to vector<16x16x128xf32>
    %cst_38 = arith.constant 0.000000e+00 : f32
    %72 = vector.broadcast %cst_38 : f32 to vector<16x1x128xf32>
    %73 = vector.extract_strided_slice %69 {offsets = [0, 0, 0], sizes = [16, 15, 128], strides = [1, 1, 1]} : vector<16x16x128xf32> to vector<16x15x128xf32>
    %74 = tpu.concatenate %72, %73 in 1 : vector<16x1x128xf32>, vector<16x15x128xf32> -> vector<16x16x128xf32>
    %75 = arith.addf %74, %70 : vector<16x16x128xf32>
    %76 = vector.extract_strided_slice %71 {offsets = [0, 1, 0], sizes = [16, 15, 128], strides = [1, 1, 1]} : vector<16x16x128xf32> to vector<16x15x128xf32>
    %77 = tpu.concatenate %76, %72 in 1 : vector<16x15x128xf32>, vector<16x1x128xf32> -> vector<16x16x128xf32>
    %78 = arith.addf %75, %77 : vector<16x16x128xf32>
    %c0_39 = arith.constant 0 : index
    %c0_40 = arith.constant 0 : index
    %79 = vector.load %arg7[%c0_39, %c0_40] : memref<1x128xf32, #tpu.memory_space<vmem>>, vector<1x128xf32>
    %80 = vector.shape_cast %79 : vector<1x128xf32> to vector<128xf32>
    %81 = vector.shape_cast %80 : vector<128xf32> to vector<1x1x128xf32>
    %82 = vector.broadcast %81 : vector<1x1x128xf32> to vector<16x16x128xf32>
    %83 = arith.addf %78, %82 : vector<16x16x128xf32>
    %84 = arith.truncf %83 : vector<16x16x128xf32> to vector<16x16x128xbf16>
    %c0_41 = arith.constant 0 : index
    %c0_42 = arith.constant 0 : index
    %c0_43 = arith.constant 0 : index
    %c0_44 = arith.constant 0 : index
    %85 = vector.load %arg10[%c0_41, %c0_42, %c0_43, %c0_44] : memref<1x16x16x128xbf16, #tpu.memory_space<vmem>>, vector<1x16x16x128xbf16>
    %86 = vector.shape_cast %85 : vector<1x16x16x128xbf16> to vector<16x16x128xbf16>
    %87 = vector.shape_cast %84 : vector<16x16x128xbf16> to vector<1x16x16x128xbf16>
    tpu.vector_store %arg10[%c0_41, %c0_42, %c0_43, %c0_44], %87 {strides = array<i32>} : memref<1x16x16x128xbf16, #tpu.memory_space<vmem>>, vector<1x16x16x128xbf16>,
    %c0_i32_45 = arith.constant 0 : i32
    %88 = arith.cmpi eq, %arg2, %c0_i32_45 : i32
    %89 = arith.extui %88 : i1 to i32
    %c0_i32_46 = arith.constant 0 : i32
    %90 = arith.cmpi ne, %89, %c0_i32_46 : i32
    scf.if %90 {
      %cst_65 = arith.constant 0.000000e+00 : f32
      %102 = vector.broadcast %cst_65 : f32 to vector<1x1x1x128xf32>
      %c0_66 = arith.constant 0 : index
      %c0_67 = arith.constant 0 : index
      %c0_68 = arith.constant 0 : index
      %c0_69 = arith.constant 0 : index
      %103 = vector.load %arg11[%c0_66, %c0_67, %c0_68, %c0_69] : memref<1x1x1x128xf32, #tpu.memory_space<vmem>>, vector<1x1x1x128xf32>
      tpu.vector_store %arg11[%c0_66, %c0_67, %c0_68, %c0_69], %102 {strides = array<i32>} : memref<1x1x1x128xf32, #tpu.memory_space<vmem>>, vector<1x1x1x128xf32>,
      %cst_70 = arith.constant 0.000000e+00 : f32
      %104 = vector.broadcast %cst_70 : f32 to vector<1x1x1x128xf32>
      %c0_71 = arith.constant 0 : index
      %c0_72 = arith.constant 0 : index
      %c0_73 = arith.constant 0 : index
      %c0_74 = arith.constant 0 : index
      %105 = vector.load %arg12[%c0_71, %c0_72, %c0_73, %c0_74] : memref<1x1x1x128xf32, #tpu.memory_space<vmem>>, vector<1x1x1x128xf32>
      tpu.vector_store %arg12[%c0_71, %c0_72, %c0_73, %c0_74], %104 {strides = array<i32>} : memref<1x1x1x128xf32, #tpu.memory_space<vmem>>, vector<1x1x1x128xf32>,
    } else {
    }
    %c0_47 = arith.constant 0 : index
    %c0_48 = arith.constant 0 : index
    %c0_49 = arith.constant 0 : index
    %c0_50 = arith.constant 0 : index
    %91 = vector.load %arg11[%c0_47, %c0_48, %c0_49, %c0_50] : memref<1x1x1x128xf32, #tpu.memory_space<vmem>>, vector<1x1x1x128xf32>
    %cst_51 = arith.constant dense<0.000000e+00> : vector<128xf32>
    %92 = vector.multi_reduction <add>, %83, %cst_51 [0, 1] : vector<16x16x128xf32> to vector<128xf32>
    %93 = vector.shape_cast %92 : vector<128xf32> to vector<1x1x1x128xf32>
    %94 = arith.addf %91, %93 : vector<1x1x1x128xf32>
    %c0_52 = arith.constant 0 : index
    %c0_53 = arith.constant 0 : index
    %c0_54 = arith.constant 0 : index
    %c0_55 = arith.constant 0 : index
    %95 = vector.load %arg11[%c0_52, %c0_53, %c0_54, %c0_55] : memref<1x1x1x128xf32, #tpu.memory_space<vmem>>, vector<1x1x1x128xf32>
    tpu.vector_store %arg11[%c0_52, %c0_53, %c0_54, %c0_55], %94 {strides = array<i32>} : memref<1x1x1x128xf32, #tpu.memory_space<vmem>>, vector<1x1x1x128xf32>,
    %c0_56 = arith.constant 0 : index
    %c0_57 = arith.constant 0 : index
    %c0_58 = arith.constant 0 : index
    %c0_59 = arith.constant 0 : index
    %96 = vector.load %arg12[%c0_56, %c0_57, %c0_58, %c0_59] : memref<1x1x1x128xf32, #tpu.memory_space<vmem>>, vector<1x1x1x128xf32>
    %97 = arith.mulf %83, %83 : vector<16x16x128xf32>
    %cst_60 = arith.constant dense<0.000000e+00> : vector<128xf32>
    %98 = vector.multi_reduction <add>, %97, %cst_60 [0, 1] : vector<16x16x128xf32> to vector<128xf32>
    %99 = vector.shape_cast %98 : vector<128xf32> to vector<1x1x1x128xf32>
    %100 = arith.addf %96, %99 : vector<1x1x1x128xf32>
    %c0_61 = arith.constant 0 : index
    %c0_62 = arith.constant 0 : index
    %c0_63 = arith.constant 0 : index
    %c0_64 = arith.constant 0 : index
    %101 = vector.load %arg12[%c0_61, %c0_62, %c0_63, %c0_64] : memref<1x1x1x128xf32, #tpu.memory_space<vmem>>, vector<1x1x1x128xf32>
    tpu.vector_store %arg12[%c0_61, %c0_62, %c0_63, %c0_64], %100 {strides = array<i32>} : memref<1x1x1x128xf32, #tpu.memory_space<vmem>>, vector<1x1x1x128xf32>,
    return
  }
  func.func @transform_0(%arg0: i32, %arg1: i32, %arg2: i32) -> (i32, i32, i32, i32) {
    %c1_i32 = arith.constant 1 : i32
    %0 = arith.muli %arg1, %c1_i32 : i32
    %1 = arith.addi %0, %arg2 : i32
    %c16_i32 = arith.constant 16 : i32
    %2 = arith.muli %1, %c16_i32 : i32
    %c1_i32_0 = arith.constant 1 : i32
    %3 = arith.subi %2, %c1_i32_0 : i32
    %c0_i32 = arith.constant 0 : i32
    %4 = arith.maxsi %3, %c0_i32 : i32
    %c0_i32_1 = arith.constant 0 : i32
    %c0_i32_2 = arith.constant 0 : i32
    %c0_i32_3 = arith.constant 0 : i32
    return %arg0, %4, %c0_i32_1, %c0_i32_2 : i32, i32, i32, i32
  }
  func.func @transform_1(%arg0: i32, %arg1: i32, %arg2: i32) -> (i32, i32, i32, i32) {
    %c1_i32 = arith.constant 1 : i32
    %0 = arith.muli %arg1, %c1_i32 : i32
    %1 = arith.addi %0, %arg2 : i32
    %c0_i32 = arith.constant 0 : i32
    %c0_i32_0 = arith.constant 0 : i32
    %c0_i32_1 = arith.constant 0 : i32
    return %arg0, %1, %c0_i32, %c0_i32_0 : i32, i32, i32, i32
  }
  func.func @transform_2(%arg0: i32, %arg1: i32, %arg2: i32) -> (i32, i32, i32, i32) {
    %c1_i32 = arith.constant 1 : i32
    %0 = arith.muli %arg1, %c1_i32 : i32
    %1 = arith.addi %0, %arg2 : i32
    %c1_i32_0 = arith.constant 1 : i32
    %2 = arith.addi %1, %c1_i32_0 : i32
    %c16_i32 = arith.constant 16 : i32
    %3 = arith.muli %2, %c16_i32 : i32
    %c15_i32 = arith.constant 15 : i32
    %4 = arith.minsi %3, %c15_i32 : i32
    %c0_i32 = arith.constant 0 : i32
    %c0_i32_1 = arith.constant 0 : i32
    %c0_i32_2 = arith.constant 0 : i32
    return %arg0, %4, %c0_i32, %c0_i32_1 : i32, i32, i32, i32
  }
  func.func @transform_3(%arg0: i32, %arg1: i32, %arg2: i32) -> (i32, i32, i32) {
    %c0_i32 = arith.constant 0 : i32
    %c0_i32_0 = arith.constant 0 : i32
    %c0_i32_1 = arith.constant 0 : i32
    %c0_i32_2 = arith.constant 0 : i32
    return %c0_i32, %c0_i32_0, %c0_i32_1 : i32, i32, i32
  }
  func.func @transform_4(%arg0: i32, %arg1: i32, %arg2: i32) -> (i32, i32) {
    %c0_i32 = arith.constant 0 : i32
    %c0_i32_0 = arith.constant 0 : i32
    %c0_i32_1 = arith.constant 0 : i32
    return %c0_i32, %c0_i32_0 : i32, i32
  }
  func.func @transform_5(%arg0: i32, %arg1: i32, %arg2: i32) -> (i32, i32) {
    %c0_i32 = arith.constant 0 : i32
    %c0_i32_0 = arith.constant 0 : i32
    %c0_i32_1 = arith.constant 0 : i32
    return %c0_i32, %c0_i32_0 : i32, i32
  }
  func.func @transform_6(%arg0: i32, %arg1: i32, %arg2: i32) -> (i32, i32) {
    %c0_i32 = arith.constant 0 : i32
    %c0_i32_0 = arith.constant 0 : i32
    %c0_i32_1 = arith.constant 0 : i32
    return %c0_i32, %c0_i32_0 : i32, i32
  }
  func.func @transform_7(%arg0: i32, %arg1: i32, %arg2: i32) -> (i32, i32, i32, i32) {
    %c1_i32 = arith.constant 1 : i32
    %0 = arith.muli %arg1, %c1_i32 : i32
    %1 = arith.addi %0, %arg2 : i32
    %c0_i32 = arith.constant 0 : i32
    %c0_i32_0 = arith.constant 0 : i32
    %c0_i32_1 = arith.constant 0 : i32
    return %arg0, %1, %c0_i32, %c0_i32_0 : i32, i32, i32, i32
  }
  func.func @transform_8(%arg0: i32, %arg1: i32, %arg2: i32) -> (i32, i32, i32, i32) {
    %c0_i32 = arith.constant 0 : i32
    %c0_i32_0 = arith.constant 0 : i32
    %c0_i32_1 = arith.constant 0 : i32
    return %arg0, %arg1, %c0_i32, %c0_i32_0 : i32, i32, i32, i32
  }
  func.func @transform_9(%arg0: i32, %arg1: i32, %arg2: i32) -> (i32, i32, i32, i32) {
    %c0_i32 = arith.constant 0 : i32
    %c0_i32_0 = arith.constant 0 : i32
    %c0_i32_1 = arith.constant 0 : i32
    return %arg0, %arg1, %c0_i32, %c0_i32_0 : i32, i32, i32, i32
  }
}

module attributes {stable_mosaic.version = 11 : i64} {
  func.func @_conv3x3_bn_stats_kernel(%arg0: i32, %arg1: i32, %arg2: i32, %arg3: memref<1x1x16x128xf32, #tpu.memory_space<vmem>>, %arg4: memref<1x16x16x128xf32, #tpu.memory_space<vmem>>, %arg5: memref<1x1x16x128xf32, #tpu.memory_space<vmem>>, %arg6: memref<3x384x128xbf16, #tpu.memory_space<vmem>>, %arg7: memref<1x128xf32, #tpu.memory_space<vmem>>, %arg8: memref<1x128xf32, #tpu.memory_space<vmem>>, %arg9: memref<1x128xf32, #tpu.memory_space<vmem>>, %arg10: memref<1x16x16x128xbf16, #tpu.memory_space<vmem>>, %arg11: memref<1x1x1x128xf32, #tpu.memory_space<vmem>>, %arg12: memref<1x1x1x128xf32, #tpu.memory_space<vmem>>) attributes {dimension_semantics = [#tpu.dimension_semantics<parallel>, #tpu.dimension_semantics<parallel>, #tpu.dimension_semantics<arbitrary>], iteration_bounds = array<i64: 2, 1, 1>, scalar_prefetch = 0 : i64, scratch_operands = 0 : i64, tpu.core_type = #tpu.core_type<tc>, window_params = [{transform_indices = @transform_0, window_bounds = array<i64: 1, 1, 16, 128>}, {transform_indices = @transform_1, window_bounds = array<i64: 1, 16, 16, 128>}, {transform_indices = @transform_2, window_bounds = array<i64: 1, 1, 16, 128>}, {pipeline_mode = #tpu.pipeline_mode<synchronous>, transform_indices = @transform_3, window_bounds = array<i64: 3, 384, 128>}, {pipeline_mode = #tpu.pipeline_mode<synchronous>, transform_indices = @transform_4, window_bounds = array<i64: 1, 128>}, {pipeline_mode = #tpu.pipeline_mode<synchronous>, transform_indices = @transform_5, window_bounds = array<i64: 1, 128>}, {pipeline_mode = #tpu.pipeline_mode<synchronous>, transform_indices = @transform_6, window_bounds = array<i64: 1, 128>}, {transform_indices = @transform_7, window_bounds = array<i64: 1, 16, 16, 128>}, {transform_indices = @transform_8, window_bounds = array<i64: 1, 1, 1, 128>}, {transform_indices = @transform_9, window_bounds = array<i64: 1, 1, 1, 128>}]} {
    %c1_i32 = arith.constant 1 : i32
    %0 = arith.muli %arg1, %c1_i32 : i32
    %1 = arith.addi %0, %arg2 : i32
    %c0 = arith.constant 0 : index
    %c0_0 = arith.constant 0 : index
    %c0_1 = arith.constant 0 : index
    %c0_2 = arith.constant 0 : index
    %2 = vector.load %arg3[%c0, %c0_0, %c0_1, %c0_2] : memref<1x1x16x128xf32, #tpu.memory_space<vmem>>, vector<1x1x16x128xf32>
    %3 = vector.shape_cast %2 : vector<1x1x16x128xf32> to vector<1x16x128xf32>
    %c0_3 = arith.constant 0 : index
    %c0_4 = arith.constant 0 : index
    %c0_5 = arith.constant 0 : index
    %c0_6 = arith.constant 0 : index
    %4 = vector.load %arg4[%c0_3, %c0_4, %c0_5, %c0_6] : memref<1x16x16x128xf32, #tpu.memory_space<vmem>>, vector<1x16x16x128xf32>
    %5 = vector.shape_cast %4 : vector<1x16x16x128xf32> to vector<16x16x128xf32>
    %c0_7 = arith.constant 0 : index
    %c0_8 = arith.constant 0 : index
    %c0_9 = arith.constant 0 : index
    %c0_10 = arith.constant 0 : index
    %6 = vector.load %arg5[%c0_7, %c0_8, %c0_9, %c0_10] : memref<1x1x16x128xf32, #tpu.memory_space<vmem>>, vector<1x1x16x128xf32>
    %7 = vector.shape_cast %6 : vector<1x1x16x128xf32> to vector<1x16x128xf32>
    %c0_i32 = arith.constant 0 : i32
    %8 = arith.cmpi eq, %1, %c0_i32 : i32
    %cst = arith.constant 0.000000e+00 : f32
    %9 = vector.broadcast %cst : f32 to vector<1x16x128xf32>
    %10 = arith.select %8, %9, %3 : vector<1x16x128xf32>
    %c0_i32_11 = arith.constant 0 : i32
    %11 = arith.cmpi eq, %1, %c0_i32_11 : i32
    %cst_12 = arith.constant 0.000000e+00 : f32
    %12 = vector.broadcast %cst_12 : f32 to vector<1x16x128xf32>
    %13 = arith.select %11, %12, %7 : vector<1x16x128xf32>
    %14 = tpu.concatenate %10, %5, %13 in 0 : vector<1x16x128xf32>, vector<16x16x128xf32>, vector<1x16x128xf32> -> vector<18x16x128xf32>
    %15 = arith.truncf %14 : vector<18x16x128xf32> to vector<18x16x128xbf16>
    %16 = vector.extract_strided_slice %15 {offsets = [0, 0, 0], sizes = [16, 16, 128], strides = [1, 1, 1]} : vector<18x16x128xbf16> to vector<16x16x128xbf16>
    %17 = vector.extract_strided_slice %15 {offsets = [1, 0, 0], sizes = [16, 16, 128], strides = [1, 1, 1]} : vector<18x16x128xbf16> to vector<16x16x128xbf16>
    %18 = vector.extract_strided_slice %15 {offsets = [2, 0, 0], sizes = [16, 16, 128], strides = [1, 1, 1]} : vector<18x16x128xbf16> to vector<16x16x128xbf16>
    %19 = tpu.concatenate %16, %17, %18 in 2 : vector<16x16x128xbf16>, vector<16x16x128xbf16>, vector<16x16x128xbf16> -> vector<16x16x384xbf16>
    %20 = vector.shape_cast %19 : vector<16x16x384xbf16> to vector<256x384xbf16>
    %c0_13 = arith.constant 0 : index
    %c0_14 = arith.constant 0 : index
    %c0_15 = arith.constant 0 : index
    %21 = vector.load %arg6[%c0_13, %c0_14, %c0_15] : memref<3x384x128xbf16, #tpu.memory_space<vmem>>, vector<1x384x128xbf16>
    %22 = vector.shape_cast %21 : vector<1x384x128xbf16> to vector<384x128xbf16>
    %cst_16 = arith.constant dense<0.000000e+00> : vector<256x128xf32>
    %23 = tpu.matmul %20, %22, %cst_16 {dimension_numbers = #tpu.dot_dimension_numbers<[1], [0], [0], [1], [0, 0, 1, 1], [], []>} : vector<256x384xbf16>, vector<384x128xbf16>, vector<256x128xf32> -> vector<256x128xf32>
    %c1 = arith.constant 1 : index
    %c0_17 = arith.constant 0 : index
    %c0_18 = arith.constant 0 : index
    %24 = vector.load %arg6[%c1, %c0_17, %c0_18] : memref<3x384x128xbf16, #tpu.memory_space<vmem>>, vector<1x384x128xbf16>
    %25 = vector.shape_cast %24 : vector<1x384x128xbf16> to vector<384x128xbf16>
    %cst_19 = arith.constant dense<0.000000e+00> : vector<256x128xf32>
    %26 = tpu.matmul %20, %25, %cst_19 {dimension_numbers = #tpu.dot_dimension_numbers<[1], [0], [0], [1], [0, 0, 1, 1], [], []>} : vector<256x384xbf16>, vector<384x128xbf16>, vector<256x128xf32> -> vector<256x128xf32>
    %c2 = arith.constant 2 : index
    %c0_20 = arith.constant 0 : index
    %c0_21 = arith.constant 0 : index
    %27 = vector.load %arg6[%c2, %c0_20, %c0_21] : memref<3x384x128xbf16, #tpu.memory_space<vmem>>, vector<1x384x128xbf16>
    %28 = vector.shape_cast %27 : vector<1x384x128xbf16> to vector<384x128xbf16>
    %cst_22 = arith.constant dense<0.000000e+00> : vector<256x128xf32>
    %29 = tpu.matmul %20, %28, %cst_22 {dimension_numbers = #tpu.dot_dimension_numbers<[1], [0], [0], [1], [0, 0, 1, 1], [], []>} : vector<256x384xbf16>, vector<384x128xbf16>, vector<256x128xf32> -> vector<256x128xf32>
    %30 = vector.shape_cast %23 : vector<256x128xf32> to vector<16x16x128xf32>
    %31 = vector.shape_cast %26 : vector<256x128xf32> to vector<16x16x128xf32>
    %32 = vector.shape_cast %29 : vector<256x128xf32> to vector<16x16x128xf32>
    %cst_23 = arith.constant 0.000000e+00 : f32
    %33 = vector.broadcast %cst_23 : f32 to vector<16x1x128xf32>
    %34 = vector.extract_strided_slice %30 {offsets = [0, 0, 0], sizes = [16, 15, 128], strides = [1, 1, 1]} : vector<16x16x128xf32> to vector<16x15x128xf32>
    %35 = tpu.concatenate %33, %34 in 1 : vector<16x1x128xf32>, vector<16x15x128xf32> -> vector<16x16x128xf32>
    %36 = arith.addf %35, %31 : vector<16x16x128xf32>
    %37 = vector.extract_strided_slice %32 {offsets = [0, 1, 0], sizes = [16, 15, 128], strides = [1, 1, 1]} : vector<16x16x128xf32> to vector<16x15x128xf32>
    %38 = tpu.concatenate %37, %33 in 1 : vector<16x15x128xf32>, vector<16x1x128xf32> -> vector<16x16x128xf32>
    %39 = arith.addf %36, %38 : vector<16x16x128xf32>
    %c0_24 = arith.constant 0 : index
    %c0_25 = arith.constant 0 : index
    %40 = vector.load %arg7[%c0_24, %c0_25] : memref<1x128xf32, #tpu.memory_space<vmem>>, vector<1x128xf32>
    %41 = vector.shape_cast %40 : vector<1x128xf32> to vector<128xf32>
    %42 = vector.shape_cast %41 : vector<128xf32> to vector<1x1x128xf32>
    %43 = vector.broadcast %42 : vector<1x1x128xf32> to vector<16x16x128xf32>
    %44 = arith.addf %39, %43 : vector<16x16x128xf32>
    %45 = arith.truncf %44 : vector<16x16x128xf32> to vector<16x16x128xbf16>
    %c0_26 = arith.constant 0 : index
    %c0_27 = arith.constant 0 : index
    %c0_28 = arith.constant 0 : index
    %c0_29 = arith.constant 0 : index
    %46 = vector.load %arg10[%c0_26, %c0_27, %c0_28, %c0_29] : memref<1x16x16x128xbf16, #tpu.memory_space<vmem>>, vector<1x16x16x128xbf16>
    %47 = vector.shape_cast %46 : vector<1x16x16x128xbf16> to vector<16x16x128xbf16>
    %48 = vector.shape_cast %45 : vector<16x16x128xbf16> to vector<1x16x16x128xbf16>
    tpu.vector_store %arg10[%c0_26, %c0_27, %c0_28, %c0_29], %48 {strides = array<i32>} : memref<1x16x16x128xbf16, #tpu.memory_space<vmem>>, vector<1x16x16x128xbf16>,
    %c0_i32_30 = arith.constant 0 : i32
    %49 = arith.cmpi eq, %arg2, %c0_i32_30 : i32
    %50 = arith.extui %49 : i1 to i32
    %c0_i32_31 = arith.constant 0 : i32
    %51 = arith.cmpi ne, %50, %c0_i32_31 : i32
    scf.if %51 {
      %cst_50 = arith.constant 0.000000e+00 : f32
      %63 = vector.broadcast %cst_50 : f32 to vector<1x1x1x128xf32>
      %c0_51 = arith.constant 0 : index
      %c0_52 = arith.constant 0 : index
      %c0_53 = arith.constant 0 : index
      %c0_54 = arith.constant 0 : index
      %64 = vector.load %arg11[%c0_51, %c0_52, %c0_53, %c0_54] : memref<1x1x1x128xf32, #tpu.memory_space<vmem>>, vector<1x1x1x128xf32>
      tpu.vector_store %arg11[%c0_51, %c0_52, %c0_53, %c0_54], %63 {strides = array<i32>} : memref<1x1x1x128xf32, #tpu.memory_space<vmem>>, vector<1x1x1x128xf32>,
      %cst_55 = arith.constant 0.000000e+00 : f32
      %65 = vector.broadcast %cst_55 : f32 to vector<1x1x1x128xf32>
      %c0_56 = arith.constant 0 : index
      %c0_57 = arith.constant 0 : index
      %c0_58 = arith.constant 0 : index
      %c0_59 = arith.constant 0 : index
      %66 = vector.load %arg12[%c0_56, %c0_57, %c0_58, %c0_59] : memref<1x1x1x128xf32, #tpu.memory_space<vmem>>, vector<1x1x1x128xf32>
      tpu.vector_store %arg12[%c0_56, %c0_57, %c0_58, %c0_59], %65 {strides = array<i32>} : memref<1x1x1x128xf32, #tpu.memory_space<vmem>>, vector<1x1x1x128xf32>,
    } else {
    }
    %c0_32 = arith.constant 0 : index
    %c0_33 = arith.constant 0 : index
    %c0_34 = arith.constant 0 : index
    %c0_35 = arith.constant 0 : index
    %52 = vector.load %arg11[%c0_32, %c0_33, %c0_34, %c0_35] : memref<1x1x1x128xf32, #tpu.memory_space<vmem>>, vector<1x1x1x128xf32>
    %cst_36 = arith.constant dense<0.000000e+00> : vector<128xf32>
    %53 = vector.multi_reduction <add>, %44, %cst_36 [0, 1] : vector<16x16x128xf32> to vector<128xf32>
    %54 = vector.shape_cast %53 : vector<128xf32> to vector<1x1x1x128xf32>
    %55 = arith.addf %52, %54 : vector<1x1x1x128xf32>
    %c0_37 = arith.constant 0 : index
    %c0_38 = arith.constant 0 : index
    %c0_39 = arith.constant 0 : index
    %c0_40 = arith.constant 0 : index
    %56 = vector.load %arg11[%c0_37, %c0_38, %c0_39, %c0_40] : memref<1x1x1x128xf32, #tpu.memory_space<vmem>>, vector<1x1x1x128xf32>
    tpu.vector_store %arg11[%c0_37, %c0_38, %c0_39, %c0_40], %55 {strides = array<i32>} : memref<1x1x1x128xf32, #tpu.memory_space<vmem>>, vector<1x1x1x128xf32>,
    %c0_41 = arith.constant 0 : index
    %c0_42 = arith.constant 0 : index
    %c0_43 = arith.constant 0 : index
    %c0_44 = arith.constant 0 : index
    %57 = vector.load %arg12[%c0_41, %c0_42, %c0_43, %c0_44] : memref<1x1x1x128xf32, #tpu.memory_space<vmem>>, vector<1x1x1x128xf32>
    %58 = arith.mulf %44, %44 : vector<16x16x128xf32>
    %cst_45 = arith.constant dense<0.000000e+00> : vector<128xf32>
    %59 = vector.multi_reduction <add>, %58, %cst_45 [0, 1] : vector<16x16x128xf32> to vector<128xf32>
    %60 = vector.shape_cast %59 : vector<128xf32> to vector<1x1x1x128xf32>
    %61 = arith.addf %57, %60 : vector<1x1x1x128xf32>
    %c0_46 = arith.constant 0 : index
    %c0_47 = arith.constant 0 : index
    %c0_48 = arith.constant 0 : index
    %c0_49 = arith.constant 0 : index
    %62 = vector.load %arg12[%c0_46, %c0_47, %c0_48, %c0_49] : memref<1x1x1x128xf32, #tpu.memory_space<vmem>>, vector<1x1x1x128xf32>
    tpu.vector_store %arg12[%c0_46, %c0_47, %c0_48, %c0_49], %61 {strides = array<i32>} : memref<1x1x1x128xf32, #tpu.memory_space<vmem>>, vector<1x1x1x128xf32>,
    return
  }
  func.func @transform_0(%arg0: i32, %arg1: i32, %arg2: i32) -> (i32, i32, i32, i32) {
    %c1_i32 = arith.constant 1 : i32
    %0 = arith.muli %arg1, %c1_i32 : i32
    %1 = arith.addi %0, %arg2 : i32
    %c16_i32 = arith.constant 16 : i32
    %2 = arith.muli %1, %c16_i32 : i32
    %c1_i32_0 = arith.constant 1 : i32
    %3 = arith.subi %2, %c1_i32_0 : i32
    %c0_i32 = arith.constant 0 : i32
    %4 = arith.maxsi %3, %c0_i32 : i32
    %c0_i32_1 = arith.constant 0 : i32
    %c0_i32_2 = arith.constant 0 : i32
    %c0_i32_3 = arith.constant 0 : i32
    return %arg0, %4, %c0_i32_1, %c0_i32_2 : i32, i32, i32, i32
  }
  func.func @transform_1(%arg0: i32, %arg1: i32, %arg2: i32) -> (i32, i32, i32, i32) {
    %c1_i32 = arith.constant 1 : i32
    %0 = arith.muli %arg1, %c1_i32 : i32
    %1 = arith.addi %0, %arg2 : i32
    %c0_i32 = arith.constant 0 : i32
    %c0_i32_0 = arith.constant 0 : i32
    %c0_i32_1 = arith.constant 0 : i32
    return %arg0, %1, %c0_i32, %c0_i32_0 : i32, i32, i32, i32
  }
  func.func @transform_2(%arg0: i32, %arg1: i32, %arg2: i32) -> (i32, i32, i32, i32) {
    %c1_i32 = arith.constant 1 : i32
    %0 = arith.muli %arg1, %c1_i32 : i32
    %1 = arith.addi %0, %arg2 : i32
    %c1_i32_0 = arith.constant 1 : i32
    %2 = arith.addi %1, %c1_i32_0 : i32
    %c16_i32 = arith.constant 16 : i32
    %3 = arith.muli %2, %c16_i32 : i32
    %c15_i32 = arith.constant 15 : i32
    %4 = arith.minsi %3, %c15_i32 : i32
    %c0_i32 = arith.constant 0 : i32
    %c0_i32_1 = arith.constant 0 : i32
    %c0_i32_2 = arith.constant 0 : i32
    return %arg0, %4, %c0_i32, %c0_i32_1 : i32, i32, i32, i32
  }
  func.func @transform_3(%arg0: i32, %arg1: i32, %arg2: i32) -> (i32, i32, i32) {
    %c0_i32 = arith.constant 0 : i32
    %c0_i32_0 = arith.constant 0 : i32
    %c0_i32_1 = arith.constant 0 : i32
    %c0_i32_2 = arith.constant 0 : i32
    return %c0_i32, %c0_i32_0, %c0_i32_1 : i32, i32, i32
  }
  func.func @transform_4(%arg0: i32, %arg1: i32, %arg2: i32) -> (i32, i32) {
    %c0_i32 = arith.constant 0 : i32
    %c0_i32_0 = arith.constant 0 : i32
    %c0_i32_1 = arith.constant 0 : i32
    return %c0_i32, %c0_i32_0 : i32, i32
  }
  func.func @transform_5(%arg0: i32, %arg1: i32, %arg2: i32) -> (i32, i32) {
    %c0_i32 = arith.constant 0 : i32
    %c0_i32_0 = arith.constant 0 : i32
    %c0_i32_1 = arith.constant 0 : i32
    return %c0_i32, %c0_i32_0 : i32, i32
  }
  func.func @transform_6(%arg0: i32, %arg1: i32, %arg2: i32) -> (i32, i32) {
    %c0_i32 = arith.constant 0 : i32
    %c0_i32_0 = arith.constant 0 : i32
    %c0_i32_1 = arith.constant 0 : i32
    return %c0_i32, %c0_i32_0 : i32, i32
  }
  func.func @transform_7(%arg0: i32, %arg1: i32, %arg2: i32) -> (i32, i32, i32, i32) {
    %c1_i32 = arith.constant 1 : i32
    %0 = arith.muli %arg1, %c1_i32 : i32
    %1 = arith.addi %0, %arg2 : i32
    %c0_i32 = arith.constant 0 : i32
    %c0_i32_0 = arith.constant 0 : i32
    %c0_i32_1 = arith.constant 0 : i32
    return %arg0, %1, %c0_i32, %c0_i32_0 : i32, i32, i32, i32
  }
  func.func @transform_8(%arg0: i32, %arg1: i32, %arg2: i32) -> (i32, i32, i32, i32) {
    %c0_i32 = arith.constant 0 : i32
    %c0_i32_0 = arith.constant 0 : i32
    %c0_i32_1 = arith.constant 0 : i32
    return %arg0, %arg1, %c0_i32, %c0_i32_0 : i32, i32, i32, i32
  }
  func.func @transform_9(%arg0: i32, %arg1: i32, %arg2: i32) -> (i32, i32, i32, i32) {
    %c0_i32 = arith.constant 0 : i32
    %c0_i32_0 = arith.constant 0 : i32
    %c0_i32_1 = arith.constant 0 : i32
    return %arg0, %arg1, %c0_i32, %c0_i32_0 : i32, i32, i32, i32
  }
}

module attributes {stable_mosaic.version = 11 : i64} {
  func.func @_bn_relu_kernel(%arg0: i32, %arg1: i32, %arg2: memref<1x16x16x128xbf16, #tpu.memory_space<vmem>>, %arg3: memref<1x128xf32, #tpu.memory_space<vmem>>, %arg4: memref<1x128xf32, #tpu.memory_space<vmem>>, %arg5: memref<1x16x16x8xf32, #tpu.memory_space<vmem>>) attributes {dimension_semantics = [#tpu.dimension_semantics<parallel>, #tpu.dimension_semantics<parallel>], iteration_bounds = array<i64: 2, 1>, scalar_prefetch = 0 : i64, scratch_operands = 0 : i64, tpu.core_type = #tpu.core_type<tc>, window_params = [{transform_indices = @transform_0, window_bounds = array<i64: 1, 16, 16, 128>}, {pipeline_mode = #tpu.pipeline_mode<synchronous>, transform_indices = @transform_1, window_bounds = array<i64: 1, 128>}, {pipeline_mode = #tpu.pipeline_mode<synchronous>, transform_indices = @transform_2, window_bounds = array<i64: 1, 128>}, {transform_indices = @transform_3, window_bounds = array<i64: 1, 16, 16, 8>}]} {
    %c0 = arith.constant 0 : index
    %c0_0 = arith.constant 0 : index
    %c0_1 = arith.constant 0 : index
    %c0_2 = arith.constant 0 : index
    %0 = vector.load %arg2[%c0, %c0_0, %c0_1, %c0_2] : memref<1x16x16x128xbf16, #tpu.memory_space<vmem>>, vector<1x16x16x128xbf16>
    %1 = vector.shape_cast %0 : vector<1x16x16x128xbf16> to vector<16x16x128xbf16>
    %2 = arith.extf %1 : vector<16x16x128xbf16> to vector<16x16x128xf32>
    %c0_3 = arith.constant 0 : index
    %c0_4 = arith.constant 0 : index
    %3 = vector.load %arg3[%c0_3, %c0_4] : memref<1x128xf32, #tpu.memory_space<vmem>>, vector<1x128xf32>
    %4 = vector.shape_cast %3 : vector<1x128xf32> to vector<128xf32>
    %5 = vector.shape_cast %4 : vector<128xf32> to vector<1x1x128xf32>
    %6 = vector.broadcast %5 : vector<1x1x128xf32> to vector<16x16x128xf32>
    %7 = arith.mulf %2, %6 : vector<16x16x128xf32>
    %c0_5 = arith.constant 0 : index
    %c0_6 = arith.constant 0 : index
    %8 = vector.load %arg4[%c0_5, %c0_6] : memref<1x128xf32, #tpu.memory_space<vmem>>, vector<1x128xf32>
    %9 = vector.shape_cast %8 : vector<1x128xf32> to vector<128xf32>
    %10 = vector.shape_cast %9 : vector<128xf32> to vector<1x1x128xf32>
    %11 = vector.broadcast %10 : vector<1x1x128xf32> to vector<16x16x128xf32>
    %12 = arith.addf %7, %11 : vector<16x16x128xf32>
    %cst = arith.constant 0.000000e+00 : f32
    %13 = vector.broadcast %cst : f32 to vector<16x16x128xf32>
    %14 = arith.maximumf %12, %13 : vector<16x16x128xf32>
    %15 = vector.extract_strided_slice %14 {offsets = [0, 0, 0], sizes = [16, 16, 8], strides = [1, 1, 1]} : vector<16x16x128xf32> to vector<16x16x8xf32>
    %c0_7 = arith.constant 0 : index
    %c0_8 = arith.constant 0 : index
    %c0_9 = arith.constant 0 : index
    %c0_10 = arith.constant 0 : index
    %16 = vector.load %arg5[%c0_7, %c0_8, %c0_9, %c0_10] : memref<1x16x16x8xf32, #tpu.memory_space<vmem>>, vector<1x16x16x8xf32>
    %17 = vector.shape_cast %16 : vector<1x16x16x8xf32> to vector<16x16x8xf32>
    %18 = vector.shape_cast %15 : vector<16x16x8xf32> to vector<1x16x16x8xf32>
    tpu.vector_store %arg5[%c0_7, %c0_8, %c0_9, %c0_10], %18 {strides = array<i32>} : memref<1x16x16x8xf32, #tpu.memory_space<vmem>>, vector<1x16x16x8xf32>,
    return
  }
  func.func @transform_0(%arg0: i32, %arg1: i32) -> (i32, i32, i32, i32) {
    %c0_i32 = arith.constant 0 : i32
    %c0_i32_0 = arith.constant 0 : i32
    %c0_i32_1 = arith.constant 0 : i32
    return %arg0, %arg1, %c0_i32, %c0_i32_0 : i32, i32, i32, i32
  }
  func.func @transform_1(%arg0: i32, %arg1: i32) -> (i32, i32) {
    %c0_i32 = arith.constant 0 : i32
    %c0_i32_0 = arith.constant 0 : i32
    %c0_i32_1 = arith.constant 0 : i32
    return %c0_i32, %c0_i32_0 : i32, i32
  }
  func.func @transform_2(%arg0: i32, %arg1: i32) -> (i32, i32) {
    %c0_i32 = arith.constant 0 : i32
    %c0_i32_0 = arith.constant 0 : i32
    %c0_i32_1 = arith.constant 0 : i32
    return %c0_i32, %c0_i32_0 : i32, i32
  }
  func.func @transform_3(%arg0: i32, %arg1: i32) -> (i32, i32, i32, i32) {
    %c0_i32 = arith.constant 0 : i32
    %c0_i32_0 = arith.constant 0 : i32
    %c0_i32_1 = arith.constant 0 : i32
    return %arg0, %arg1, %c0_i32, %c0_i32_0 : i32, i32, i32, i32
  }
}

</mosaic_0001>

<bundles_post_ra>
// kernel: tpu_custom_call.1
= control target key start
LH: loop header
LB: loop body
LE: loop exit
PB: predicated region body
PF: predicated region fallthrough
CT: control target
= control target key end

     0   :  { %6 = vsyncpa [#allocation3], 0  ;;  %s147_s0 = inlined_call_operand.hbm [shape: f32[16,128], index: 0, kind: input, shape index: {}]   ;;  %s148_s1 = inlined_call_operand.hbm [shape: f32[16,128], index: 1, kind: output, shape index: {}]  }
   0x1   :  { %7 = vsyncpa [#allocation4], 0  ;;  %s103_s6 = smov [#allocation2]   ;;  %s55_s10 = scalar_lea.hbm %s147_s0, 256 }
   0x2   :  { %s13_s7 = sshll.u32 %s103_s6, 4  ;;  %p56_p0 = scmp.ne.s32.totalorder %s147_s0, %s55_s10  ;;  %s14_s7 = int_to_ptr.vmem [resolvable:$true] %s13_s7 }
   0x3   :  { %p59_p1 = scmp.lt.u32.totalorder %s55_s10, %s147_s0 }
   0x5   :  { %p61_p2 = pnand %p59_p1, %p56_p0 }
   0x7   :  { %64 = shalt.err (!%p61_p2)
}
   0x8   :  { %s65_s15 = scalar_lea.vmem %s14_s7, 256  ;;  %p70_p4 = scmp.lt.s32.totalorder %s14_s7, %s14_s7 }
   0x9   :  { %p66_p3 = scmp.ne.s32.totalorder %s14_s7, %s65_s15  ;;  %p71_p5 = scmp.lt.s32.totalorder %s65_s15, %s65_s15 }
   0xb   :  { %p72_p6 = por %p71_p5, %p70_p4 }
   0xd   :  { %p73_p7 = pnand %p72_p6, %p66_p3 }
   0xf   :  { %76 = shalt.err (!%p73_p7)
}
  0x10   :  { %s104_s16 = smov 128   ;;  %s105_s17 = smov 8  }
  0x11   :  { %19 = dma.hbm_to_vmem [thread:$0]  %s147_s0, 256, %s14_s7, [#allocation3], %s104_s16, %s104_s16, %s105_s17  }
  0x12   :  { %99 = dma.done.wait [#allocation3], 256  }
  0x13   :  { %100 = vsyncadd [#allocation3], 4294967040  ;;  %v27_v0 = vlaneseq  ;;  %s106_s20 = smov [#allocation5]   ;;  %v23_v2 = vld [vmem:[#allocation2] sm:$0xff]  ;;  %v24_v3 = vld [vmem:[#allocation2 + $0x8] sm:$0xff] }
  0x14   :  { %s39_s21 = sshll.u32 %s106_s20, 4  ;;  %v25_v4 = vrot.slane %v23_v2, 7  ;;  %v26_v5 = vrot.slane %v24_v3, 7  ;;  %s40_s21 = int_to_ptr.vmem [resolvable:$true] %s39_s21 }
  0x15   :  { %v28_v1 = vshrl.u32 %v27_v0, 7  ;;  %s77_s22 = scalar_lea.vmem %s40_s21, 256  ;;  %p82_p9 = scmp.lt.s32.totalorder %s40_s21, %s40_s21 }
  0x16   :  { %p78_p8 = scmp.ne.s32.totalorder %s40_s21, %s77_s22  ;;  %p83_p10 = scmp.lt.s32.totalorder %s77_s22, %s77_s22 }
  0x17   :  { %vm29_vm0 = vcmp.lt.s32.totalorder %v28_v1, 1 }
  0x18   :  { %v31_v6 = vsel %vm29_vm0, %v26_v5, %v25_v4  ;;  %v30_v7 = vsel %vm29_vm0, %v25_v4, %v26_v5  ;;  %p84_p11 = por %p83_p10, %p82_p9 }
  0x19   :  { %32 = vst [vmem:[#allocation5] sm:$0xff] %v31_v6  ;;  %33 = vst [vmem:[#allocation5 + $0x8] sm:$0xff] %v30_v7 }
  0x1a   :  { %p85_p12 = pnand %p84_p11, %p78_p8 }
  0x1c   :  { %88 = shalt.err (!%p85_p12)
}
  0x1d   :  { %s89_s24 = scalar_lea.hbm %s148_s1, 256 }
  0x1e   :  { %p90_p13 = scmp.ne.s32.totalorder %s148_s1, %s89_s24  ;;  %p93_p0 = scmp.lt.u32.totalorder %s89_s24, %s148_s1 }
  0x20   :  { %p95_p1 = pnand %p93_p0, %p90_p13 }
  0x22   :  { %98 = shalt.err (!%p95_p1)
}
  0x23   :  { %45 = dma.vmem_to_hbm [thread:$0]  %s40_s21, 256, %s148_s1, [#allocation4], %s104_s16, %s104_s16, %s105_s17  }
  0x24   :  { %101 = dma.done.wait [#allocation4], 256  }
  0x25   :  { %102 = vsyncadd [#allocation4], 4294967040 }
  0x26   :  { %49 = vsyncpa [#allocation3], 1 }
  0x27   :  { %50 = vsyncpa [#allocation4], 1 }

// kernel: tpu_custom_call.1
= control target key start
LH: loop header
LB: loop body
LE: loop exit
PB: predicated region body
PF: predicated region fallthrough
CT: control target
= control target key end

     0   :  { %6 = vsyncpa [#allocation3], 0  ;;  %s341_s0 = inlined_call_operand.hbm [shape: f32[8,128], index: 0, kind: input, shape index: {}]   ;;  %s342_s1 = inlined_call_operand.hbm [shape: f32[8,128], index: 1, kind: output, shape index: {}]  }
   0x1   :  { %7 = vsyncpa [#allocation4], 0  ;;  %s262_s6 = smov 0  }
   0x2 LB: > { %s145_s7 = sadd.s32 4294967295, %s248_s6   ;;  %p146_p0 = scmp.ge.s32.totalorder %s248_s6, 1  ;;  %s248_s6 = sphi %s262_s6, %s13_s6  }
   0x3   : > { %p60_p1 = scmp.lt.s32.totalorder %s248_s6, 3  ;;  %p276_p3 = scmp.eq.s32.totalorder %s145_s7, 0 }
   0x4   : > { %s250_s10 = smov [#allocation2]   ;;  %s180_s15 = scalar_lea.hbm %s341_s0, 128 }
   0x5   : > { %p270_p2 = pnand %p146_p0, %p60_p1  ;;  %s73_s11 = sshll.u32 %s250_s10, 4  ;;  %s74_s11 = int_to_ptr.vmem [resolvable:$true] %s73_s11 }
   0x6   : > { %s347_s9 = scalar_select %p276_p3, 1, 0 }
   0x7   : > { %s346_s8 = scalar_select %p270_p2, 1, 0 }
   0x8   : > { %p162_p4 = pneg %p270_p2  ;;  %p181_p6 = scmp.ne.s32.totalorder %s341_s0, %s180_s15 }
   0x9   : > { %p187_p10 = scmp.lt.u32.totalorder %s180_s15, %s341_s0 }
   0xa   : > { %p284_p5 = pnand %p276_p3, %p162_p4 }
   0xc   : > { %p182_p7 = pneg %p284_p5 }
   0xe   : > { %p183_p8 = pnand %p182_p7, %p181_p6 }
  0x10   : > { %p184_p9 = pneg %p183_p8 }
  0x12   : > { %p189_p11 = pnand %p187_p10, %p184_p9 }
  0x14   : > { %192 = shalt.err (!%p189_p11)
}
  0x15   : > { %s193_s20 = scalar_lea.vmem %s74_s11, 128  ;;  %p201_p1 = scmp.lt.s32.totalorder %s74_s11, %s74_s11 }
  0x16   : > { %p194_p12 = scmp.ne.s32.totalorder %s74_s11, %s193_s20  ;;  %p202_p4 = scmp.lt.s32.totalorder %s193_s20, %s193_s20 }
  0x18   : > { %p196_p13 = pnand %p194_p12, %p182_p7  ;;  %p203_p3 = por %p202_p4, %p201_p1 }
  0x1a   : > { %p197_p0 = pneg %p196_p13 }
  0x1c   : > { %p204_p2 = pnand %p203_p3, %p197_p0 }
  0x1e   : > { %207 = shalt.err (!%p204_p2)
}
  0x1f   : > { %165 = dma.hbm_to_vmem [thread:$0]  (!%p284_p5), %s341_s0, 128, %s74_s11, [#allocation3]  }
  0x20   : > { %p349_p6 = scmp.ne.s32.totalorder %s346_s8, 0 }
  0x21   : > { %p350_p8 = scmp.ne.s32.totalorder (!%p349_p6), %s347_s9, 0 }
  0x22   : > { %86 = sbr.rel (%p349_p6) target bundleno = 67 (0x43), region = 24 }
  0x29   : > { %239 = dma.done.wait (%p350_p8), [#allocation3], 128  }
  0x2a   : > { %241 = vsyncadd (%p350_p8), [#allocation3], 4294967168  ;;  %s251_s23 = smov [#allocation5]   ;;  %v96_v0 = vld [vmem:[#allocation2] sm:$0xff]  ;;  %p312_p2 = scmp.eq.s32.totalorder %s145_s7, 1 }
  0x2b   : > { %s106_s24 = sshll.u32 %s251_s23, 4  ;;  %v97_v1 = vadd.f32 1.0, %v96_v0  ;;  %s107_s24 = int_to_ptr.vmem [resolvable:$true] %s106_s24 }
  0x2c   : > { %s208_s26 = scalar_lea.vmem %s107_s24, 128  ;;  %p215_p9 = scmp.lt.s32.totalorder %s107_s24, %s107_s24 }
  0x2d   : > { %98 = vst [vmem:[#allocation5] sm:$0xff] %v97_v1  ;;  %p209_p3 = scmp.ne.s32.totalorder %s107_s24, %s208_s26  ;;  %p216_p10 = scmp.lt.s32.totalorder %s208_s26, %s208_s26 }
  0x2f   : > { %p210_p5 = pnand %p209_p3, %p312_p2  ;;  %p217_p11 = por %p216_p10, %p215_p9 }
  0x31   : > { %p211_p7 = pneg %p210_p5 }
  0x33   : > { %p218_p12 = pnand %p217_p11, %p211_p7 }
  0x35   : > { %221 = shalt.err (!%p218_p12)
}
  0x36   : > { %s222_s29 = scalar_lea.hbm %s342_s1, 128 }
  0x37   : > { %p223_p13 = scmp.ne.s32.totalorder %s342_s1, %s222_s29  ;;  %p228_p4 = scmp.lt.u32.totalorder %s222_s29, %s342_s1 }
  0x39   : > { %p224_p0 = pnand %p223_p13, %p312_p2 }
  0x3b   : > { %p225_p1 = pneg %p224_p0 }
  0x3d   : > { %p230_p6 = pnand %p228_p4, %p225_p1 }
  0x3f   : > { %233 = shalt.err (!%p230_p6)
}
  0x40   : > { %159 = dma.vmem_to_hbm [thread:$0]  (%p312_p2), %s107_s24, 128, %s342_s1, [#allocation4]  }
  0x41   : > { %243 = dma.done.wait (%p312_p2), [#allocation4], 128  }
  0x42   : > { %245 = vsyncadd (%p312_p2), [#allocation4], 4294967168 }
  0x43 PF: > { %s13_s6 = sadd.s32 1, %s248_s6  }
  0x44   : > { %p10_p8 = scmp.ge.s32.totalorder %s13_s6, 4  }
  0x46   :  { %12 = sbr.rel (!%p10_p8) target bundleno = 2 (0x2), region = 53 }
  0x4d   :  { %119 = vsyncpa [#allocation3], 1 }
  0x4e   :  { %121 = vsyncpa [#allocation3 + $0x1], 1 }
  0x4f   :  { %122 = vsyncpa [#allocation4], 1 }
  0x50   :  { %124 = vsyncpa [#allocation4 + $0x1], 1 }

// kernel: double_conv_apply.5
= control target key start
LH: loop header
LB: loop body
LE: loop exit
PB: predicated region body
PF: predicated region fallthrough
CT: control target
= control target key end

     0   :  { %s680_s12 = smov 0   ;;  %s682_s13 = smov 0   ;;  %s875_s0 = inlined_call_operand.vmem [shape: bf16[2,16,16,128], index: 0, kind: input, shape index: {}]   ;;  %s876_s1 = inlined_call_operand.vmem [shape: f32[1,128], index: 1, kind: input, shape index: {}]   ;;  %s877_s2 = inlined_call_operand.vmem [shape: f32[1,128], index: 2, kind: input, shape index: {}]   ;;  %s878_s3 = inlined_call_operand.vmem [shape: f32[2,16,16,8], index: 3, kind: output, shape index: {}]  }
   0x1   :  { %s684_s14 = smov 0  }
   0x2 LB: > { %s25_s15 = sadd.s32 1, %s654_s13  ;;  %p522_p0 = scmp.ge.s32.totalorder %s658_s14, 1  ;;  %s658_s14 = sphi %s684_s14, %s13_s14   ;;  %s654_s13 = sphi %s682_s13, %s880_s13   ;;  %s650_s12 = sphi %s680_s12, %s879_s12  }
   0x3   : > { %p27_p1 = scmp.ge.s32.totalorder %s25_s15, 2  ;;  %p159_p2 = scmp.lt.s32.totalorder %s658_s14, 3 }
   0x5   : > { %s882_s15 = smov (%p27_p1, %s25_s15), 0  ;;  %p160_p3 = pnand %p522_p0, %p159_p2 }
   0x6   : > { %p194_p4 = scmp.lt.s32.totalorder (!%p160_p3), %s650_s12, 1  ;;  %v709_v0 = vld [vmem:[%s876_s1] ss:$0 sm:$0xff] (!%p160_p3)  ;;  %vm389_vm0 = vcmask (!%p160_p3), 64512  }
   0x7   : > { %163 = sbr.rel (%p160_p3) target bundleno = 54 (0x36), region = 32  ;;  %v718_v9 = vld [vmem:[%s877_s2] ss:$0 sm:$0xff] (!%p160_p3) }
   0xe   : > { %s884_s12 = smov (!%p194_p4, %s650_s12), 1 }
   0xf   : > { %s531_s16 = sshll.u32 %s884_s12, 7  ;;  %s532_s24 = sshll.u32 %s884_s12, 8 }
  0x10   : > { %s704_s19 = scalar_lea.vmem %s875_s0, %s531_s16  ;;  %s736_s27 = scalar_lea.vmem %s878_s3, %s532_s24 }
  0x11   : > { %v534_v1 = vld [vmem:[%s704_s19] sm:$0xff]   ;;  %v597_v2 = vld [vmem:[%s704_s19 + $0x8] sm:$0xff]   ;;  %v598_v3 = vld [vmem:[%s704_s19 + $0x10] sm:$0xff]  }
  0x12   : > { %v535_v4 = vunpack.c.l.bf16 %v534_v1  ;;  %v536_v5 = vunpack.c.h.bf16 %v534_v1  ;;  %v539_v6 = vunpack.c.l.bf16 %v597_v2  ;;  %v540_v7 = vunpack.c.h.bf16 %v597_v2  ;;  %v599_v8 = vld [vmem:[%s704_s19 + $0x18] sm:$0xff]   ;;  %v600_v30 = vld [vmem:[%s704_s19 + $0x20] sm:$0xff]   ;;  %v601_v31 = vld [vmem:[%s704_s19 + $0x28] sm:$0xff]  }
  0x13   : > { %v543_v10 = vunpack.c.l.bf16 %v598_v3  ;;  %v544_v11 = vunpack.c.h.bf16 %v598_v3  ;;  %v547_v12 = vunpack.c.l.bf16 %v599_v8  ;;  %v548_v13 = vunpack.c.h.bf16 %v599_v8  ;;  %v602_v36 = vld [vmem:[%s704_s19 + $0x30] sm:$0xff]   ;;  %v603_v37 = vld [vmem:[%s704_s19 + $0x38] sm:$0xff]   ;;  %v604_v3 = vld [vmem:[%s704_s19 + $0x40] sm:$0xff]  }
  0x14   : > { %v286_v14 = vmul.f32 %v535_v4, %v709_v0  ;;  %v287_v15 = vmul.f32 %v536_v5, %v709_v0  ;;  %v288_v16 = vmul.f32 %v539_v6, %v709_v0  ;;  %v289_v17 = vmul.f32 %v540_v7, %v709_v0  ;;  %v605_v4 = vld [vmem:[%s704_s19 + $0x48] sm:$0xff]  }
  0x15   : > { %v290_v18 = vmul.f32 %v543_v10, %v709_v0  ;;  %v291_v19 = vmul.f32 %v544_v11, %v709_v0  ;;  %v292_v20 = vmul.f32 %v547_v12, %v709_v0  ;;  %v293_v21 = vmul.f32 %v548_v13, %v709_v0  ;;  %v606_v10 = vld [vmem:[%s704_s19 + $0x50] sm:$0xff]   ;;  %v607_v11 = vld [vmem:[%s704_s19 + $0x58] sm:$0xff]  }
  0x16   : > { %v325_v22 = vadd.f32 %v718_v9, %v286_v14  ;;  %v326_v23 = vadd.f32 %v718_v9, %v287_v15  ;;  %v327_v24 = vadd.f32 %v718_v9, %v288_v16  ;;  %v328_v25 = vadd.f32 %v718_v9, %v289_v17 }
  0x17   : > { %v329_v26 = vadd.f32 %v718_v9, %v290_v18  ;;  %v330_v27 = vadd.f32 %v718_v9, %v291_v19  ;;  %v331_v28 = vadd.f32 %v718_v9, %v292_v20  ;;  %v332_v29 = vadd.f32 %v718_v9, %v293_v21 }
  0x18   : > { %v357_v32 = vmax.f32 %v325_v22, 0.0  ;;  %v358_v33 = vmax.f32 %v326_v23, 0.0  ;;  %v359_v34 = vmax.f32 %v327_v24, 0.0  ;;  %v360_v35 = vmax.f32 %v328_v25, 0.0 }
  0x19   : > { %v361_v38 = vmax.f32 %v329_v26, 0.0  ;;  %v362_v39 = vmax.f32 %v330_v27, 0.0  ;;  %v363_v40 = vmax.f32 %v331_v28, 0.0  ;;  %v364_v41 = vmax.f32 %v332_v29, 0.0 }
  0x1a   : > { %390 = vst.msk [vmem:[%s736_s27] sm:$0xff] %vm389_vm0, %v357_v32  ;;  %391 = vst.msk [vmem:[%s736_s27 + $0x8] sm:$0xff] %vm389_vm0, %v358_v33  ;;  %v551_v42 = vunpack.c.l.bf16 %v600_v30  ;;  %v552_v43 = vunpack.c.h.bf16 %v600_v30  ;;  %v555_v44 = vunpack.c.l.bf16 %v601_v31  ;;  %v556_v45 = vunpack.c.h.bf16 %v601_v31 }
  0x1b   : > { %392 = vst.msk [vmem:[%s736_s27 + $0x10] sm:$0xff] %vm389_vm0, %v359_v34  ;;  %393 = vst.msk [vmem:[%s736_s27 + $0x18] sm:$0xff] %vm389_vm0, %v360_v35  ;;  %v559_v46 = vunpack.c.l.bf16 %v602_v36  ;;  %v560_v47 = vunpack.c.h.bf16 %v602_v36  ;;  %v563_v48 = vunpack.c.l.bf16 %v603_v37  ;;  %v564_v49 = vunpack.c.h.bf16 %v603_v37 }
  0x1c   : > { %394 = vst.msk [vmem:[%s736_s27 + $0x20] sm:$0xff] %vm389_vm0, %v361_v38  ;;  %395 = vst.msk [vmem:[%s736_s27 + $0x28] sm:$0xff] %vm389_vm0, %v362_v39  ;;  %v294_v50 = vmul.f32 %v551_v42, %v709_v0  ;;  %v295_v51 = vmul.f32 %v552_v43, %v709_v0  ;;  %v296_v52 = vmul.f32 %v555_v44, %v709_v0  ;;  %v567_v16 = vunpack.c.l.bf16 %v604_v3 }
  0x1d   : > { %396 = vst.msk [vmem:[%s736_s27 + $0x30] sm:$0xff] %vm389_vm0, %v363_v40  ;;  %397 = vst.msk [vmem:[%s736_s27 + $0x38] sm:$0xff] %vm389_vm0, %v364_v41  ;;  %v297_v53 = vmul.f32 %v556_v45, %v709_v0  ;;  %v298_v54 = vmul.f32 %v559_v46, %v709_v0  ;;  %v299_v55 = vmul.f32 %v560_v47, %v709_v0  ;;  %v568_v17 = vunpack.c.h.bf16 %v604_v3  ;;  %v608_v40 = vld [vmem:[%s704_s19 + $0x60] sm:$0xff]   ;;  %v609_v41 = vld [vmem:[%s704_s19 + $0x68] sm:$0xff]  }
  0x1e   : > { %v300_v56 = vmul.f32 %v563_v48, %v709_v0  ;;  %v301_v57 = vmul.f32 %v564_v49, %v709_v0  ;;  %v333_v58 = vadd.f32 %v718_v9, %v294_v50  ;;  %v334_v59 = vadd.f32 %v718_v9, %v295_v51  ;;  %v610_v46 = vld [vmem:[%s704_s19 + $0x70] sm:$0xff]   ;;  %v611_v47 = vld [vmem:[%s704_s19 + $0x78] sm:$0xff]  }
  0x1f   : > { %v335_v60 = vadd.f32 %v718_v9, %v296_v52  ;;  %v336_v61 = vadd.f32 %v718_v9, %v297_v53  ;;  %v337_v62 = vadd.f32 %v718_v9, %v298_v54  ;;  %v338_v63 = vadd.f32 %v718_v9, %v299_v55 }
  0x20   : > { %v339_v1 = vadd.f32 %v718_v9, %v300_v56  ;;  %v340_v2 = vadd.f32 %v718_v9, %v301_v57  ;;  %v365_v5 = vmax.f32 %v333_v58, 0.0  ;;  %v366_v6 = vmax.f32 %v334_v59, 0.0 }
  0x21   : > { %v367_v7 = vmax.f32 %v335_v60, 0.0  ;;  %v368_v8 = vmax.f32 %v336_v61, 0.0  ;;  %v369_v12 = vmax.f32 %v337_v62, 0.0  ;;  %v370_v13 = vmax.f32 %v338_v63, 0.0 }
  0x22   : > { %v371_v14 = vmax.f32 %v339_v1, 0.0  ;;  %v372_v15 = vmax.f32 %v340_v2, 0.0  ;;  %398 = vst.msk [vmem:[%s736_s27 + $0x40] sm:$0xff] %vm389_vm0, %v365_v5  ;;  %399 = vst.msk [vmem:[%s736_s27 + $0x48] sm:$0xff] %vm389_vm0, %v366_v6  ;;  %v571_v18 = vunpack.c.l.bf16 %v605_v4  ;;  %v572_v19 = vunpack.c.h.bf16 %v605_v4 }
  0x23   : > { %400 = vst.msk [vmem:[%s736_s27 + $0x50] sm:$0xff] %vm389_vm0, %v367_v7  ;;  %401 = vst.msk [vmem:[%s736_s27 + $0x58] sm:$0xff] %vm389_vm0, %v368_v8  ;;  %v575_v20 = vunpack.c.l.bf16 %v606_v10  ;;  %v576_v21 = vunpack.c.h.bf16 %v606_v10  ;;  %v579_v22 = vunpack.c.l.bf16 %v607_v11  ;;  %v580_v23 = vunpack.c.h.bf16 %v607_v11 }
  0x24   : > { %402 = vst.msk [vmem:[%s736_s27 + $0x60] sm:$0xff] %vm389_vm0, %v369_v12  ;;  %403 = vst.msk [vmem:[%s736_s27 + $0x68] sm:$0xff] %vm389_vm0, %v370_v13  ;;  %v302_v24 = vmul.f32 %v567_v16, %v709_v0  ;;  %v303_v25 = vmul.f32 %v568_v17, %v709_v0  ;;  %v304_v26 = vmul.f32 %v571_v18, %v709_v0  ;;  %v583_v52 = vunpack.c.l.bf16 %v608_v40 }
  0x25   : > { %404 = vst.msk [vmem:[%s736_s27 + $0x70] sm:$0xff] %vm389_vm0, %v371_v14  ;;  %405 = vst.msk [vmem:[%s736_s27 + $0x78] sm:$0xff] %vm389_vm0, %v372_v15  ;;  %v305_v27 = vmul.f32 %v572_v19, %v709_v0  ;;  %v306_v28 = vmul.f32 %v575_v20, %v709_v0  ;;  %v307_v29 = vmul.f32 %v576_v21, %v709_v0  ;;  %v584_v53 = vunpack.c.h.bf16 %v608_v40 }
  0x26   : > { %v308_v30 = vmul.f32 %v579_v22, %v709_v0  ;;  %v309_v31 = vmul.f32 %v580_v23, %v709_v0  ;;  %v341_v32 = vadd.f32 %v718_v9, %v302_v24  ;;  %v342_v33 = vadd.f32 %v718_v9, %v303_v25 }
  0x27   : > { %v343_v34 = vadd.f32 %v718_v9, %v304_v26  ;;  %v344_v35 = vadd.f32 %v718_v9, %v305_v27  ;;  %v345_v36 = vadd.f32 %v718_v9, %v306_v28  ;;  %v346_v37 = vadd.f32 %v718_v9, %v307_v29 }
  0x28   : > { %v347_v38 = vadd.f32 %v718_v9, %v308_v30  ;;  %v348_v39 = vadd.f32 %v718_v9, %v309_v31  ;;  %v373_v42 = vmax.f32 %v341_v32, 0.0  ;;  %v374_v43 = vmax.f32 %v342_v33, 0.0 }
  0x29   : > { %v375_v44 = vmax.f32 %v343_v34, 0.0  ;;  %v376_v45 = vmax.f32 %v344_v35, 0.0  ;;  %v377_v48 = vmax.f32 %v345_v36, 0.0  ;;  %v378_v49 = vmax.f32 %v346_v37, 0.0 }
  0x2a   : > { %v379_v50 = vmax.f32 %v347_v38, 0.0  ;;  %v380_v51 = vmax.f32 %v348_v39, 0.0  ;;  %406 = vst.msk [vmem:[%s736_s27 + $0x80] sm:$0xff] %vm389_vm0, %v373_v42  ;;  %407 = vst.msk [vmem:[%s736_s27 + $0x88] sm:$0xff] %vm389_vm0, %v374_v43  ;;  %v587_v54 = vunpack.c.l.bf16 %v609_v41  ;;  %v588_v55 = vunpack.c.h.bf16 %v609_v41 }
  0x2b   : > { %408 = vst.msk [vmem:[%s736_s27 + $0x90] sm:$0xff] %vm389_vm0, %v375_v44  ;;  %409 = vst.msk [vmem:[%s736_s27 + $0x98] sm:$0xff] %vm389_vm0, %v376_v45  ;;  %v591_v56 = vunpack.c.l.bf16 %v610_v46  ;;  %v592_v57 = vunpack.c.h.bf16 %v610_v46  ;;  %v595_v58 = vunpack.c.l.bf16 %v611_v47  ;;  %v596_v59 = vunpack.c.h.bf16 %v611_v47 }
  0x2c   : > { %410 = vst.msk [vmem:[%s736_s27 + $0xa0] sm:$0xff] %vm389_vm0, %v377_v48  ;;  %411 = vst.msk [vmem:[%s736_s27 + $0xa8] sm:$0xff] %vm389_vm0, %v378_v49  ;;  %v310_v60 = vmul.f32 %v583_v52, %v709_v0  ;;  %v311_v61 = vmul.f32 %v584_v53, %v709_v0  ;;  %v312_v62 = vmul.f32 %v587_v54, %v709_v0 }
  0x2d   : > { %412 = vst.msk [vmem:[%s736_s27 + $0xb0] sm:$0xff] %vm389_vm0, %v379_v50  ;;  %413 = vst.msk [vmem:[%s736_s27 + $0xb8] sm:$0xff] %vm389_vm0, %v380_v51  ;;  %v313_v63 = vmul.f32 %v588_v55, %v709_v0  ;;  %v314_v1 = vmul.f32 %v591_v56, %v709_v0  ;;  %v315_v2 = vmul.f32 %v592_v57, %v709_v0 }
  0x2e   : > { %v316_v3 = vmul.f32 %v595_v58, %v709_v0  ;;  %v317_v4 = vmul.f32 %v596_v59, %v709_v0  ;;  %v349_v5 = vadd.f32 %v718_v9, %v310_v60  ;;  %v350_v6 = vadd.f32 %v718_v9, %v311_v61 }
  0x2f   : > { %v351_v7 = vadd.f32 %v718_v9, %v312_v62  ;;  %v352_v8 = vadd.f32 %v718_v9, %v313_v63  ;;  %v353_v10 = vadd.f32 %v718_v9, %v314_v1  ;;  %v354_v11 = vadd.f32 %v718_v9, %v315_v2 }
  0x30   : > { %v355_v0 = vadd.f32 %v718_v9, %v316_v3  ;;  %v356_v12 = vadd.f32 %v718_v9, %v317_v4  ;;  %v381_v13 = vmax.f32 %v349_v5, 0.0  ;;  %v382_v14 = vmax.f32 %v350_v6, 0.0 }
  0x31   : > { %v383_v15 = vmax.f32 %v351_v7, 0.0  ;;  %v384_v16 = vmax.f32 %v352_v8, 0.0  ;;  %v385_v17 = vmax.f32 %v353_v10, 0.0  ;;  %v386_v18 = vmax.f32 %v354_v11, 0.0 }
  0x32   : > { %v387_v19 = vmax.f32 %v355_v0, 0.0  ;;  %v388_v20 = vmax.f32 %v356_v12, 0.0  ;;  %414 = vst.msk [vmem:[%s736_s27 + $0xc0] sm:$0xff] %vm389_vm0, %v381_v13  ;;  %415 = vst.msk [vmem:[%s736_s27 + $0xc8] sm:$0xff] %vm389_vm0, %v382_v14 }
  0x33   : > { %416 = vst.msk [vmem:[%s736_s27 + $0xd0] sm:$0xff] %vm389_vm0, %v383_v15  ;;  %417 = vst.msk [vmem:[%s736_s27 + $0xd8] sm:$0xff] %vm389_vm0, %v384_v16 }
  0x34   : > { %418 = vst.msk [vmem:[%s736_s27 + $0xe0] sm:$0xff] %vm389_vm0, %v385_v17  ;;  %419 = vst.msk [vmem:[%s736_s27 + $0xe8] sm:$0xff] %vm389_vm0, %v386_v18 }
  0x35   : > { %420 = vst.msk [vmem:[%s736_s27 + $0xf0] sm:$0xff] %vm389_vm0, %v387_v19  ;;  %421 = vst.msk [vmem:[%s736_s27 + $0xf8] sm:$0xff] %vm389_vm0, %v388_v20 }
  0x36 PF: > { %s13_s14 = sadd.s32 1, %s658_s14   ;;  %s879_s12 = smov %s654_s13 }
  0x37   : > { %p10_p5 = scmp.ge.s32.totalorder %s13_s14, 4   ;;  %s880_s13 = smov %s882_s15 }
  0x39   :  { %12 = sbr.rel (!%p10_p5) target bundleno = 2 (0x2), region = 62 }

// kernel: double_conv_apply.3
= control target key start
LH: loop header
LB: loop body
LE: loop exit
PB: predicated region body
PF: predicated region fallthrough
CT: control target
= control target key end

     0   :  { %s4118_s28 = smov 0   ;;  %s4120_s29 = smov 0   ;;  %s5140_s0 = inlined_call_operand.vmem [shape: f32[2,16,16,128], index: 0, kind: input, shape index: {}, may-alias: {0,1,2}]   ;;  %s5141_s1 = inlined_call_operand.vmem [shape: f32[2,16,16,128], index: 1, kind: input, shape index: {}, may-alias: {0,1,2}]   ;;  %s5142_s2 = inlined_call_operand.vmem [shape: f32[2,16,16,128], index: 2, kind: input, shape index: {}, may-alias: {0,1,2}]   ;;  %s5143_s3 = inlined_call_operand.vmem [shape: bf16[3,384,128], index: 3, kind: input, shape index: {}]   ;;  %s5144_s4 = inlined_call_operand.vmem [shape: f32[1,128], index: 4, kind: input, shape index: {}]   ;;  %s5145_s5 = inlined_call_operand.vmem [shape: f32[1,128], index: 5, kind: input, shape index: {}]   ;;  %s5146_s6 = inlined_call_operand.vmem [shape: f32[1,128], index: 6, kind: input, shape index: {}]   ;;  %s5147_s7 = inlined_call_operand.vmem [shape: bf16[2,16,16,128], index: 7, kind: output, shape index: {0}]   ;;  %s5148_s8 = inlined_call_operand.vmem [shape: f32[2,1,1,128], index: 8, kind: output, shape index: {1}]   ;;  %s5149_s9 = inlined_call_operand.vmem [shape: f32[2,1,1,128], index: 9, kind: output, shape index: {2}]  }
   0x1   :  { %s4122_s30 = smov 0  }
   0x2 LB: > { %s39_s5 = sadd.s32 1, %s4060_s29  ;;  %p3032_p0 = scmp.ge.s32.totalorder %s4064_s30, 1  ;;  %s4064_s30 = sphi %s4122_s30, %s20_s30   ;;  %s4060_s29 = sphi %s4120_s29, %s5173_s29   ;;  %s4056_s28 = sphi %s4118_s28, %s5172_s28  }
   0x3   : > { %p41_p1 = scmp.ge.s32.totalorder %s39_s5, 2  ;;  %p403_p2 = scmp.lt.s32.totalorder %s4064_s30, 3 }
   0x5   : > { %s5175_s5 = smov (%p41_p1, %s39_s5), 0  ;;  %p404_p3 = pnand %p3032_p0, %p403_p2 }
   0x7   : > { %407 = sbr.rel (%p404_p3) target bundleno = 583 (0x247), region = 48 }
   0xe   : > { %v3970_v0 = vld [vmem:[%s5143_s3 + $0x40] sm:$0xff]   ;;  %v3972_v2 = vld [vmem:[%s5143_s3 + $0x48] sm:$0xff]   ;;  %p512_p4 = scmp.lt.s32.totalorder %s4056_s28, 1  ;;  %v3974_v4 = vld [vmem:[%s5143_s3 + $0x50] sm:$0xff]   ;;  %v4066_v35 = vmov 0.0|0.0   ;;  %vm2207_vm0 = vcmask 1040384  }
   0xf   : > { %v3971_v1 = vld [vmem:[%s5143_s3] sm:$0xff]   ;;  %3376 = vmatprep.subr.bf16.mxu0 %v3970_v0  ;;  %3928 = vmatprep.subr.bf16.mxu1 %v3970_v0  ;;  %v3973_v3 = vld [vmem:[%s5143_s3 + $0x8] sm:$0xff]   ;;  %v3975_v5 = vld [vmem:[%s5143_s3 + $0x10] sm:$0xff]   ;;  %vm2368_vm1 = vcmask 1046528  }
  0x10   : > { %3377 = vmatpush3.bf16.msra.mxu0 %v3971_v1  ;;  %3936 = vmatpush3.bf16.msra.mxu1 %v3971_v1  ;;  %s5177_s28 = smov (!%p512_p4, %s4056_s28), 1  ;;  %v3976_v6 = vld [vmem:[%s5143_s3 + $0x58] sm:$0xff]   ;;  %v3978_v8 = vld [vmem:[%s5143_s3 + $0x60] sm:$0xff]   ;;  %v3980_v10 = vld [vmem:[%s5143_s3 + $0x68] sm:$0xff]  }
  0x11   : > { %3378 = vmatprep.subr.bf16.mxu0 %v3972_v2  ;;  %3929 = vmatprep.subr.bf16.mxu1 %v3972_v2  ;;  %s3245_s23 = sshll.u32 %s5177_s28, 8  ;;  %v3977_v7 = vld [vmem:[%s5143_s3 + $0x18] sm:$0xff]   ;;  %v3979_v9 = vld [vmem:[%s5143_s3 + $0x20] sm:$0xff]   ;;  %v3981_v17 = vld [vmem:[%s5143_s3 + $0x28] sm:$0xff]   ;;  %s4856_s15 = scalar_lea.vmem %s5148_s8, %s5177_s28 }
  0x12   : > { %s4169_s6 = scalar_lea.vmem %s5141_s1, %s3245_s23  ;;  %v3982_v18 = vld [vmem:[%s5143_s3 + $0x70] sm:$0xff]   ;;  %v3984_v20 = vld [vmem:[%s5143_s3 + $0x78] sm:$0xff]   ;;  %v3986_v24 = vld [vmem:[%s5143_s3 + $0x80] sm:$0xff]   ;;  %s4862_s18 = scalar_lea.vmem %s5149_s9, %s5177_s28 }
  0x13   : > { %v571_v11 = vld [vmem:[%s4169_s6] sm:$0xff]  ;;  %v572_v12 = vld [vmem:[%s4169_s6 + $0x8] sm:$0xff]  ;;  %v3983_v19 = vld [vmem:[%s5143_s3 + $0x30] sm:$0xff]   ;;  %s3248_s21 = sshll.u32 %s5177_s28, 7 }
  0x14   : > { %3379 = vmatpush3.bf16.msra.mxu0 %v3973_v3  ;;  %3937 = vmatpush3.bf16.msra.mxu1 %v3973_v3  ;;  %v595_v13 = vld [vmem:[%s4169_s6 + $0xc0] sm:$0xff]  ;;  %v4180_v14 = vpack.c.bf16 %v572_v12, %v571_v11  ;;  %v596_v15 = vld [vmem:[%s4169_s6 + $0xc8] sm:$0xff]  ;;  %v3985_v21 = vld [vmem:[%s5143_s3 + $0x38] sm:$0xff]   ;;  %s4977_s23 = scalar_lea.vmem %s5147_s7, %s3248_s21 }
  0x15   : > { %3380 = vmatprep.subr.bf16.mxu0 %v3974_v4  ;;  %3930 = vmatprep.subr.bf16.mxu1 %v3974_v4  ;;  %v4183_v16 = vpack.c.bf16 %v596_v15, %v595_v13  ;;  %v593_v22 = vld [vmem:[%s4169_s6 + $0xb0] sm:$0xff]  ;;  %v594_v23 = vld [vmem:[%s4169_s6 + $0xb8] sm:$0xff]  ;;  %v3987_v25 = vld [vmem:[%s5143_s3 + $0x140] sm:$0xff]  }
  0x16   : > { %855 = vmatprep.mubr.bf16.mxu0 %v4180_v14  ;;  %v573_v26 = vld [vmem:[%s4169_s6 + $0x10] sm:$0xff]  ;;  %v574_v27 = vld [vmem:[%s4169_s6 + $0x18] sm:$0xff]  ;;  %v4213_v29 = vpack.c.bf16 %v594_v23, %v593_v22  ;;  %v3988_v31 = vld [vmem:[%s5143_s3 + $0x88] sm:$0xff]  }
  0x17   : > { %951 = vmatprep.mubr.bf16.mxu1 %v4183_v16  ;;  %v597_v28 = vld [vmem:[%s4169_s6 + $0xd0] sm:$0xff]  ;;  %v598_v30 = vld [vmem:[%s4169_s6 + $0xd8] sm:$0xff]  ;;  %v4219_v32 = vpack.c.bf16 %v574_v27, %v573_v26  ;;  %v3991_v34 = vld [vmem:[%s5143_s3 + $0x148] sm:$0xff]  }
  0x18   : > { %3381 = vmatpush3.bf16.msra.mxu0 %v3975_v5  ;;  %3938 = vmatpush3.bf16.msra.mxu1 %v3975_v5  ;;  %v4221_v33 = vpack.c.bf16 %v598_v30, %v597_v28  ;;  %v3989_v36 = vld [vmem:[%s5143_s3 + $0x90] sm:$0xff]   ;;  %v575_v37 = vld [vmem:[%s4169_s6 + $0x20] sm:$0xff]  ;;  %v576_v38 = vld [vmem:[%s4169_s6 + $0x28] sm:$0xff] }
  0x19   : > { %3382 = vmatprep.subr.bf16.mxu0 %v3976_v6  ;;  %3931 = vmatprep.subr.bf16.mxu1 %v3976_v6  ;;  %v599_v39 = vld [vmem:[%s4169_s6 + $0xe0] sm:$0xff]  ;;  %v3995_v40 = vld [vmem:[%s5143_s3 + $0x150] sm:$0xff]   ;;  %v600_v41 = vld [vmem:[%s4169_s6 + $0xe8] sm:$0xff]  ;;  %v4240_v42 = vpack.c.bf16 %v576_v38, %v575_v37 }
  0x1a   : > { %v3990_v43 = vld [vmem:[%s5143_s3 + $0x98] sm:$0xff]   ;;  %v4245_v44 = vpack.c.bf16 %v600_v41, %v599_v39  ;;  %v3992_v46 = vld [vmem:[%s5143_s3 + $0xa0] sm:$0xff]   ;;  %v577_v47 = vld [vmem:[%s4169_s6 + $0x30] sm:$0xff] }
  0x1b   : > { %v3999_v45 = vld [vmem:[%s5143_s3 + $0x158] sm:$0xff]   ;;  %v601_v49 = vld [vmem:[%s4169_s6 + $0xf0] sm:$0xff]  ;;  %v3993_v52 = vld [vmem:[%s5143_s3 + $0xa8] sm:$0xff]  }
  0x1c   : > { %3383 = vmatpush3.bf16.msra.mxu0 %v3977_v7  ;;  %3939 = vmatpush3.bf16.msra.mxu1 %v3977_v7  ;;  %v578_v48 = vld [vmem:[%s4169_s6 + $0x38] sm:$0xff]  ;;  %v4004_v54 = vld [vmem:[%s5143_s3 + $0x160] sm:$0xff]   ;;  %v3994_v55 = vld [vmem:[%s5143_s3 + $0xb0] sm:$0xff]  }
  0x1d   : > { %3384 = vmatprep.subr.bf16.mxu0 %v3978_v8  ;;  %3932 = vmatprep.subr.bf16.mxu1 %v3978_v8  ;;  %v602_v50 = vld [vmem:[%s4169_s6 + $0xf8] sm:$0xff]  ;;  %v4261_v51 = vpack.c.bf16 %v578_v48, %v577_v47  ;;  %v579_v56 = vld [vmem:[%s4169_s6 + $0x40] sm:$0xff]  ;;  %v4007_v57 = vld [vmem:[%s5143_s3 + $0x168] sm:$0xff]  }
  0x1e   : > { %v4266_v53 = vpack.c.bf16 %v602_v50, %v601_v49  ;;  %v580_v58 = vld [vmem:[%s4169_s6 + $0x48] sm:$0xff]  ;;  %v3996_v60 = vld [vmem:[%s5143_s3 + $0xb8] sm:$0xff]   ;;  %v3997_v61 = vld [vmem:[%s5143_s3 + $0x100] sm:$0xff]  }
  0x1f   : > { %v4283_v59 = vpack.c.bf16 %v580_v58, %v579_v56  ;;  %v4012_v62 = vld [vmem:[%s5143_s3 + $0x170] sm:$0xff]   ;;  %v582_v0 = vld [vmem:[%s4169_s6 + $0x58] sm:$0xff]  ;;  %v3998_v1 = vld [vmem:[%s5143_s3 + $0xc0] sm:$0xff]  }
  0x20   : > { %3385 = vmatpush3.bf16.msra.mxu0 %v3979_v9  ;;  %3940 = vmatpush3.bf16.msra.mxu1 %v3979_v9  ;;  %v581_v63 = vld [vmem:[%s4169_s6 + $0x50] sm:$0xff]  ;;  %v4000_v3 = vld [vmem:[%s5143_s3 + $0x108] sm:$0xff]   ;;  %v4015_v5 = vld [vmem:[%s5143_s3 + $0x178] sm:$0xff]  }
  0x21   : > { %3386 = vmatprep.subr.bf16.mxu0 %v3980_v10  ;;  %3933 = vmatprep.subr.bf16.mxu1 %v3980_v10  ;;  %v4303_v2 = vpack.c.bf16 %v582_v0, %v581_v63  ;;  %v4001_v4 = vld [vmem:[%s5143_s3 + $0xc8] sm:$0xff]   ;;  %v583_v6 = vld [vmem:[%s4169_s6 + $0x60] sm:$0xff]  ;;  %v4002_v9 = vld [vmem:[%s5143_s3 + $0x110] sm:$0xff]  }
  0x22   : > { %v584_v7 = vld [vmem:[%s4169_s6 + $0x68] sm:$0xff]  ;;  %v4019_v8 = vld [vmem:[%s5143_s3 + $0x1c0] sm:$0xff]   ;;  %v4003_v11 = vld [vmem:[%s5143_s3 + $0xd0] sm:$0xff]  }
  0x23   : > { %v4326_v10 = vpack.c.bf16 %v584_v7, %v583_v6  ;;  %v4005_v12 = vld [vmem:[%s5143_s3 + $0x118] sm:$0xff]   ;;  %v585_v13 = vld [vmem:[%s4169_s6 + $0x70] sm:$0xff]  ;;  %v587_v22 = vld [vmem:[%s4169_s6 + $0x80] sm:$0xff] }
  0x24   : > { %3387 = vmatpush3.bf16.msra.mxu0 %v3981_v17  ;;  %3941 = vmatpush3.bf16.msra.mxu1 %v3981_v17  ;;  %v586_v15 = vld [vmem:[%s4169_s6 + $0x78] sm:$0xff]  ;;  %v588_v23 = vld [vmem:[%s4169_s6 + $0x88] sm:$0xff]  ;;  %v4013_v27 = vld [vmem:[%s5143_s3 + $0x130] sm:$0xff]  }
  0x25   : > { %3388 = vmatprep.subr.bf16.mxu0 %v3982_v18  ;;  %3934 = vmatprep.subr.bf16.mxu1 %v3982_v18  ;;  %v4006_v17 = vld [vmem:[%s5143_s3 + $0xd8] sm:$0xff]   ;;  %v4008_v18 = vld [vmem:[%s5143_s3 + $0x120] sm:$0xff]   ;;  %v4011_v26 = vld [vmem:[%s5143_s3 + $0xe8] sm:$0xff]   ;;  %v4368_v28 = vpack.c.bf16 %v588_v23, %v587_v22 }
  0x26   : > { %v592_v37 = vld [vmem:[%s4169_s6 + $0xa8] sm:$0xff]  ;;  %v4017_v38 = vld [vmem:[%s5143_s3 + $0xf8] sm:$0xff]   ;;  %v4018_v39 = vld [vmem:[%s5143_s3 + $0x200] sm:$0xff]  }
  0x27   : > { %v4020_v41 = vld [vmem:[%s5143_s3 + $0x180] sm:$0xff]   ;;  %v4024_v47 = vld [vmem:[%s5143_s3 + $0x1d0] sm:$0xff]   ;;  %v4026_v50 = vld [vmem:[%s5143_s3 + $0x1d8] sm:$0xff]  }
  0x28   : > { %3389 = vmatpush3.bf16.msra.mxu0 %v3983_v19  ;;  %3942 = vmatpush3.bf16.msra.mxu1 %v3983_v19  ;;  %v4346_v19 = vpack.c.bf16 %v586_v15, %v585_v13  ;;  %v4028_v48 = vld [vmem:[%s5143_s3 + $0x210] sm:$0xff]   ;;  %v4038_v56 = vld [vmem:[%s5143_s3 + $0x220] sm:$0xff]   ;;  %v4031_v58 = vld [vmem:[%s5143_s3 + $0x1e8] sm:$0xff]  }
  0x29   : > { %3390 = vmatprep.subr.bf16.mxu0 %v3984_v20  ;;  %3935 = vmatprep.subr.bf16.mxu1 %v3984_v20  ;;  %v4009_v20 = vld [vmem:[%s5143_s3 + $0xe0] sm:$0xff]   ;;  %v4025_v49 = vld [vmem:[%s5143_s3 + $0x190] sm:$0xff]  }
  0x2a   : > { %v4040_v63 = vld [vmem:[%s5143_s3 + $0x230] sm:$0xff]  }
  0x2b   : > { %v4035_v0 = vld [vmem:[%s5143_s3 + $0x1b0] sm:$0xff]  }
  0x2c   : > { %3391 = vmatpush3.bf16.msra.mxu0 %v3985_v21  ;;  %3943 = vmatpush3.bf16.msra.mxu1 %v3985_v21  ;;  %v4010_v21 = vld [vmem:[%s5143_s3 + $0x128] sm:$0xff]  }
  0x2d   : > { %3784 = vmatprep.subr.bf16.mxu1 %v3986_v24  ;;  %3832 = vmatprep.subr.bf16.mxu0 %v3987_v25 }
  0x2f   : > { %856 = vmatmul.mubr.bf16.vlgmr.msra.gmra.mrb[0].mxu0 %v4066_v35  ;;  %952 = vmatmul.mubr.bf16.vlgmr.msra.gmra.mrb[0].mxu1 %v4213_v29 }
  0x30   : > { %3785 = vmatpush3.bf16.msra.mxu1 %v3986_v24  ;;  %3833 = vmatpush3.bf16.msra.mxu0 %v3987_v25  ;;  %v589_v24 = vld [vmem:[%s4169_s6 + $0x90] sm:$0xff]  ;;  %v590_v25 = vld [vmem:[%s4169_s6 + $0x98] sm:$0xff] }
  0x31   : > { %3786 = vmatprep.subr.bf16.mxu1 %v3988_v31  ;;  %863 = vmatprep.mubr.bf16.mxu0 %v4219_v32  ;;  %v4370_v30 = vpack.c.bf16 %v590_v25, %v589_v24 }
  0x32   : > { %959 = vmatprep.mubr.bf16.mxu1 %v4221_v33  ;;  %3834 = vmatprep.subr.bf16.mxu0 %v3991_v34 }
  0x34   : > { %3787 = vmatpush3.bf16.msra.mxu1 %v3988_v31  ;;  %3835 = vmatpush3.bf16.msra.mxu0 %v3991_v34  ;;  %v4014_v31 = vld [vmem:[%s5143_s3 + $0xf0] sm:$0xff]   ;;  %v4016_v34 = vld [vmem:[%s5143_s3 + $0x138] sm:$0xff]  }
  0x35   : > { %3788 = vmatprep.subr.bf16.mxu1 %v3989_v36  ;;  %3836 = vmatprep.subr.bf16.mxu0 %v3995_v40 }
  0x37   : > { %864 = vmatmul.mubr.bf16.gmra.mrb[4].mxu0 %v4180_v14  ;;  %960 = vmatmul.mubr.bf16.gmra.mrb[4].mxu1 %v4183_v16 }
  0x38   : > { %3789 = vmatpush3.bf16.msra.mxu1 %v3989_v36  ;;  %871 = vmatprep.mubr.bf16.mxu0 %v4240_v42  ;;  %v591_v36 = vld [vmem:[%s4169_s6 + $0xa0] sm:$0xff] }
  0x39   : > { %3790 = vmatprep.subr.bf16.mxu1 %v3990_v43  ;;  %967 = vmatprep.mubr.bf16.mxu1 %v4245_v44 }
  0x3a   : > { %3837 = vmatpush3.bf16.msra.mxu0 %v3995_v40  ;;  %v4390_v40 = vpack.c.bf16 %v592_v37, %v591_v36 }
  0x3b   : > { %3838 = vmatprep.subr.bf16.mxu0 %v3999_v45 }
  0x3c   : > { %3791 = vmatpush3.bf16.msra.mxu1 %v3990_v43  ;;  %v4021_v43 = vld [vmem:[%s5143_s3 + $0x1c8] sm:$0xff]  }
  0x3d   : > { %3792 = vmatprep.subr.bf16.mxu1 %v3992_v46 }
  0x3e   : > { %3839 = vmatpush3.bf16.msra.mxu0 %v3999_v45  ;;  %v4023_v45 = vld [vmem:[%s5143_s3 + $0x208] sm:$0xff]  }
  0x3f   : > { %872 = vmatmul.mubr.bf16.gmra.mrb[8].mxu0 %v4219_v32  ;;  %968 = vmatmul.mubr.bf16.gmra.mrb[8].mxu1 %v4221_v33 }
  0x40   : > { %3793 = vmatpush3.bf16.msra.mxu1 %v3992_v46  ;;  %879 = vmatprep.mubr.bf16.mxu0 %v4261_v51  ;;  %v4022_v46 = vld [vmem:[%s5143_s3 + $0x188] sm:$0xff]  }
  0x41   : > { %3794 = vmatprep.subr.bf16.mxu1 %v3993_v52  ;;  %975 = vmatprep.mubr.bf16.mxu1 %v4266_v53 }
  0x42   : > { %3840 = vmatprep.subr.bf16.mxu0 %v4004_v54 }
  0x43   : > { %3841 = vmatpush3.bf16.msra.mxu0 %v4004_v54  ;;  %v4027_v54 = vld [vmem:[%s5143_s3 + $0x198] sm:$0xff]  }
  0x44   : > { %3795 = vmatpush3.bf16.msra.mxu1 %v3993_v52  ;;  %3842 = vmatprep.subr.bf16.mxu0 %v4007_v57  ;;  %v4033_v52 = vld [vmem:[%s5143_s3 + $0x218] sm:$0xff]  }
  0x45   : > { %3796 = vmatprep.subr.bf16.mxu1 %v3994_v55 }
  0x47   : > { %880 = vmatmul.mubr.bf16.gmra.mrb[12].mxu0 %v4240_v42  ;;  %976 = vmatmul.mubr.bf16.gmra.mrb[12].mxu1 %v4245_v44 }
  0x48   : > { %3797 = vmatpush3.bf16.msra.mxu1 %v3994_v55  ;;  %887 = vmatprep.mubr.bf16.mxu0 %v4283_v59  ;;  %v4029_v55 = vld [vmem:[%s5143_s3 + $0x1e0] sm:$0xff]  }
  0x49   : > { %3798 = vmatprep.subr.bf16.mxu1 %v3996_v60  ;;  %3800 = vmatprep.mubr.bf16.mxu1 %v4219_v32 }
  0x4a   : > { %3843 = vmatpush3.bf16.msra.mxu0 %v4007_v57  ;;  %v4030_v57 = vld [vmem:[%s5143_s3 + $0x1a0] sm:$0xff]  }
  0x4b   : > { %3844 = vmatprep.subr.bf16.mxu0 %v4012_v62 }
  0x4c   : > { %3799 = vmatpush3.bf16.msra.mxu1 %v3996_v60  ;;  %v4039_v60 = vld [vmem:[%s5143_s3 + $0x228] sm:$0xff]  }
  0x4d   : > { %3512 = vmatprep.subr.bf16.mxu1 %v3997_v61  ;;  %v4032_v61 = vld [vmem:[%s5143_s3 + $0x1a8] sm:$0xff]  }
  0x4e   : > { %3845 = vmatpush3.bf16.msra.mxu0 %v4012_v62  ;;  %v4034_v62 = vld [vmem:[%s5143_s3 + $0x1f0] sm:$0xff]  }
  0x4f   : > { %888 = vmatmul.mubr.bf16.gmra.mrb[16].mxu0 %v4261_v51  ;;  %3801 = vmatmul.mubr.bf16.vlgmr.msra.gmra.mrb[16].mxu1 %v4240_v42 }
  0x50   : > { %3513 = vmatpush3.bf16.msra.mxu1 %v3998_v1  ;;  %895 = vmatprep.mubr.bf16.mxu0 %v4303_v2  ;;  %v4036_v1 = vld [vmem:[%s5143_s3 + $0x1f8] sm:$0xff]  }
  0x51   : > { %3804 = vmatprep.mubr.bf16.mxu1 %v4261_v51  ;;  %3514 = vmatprep.subr.bf16.mxu1 %v4000_v3  ;;  %v4041_v3 = vld [vmem:[%s5143_s3 + $0x238] sm:$0xff]  }
  0x52   : > { %3846 = vmatprep.subr.bf16.mxu0 %v4015_v5 }
  0x53   : > { %3847 = vmatpush3.bf16.msra.mxu0 %v4015_v5 }
  0x54   : > { %3515 = vmatpush3.bf16.msra.mxu1 %v4001_v4  ;;  %3648 = vmatprep.subr.bf16.mxu0 %v4019_v8  ;;  %v4037_v4 = vld [vmem:[%s5143_s3 + $0x1b8] sm:$0xff]  }
  0x55   : > { %3516 = vmatprep.subr.bf16.mxu1 %v4002_v9 }
  0x57   : > { %896 = vmatmul.mubr.bf16.gmra.mrb[20].mxu0 %v4283_v59  ;;  %3805 = vmatmul.mubr.bf16.gmra.mrb[20].mxu1 %v4283_v59 }
  0x58   : > { %903 = vmatprep.mubr.bf16.mxu0 %v4326_v10  ;;  %3808 = vmatprep.mubr.bf16.mxu1 %v4303_v2 }
  0x59   : > { %3517 = vmatpush3.bf16.msra.mxu1 %v4003_v11 }
  0x5a   : > { %3518 = vmatprep.subr.bf16.mxu1 %v4005_v12 }
  0x5d   : > { %3519 = vmatpush3.bf16.msra.mxu1 %v4006_v17 }
  0x5e   : > { %3520 = vmatprep.subr.bf16.mxu1 %v4008_v18 }
  0x5f   : > { %904 = vmatmul.mubr.bf16.gmra.mrb[24].mxu0 %v4303_v2  ;;  %3809 = vmatmul.mubr.bf16.gmra.mrb[24].mxu1 %v4326_v10 }
  0x60   : > { %911 = vmatprep.mubr.bf16.mxu0 %v4346_v19  ;;  %3812 = vmatprep.mubr.bf16.mxu1 %v4346_v19 }
  0x61   : > { %3521 = vmatpush3.bf16.msra.mxu1 %v4009_v20 }
  0x62   : > { %3522 = vmatprep.subr.bf16.mxu1 %v4010_v21 }
  0x65   : > { %3523 = vmatpush3.bf16.msra.mxu1 %v4011_v26 }
  0x66   : > { %3524 = vmatprep.subr.bf16.mxu1 %v4013_v27 }
  0x67   : > { %912 = vmatmul.mubr.bf16.gmra.mrb[28].mxu0 %v4326_v10  ;;  %3813 = vmatmul.mubr.bf16.gmra.mrb[28].mxu1 %v4368_v28 }
  0x68   : > { %919 = vmatprep.mubr.bf16.mxu0 %v4368_v28  ;;  %3816 = vmatprep.mubr.bf16.mxu1 %v4370_v30 }
  0x69   : > { %3525 = vmatpush3.bf16.msra.mxu1 %v4014_v31 }
  0x6a   : > { %3526 = vmatprep.subr.bf16.mxu1 %v4016_v34 }
  0x6d   : > { %3527 = vmatpush3.bf16.msra.mxu1 %v4017_v38 }
  0x6e   : > { %3880 = vmatprep.subr.bf16.mxu1 %v4018_v39 }
  0x6f   : > { %920 = vmatmul.mubr.bf16.gmra.mrb[32].mxu0 %v4346_v19  ;;  %3817 = vmatmul.mubr.bf16.gmra.mrb[32].mxu1 %v4390_v40 }
  0x70   : > { %927 = vmatprep.mubr.bf16.mxu0 %v4370_v30  ;;  %3820 = vmatprep.mubr.bf16.mxu1 %v4213_v29 }
  0x77   : > { %928 = vmatmul.mubr.bf16.gmra.mrb[36].mxu0 %v4368_v28  ;;  %3821 = vmatmul.mubr.bf16.gmra.mrb[36].mxu1 %v4183_v16 }
  0x78   : > { %935 = vmatprep.mubr.bf16.mxu0 %v4390_v40  ;;  %3824 = vmatprep.mubr.bf16.mxu1 %v4221_v33 }
  0x7f   : > { %936 = vmatmul.mubr.bf16.gmra.mrb[40].mxu0 %v4370_v30  ;;  %3825 = vmatmul.mubr.bf16.gmra.mrb[40].mxu1 %v4245_v44 }
  0x80   : > { %943 = vmatprep.mubr.bf16.mxu0 %v4213_v29  ;;  %3828 = vmatprep.mubr.bf16.mxu1 %v4266_v53 }
  0x87   : > { %944 = vmatmul.mubr.bf16.gmra.mrb[44].mxu0 %v4390_v40  ;;  %3829 = vmatmul.mubr.bf16.gmra.mrb[44].mxu1 %v4066_v35 }
  0x88   : > { %1370 = vmatprep.mubr.bf16.mxu1 %v4180_v14  ;;  %3848 = vmatprep.mubr.bf16.mxu0 %v4219_v32 }
  0x8f   : > { %1371 = vmatmul.mubr.bf16.vlgmr.msra.gmra.mrb[48].mxu1 %v4066_v35  ;;  %3849 = vmatmul.mubr.bf16.vlgmr.msra.gmra.mrb[48].mxu0 %v4240_v42 }
  0x90   : > { %3881 = vmatpush3.bf16.msra.mxu1 %v4018_v39  ;;  %3649 = vmatpush3.bf16.msra.mxu0 %v4020_v41 }
  0x91   : > { %1378 = vmatprep.mubr.bf16.mxu1 %v4219_v32  ;;  %3852 = vmatprep.mubr.bf16.mxu0 %v4261_v51 }
  0x92   : > { %3650 = vmatprep.subr.bf16.mxu0 %v4021_v43  ;;  %3882 = vmatprep.subr.bf16.mxu1 %v4023_v45 }
  0x94   : > { %3651 = vmatpush3.bf16.msra.mxu0 %v4022_v46  ;;  %3883 = vmatpush3.bf16.msra.mxu1 %v4023_v45 }
  0x95   : > { %3652 = vmatprep.subr.bf16.mxu0 %v4024_v47  ;;  %3884 = vmatprep.subr.bf16.mxu1 %v4028_v48 }
  0x97   : > { %1379 = vmatmul.mubr.bf16.gmra.mrb[52].mxu1 %v4180_v14  ;;  %3853 = vmatmul.mubr.bf16.gmra.mrb[52].mxu0 %v4283_v59 }
  0x98   : > { %1386 = vmatprep.mubr.bf16.mxu1 %v4240_v42  ;;  %3856 = vmatprep.mubr.bf16.mxu0 %v4303_v2 }
  0x99   : > { %3653 = vmatpush3.bf16.msra.mxu0 %v4025_v49  ;;  %3885 = vmatpush3.bf16.msra.mxu1 %v4028_v48 }
  0x9a   : > { %3654 = vmatprep.subr.bf16.mxu0 %v4026_v50  ;;  %3886 = vmatprep.subr.bf16.mxu1 %v4033_v52 }
  0x9d   : > { %3655 = vmatpush3.bf16.msra.mxu0 %v4027_v54  ;;  %3887 = vmatpush3.bf16.msra.mxu1 %v4033_v52 }
  0x9e   : > { %3656 = vmatprep.subr.bf16.mxu0 %v4029_v55  ;;  %3888 = vmatprep.subr.bf16.mxu1 %v4038_v56 }
  0x9f   : > { %1387 = vmatmul.mubr.bf16.gmra.mrb[56].mxu1 %v4219_v32  ;;  %3857 = vmatmul.mubr.bf16.gmra.mrb[56].mxu0 %v4326_v10 }
  0xa0   : > { %1394 = vmatprep.mubr.bf16.mxu1 %v4261_v51  ;;  %3860 = vmatprep.mubr.bf16.mxu0 %v4346_v19 }
  0xa1   : > { %3657 = vmatpush3.bf16.msra.mxu0 %v4030_v57  ;;  %3889 = vmatpush3.bf16.msra.mxu1 %v4038_v56 }
  0xa2   : > { %3658 = vmatprep.subr.bf16.mxu0 %v4031_v58  ;;  %3890 = vmatprep.subr.bf16.mxu1 %v4039_v60 }
  0xa5   : > { %3659 = vmatpush3.bf16.msra.mxu0 %v4032_v61  ;;  %3891 = vmatpush3.bf16.msra.mxu1 %v4039_v60 }
  0xa6   : > { %3660 = vmatprep.subr.bf16.mxu0 %v4034_v62  ;;  %3892 = vmatprep.subr.bf16.mxu1 %v4040_v63 }
  0xa7   : > { %1395 = vmatmul.mubr.bf16.gmra.mrb[60].mxu1 %v4240_v42  ;;  %3861 = vmatmul.mubr.bf16.gmra.mrb[60].mxu0 %v4368_v28 }
  0xa8   : > { %1402 = vmatprep.mubr.bf16.mxu1 %v4283_v59  ;;  %3864 = vmatprep.mubr.bf16.mxu0 %v4370_v30 }
  0xa9   : > { %3661 = vmatpush3.bf16.msra.mxu0 %v4035_v0  ;;  %3893 = vmatpush3.bf16.msra.mxu1 %v4040_v63 }
  0xaa   : > { %3662 = vmatprep.subr.bf16.mxu0 %v4036_v1  ;;  %3894 = vmatprep.subr.bf16.mxu1 %v4041_v3 }
  0xad   : > { %3663 = vmatpush3.bf16.msra.mxu0 %v4037_v4  ;;  %3895 = vmatpush3.bf16.msra.mxu1 %v4041_v3 }
  0xaf   : > { %1403 = vmatmul.mubr.bf16.gmra.mrb[64].mxu1 %v4261_v51  ;;  %3865 = vmatmul.mubr.bf16.gmra.mrb[64].mxu0 %v4390_v40 }
  0xb0   : > { %1410 = vmatprep.mubr.bf16.mxu1 %v4303_v2  ;;  %3868 = vmatprep.mubr.bf16.mxu0 %v4213_v29 }
  0xb7   : > { %1411 = vmatmul.mubr.bf16.gmra.mrb[68].mxu1 %v4283_v59  ;;  %3869 = vmatmul.mubr.bf16.gmra.mrb[68].mxu0 %v4183_v16 }
  0xb8   : > { %1418 = vmatprep.mubr.bf16.mxu1 %v4326_v10  ;;  %3872 = vmatprep.mubr.bf16.mxu0 %v4221_v33 }
  0xbf   : > { %1419 = vmatmul.mubr.bf16.gmra.mrb[72].mxu1 %v4303_v2  ;;  %3873 = vmatmul.mubr.bf16.gmra.mrb[72].mxu0 %v4245_v44 }
  0xc0   : > { %1426 = vmatprep.mubr.bf16.mxu1 %v4346_v19  ;;  %3876 = vmatprep.mubr.bf16.mxu0 %v4266_v53 }
  0xc7   : > { %1427 = vmatmul.mubr.bf16.gmra.mrb[76].mxu1 %v4326_v10  ;;  %3877 = vmatmul.mubr.bf16.gmra.mrb[76].mxu0 %v4066_v35 }
  0xc8   : > { %1434 = vmatprep.mubr.bf16.mxu1 %v4368_v28  ;;  %1885 = vmatprep.mubr.bf16.mxu0 %v4180_v14 }
  0xcf   : > { %1435 = vmatmul.mubr.bf16.gmra.mrb[80].mxu1 %v4346_v19  ;;  %1886 = vmatmul.mubr.bf16.vlgmr.msra.gmra.mrb[80].mxu0 %v4066_v35 }
  0xd0   : > { %1442 = vmatprep.mubr.bf16.mxu1 %v4370_v30  ;;  %1893 = vmatprep.mubr.bf16.mxu0 %v4219_v32 }
  0xd7   : > { %1443 = vmatmul.mubr.bf16.gmra.mrb[84].mxu1 %v4368_v28  ;;  %1894 = vmatmul.mubr.bf16.gmra.mrb[84].mxu0 %v4180_v14 }
  0xd8   : > { %1450 = vmatprep.mubr.bf16.mxu1 %v4390_v40  ;;  %1901 = vmatprep.mubr.bf16.mxu0 %v4240_v42 }
  0xdf   : > { %1451 = vmatmul.mubr.bf16.gmra.mrb[88].mxu1 %v4370_v30  ;;  %1902 = vmatmul.mubr.bf16.gmra.mrb[88].mxu0 %v4219_v32 }
  0xe0   : > { %1458 = vmatprep.mubr.bf16.mxu1 %v4213_v29  ;;  %1909 = vmatprep.mubr.bf16.mxu0 %v4261_v51 }
  0xe7   : > { %1459 = vmatmul.mubr.bf16.gmra.mrb[92].mxu1 %v4390_v40  ;;  %1910 = vmatmul.mubr.bf16.gmra.mrb[92].mxu0 %v4240_v42 }
  0xe8   : > { %1466 = vmatprep.mubr.bf16.mxu1 %v4183_v16  ;;  %1917 = vmatprep.mubr.bf16.mxu0 %v4283_v59 }
  0xef   : > { %1467 = vmatmul.mubr.bf16.gmra.mrb[96].mxu1 %v4213_v29  ;;  %1918 = vmatmul.mubr.bf16.gmra.mrb[96].mxu0 %v4261_v51 }
  0xf0   : > { %1474 = vmatprep.mubr.bf16.mxu1 %v4221_v33  ;;  %1925 = vmatprep.mubr.bf16.mxu0 %v4303_v2 }
  0xf7   : > { %1475 = vmatmul.mubr.bf16.gmra.mrb[100].mxu1 %v4183_v16  ;;  %1926 = vmatmul.mubr.bf16.gmra.mrb[100].mxu0 %v4283_v59 }
  0xf8   : > { %1482 = vmatprep.mubr.bf16.mxu1 %v4245_v44  ;;  %1933 = vmatprep.mubr.bf16.mxu0 %v4326_v10 }
  0xff   : > { %1483 = vmatmul.mubr.bf16.gmra.mrb[104].mxu1 %v4221_v33  ;;  %1934 = vmatmul.mubr.bf16.gmra.mrb[104].mxu0 %v4303_v2 }
 0x100   : > { %1490 = vmatprep.mubr.bf16.mxu1 %v4266_v53  ;;  %1941 = vmatprep.mubr.bf16.mxu0 %v4346_v19 }
 0x102   : > { %v3392_v14 = vpop.f32.mrb[0].mxu0  ;;  %v3464_v5 = vpop.f32.mrb[0].mxu1 }
 0x103   : > { %v3393_v6 = vpop.f32.mrb[1].mxu0  ;;  %v3465_v7 = vpop.f32.mrb[1].mxu1 }
 0x104   : > { %v4534_v8 = vadd.f32 %v3393_v6, %v3392_v14  ;;  %v4536_v9 = vadd.f32 %v3465_v7, %v3464_v5  ;;  %v3395_v11 = vpop.f32.mrb[2].mxu0  ;;  %v3467_v12 = vpop.f32.mrb[2].mxu1 }
 0x105   : > { %v3396_v13 = vpop.f32.mrb[3].mxu0  ;;  %v3468_v15 = vpop.f32.mrb[3].mxu1 }
 0x106   : > { %v4538_v17 = vadd.f32 %v3396_v13, %v3395_v11  ;;  %v4540_v18 = vadd.f32 %v3468_v15, %v3467_v12 }
 0x107   : > { %1491 = vmatmul.mubr.bf16.gmra.mrb[108].mxu1 %v4245_v44  ;;  %1942 = vmatmul.mubr.bf16.gmra.mrb[108].mxu0 %v4326_v10 }
 0x108   : > { %1949 = vmatprep.mubr.bf16.mxu0 %v4368_v28  ;;  %3896 = vmatprep.mubr.bf16.mxu1 %v4219_v32 }
 0x10a   : > { %v3398_v20 = vpop.f32.mrb[4].mxu0  ;;  %v3470_v21 = vpop.f32.mrb[4].mxu1 }
 0x10b   : > { %v3399_v22 = vpop.f32.mrb[5].mxu0  ;;  %v3471_v23 = vpop.f32.mrb[5].mxu1 }
 0x10c   : > { %v3400_v24 = vadd.f32 %v3399_v22, %v3398_v20  ;;  %v4546_v25 = vadd.f32 %v3471_v23, %v3470_v21  ;;  %v3401_v26 = vpop.f32.mrb[6].mxu0  ;;  %v3473_v27 = vpop.f32.mrb[6].mxu1 }
 0x10d   : > { %v3402_v31 = vpop.f32.mrb[7].mxu0  ;;  %v3474_v34 = vpop.f32.mrb[7].mxu1 }
 0x10e   : > { %v3403_v36 = vadd.f32 %v3402_v31, %v3401_v26  ;;  %v4548_v37 = vadd.f32 %v3474_v34, %v3473_v27 }
 0x10f   : > { %1950 = vmatmul.mubr.bf16.gmra.mrb[112].mxu0 %v4346_v19  ;;  %3897 = vmatmul.mubr.bf16.vlgmr.msra.gmra.mrb[112].mxu1 %v4240_v42 }
 0x110   : > { %1957 = vmatprep.mubr.bf16.mxu0 %v4370_v30  ;;  %3900 = vmatprep.mubr.bf16.mxu1 %v4261_v51 }
 0x112   : > { %v3404_v32 = vpop.f32.mrb[8].mxu0  ;;  %v3476_v38 = vpop.f32.mrb[8].mxu1 }
 0x113   : > { %v3405_v39 = vpop.f32.mrb[9].mxu0  ;;  %v3477_v41 = vpop.f32.mrb[9].mxu1 }
 0x114   : > { %v3406_v43 = vadd.f32 %v3405_v39, %v3404_v32  ;;  %v4554_v45 = vadd.f32 %v3477_v41, %v3476_v38  ;;  %v3407_v46 = vpop.f32.mrb[10].mxu0  ;;  %v3479_v47 = vpop.f32.mrb[10].mxu1 }
 0x115   : > { %v3408_v48 = vpop.f32.mrb[11].mxu0  ;;  %v3480_v49 = vpop.f32.mrb[11].mxu1 }
 0x116   : > { %v3409_v50 = vadd.f32 %v3408_v48, %v3407_v46  ;;  %v4556_v52 = vadd.f32 %v3480_v49, %v3479_v47 }
 0x117   : > { %1958 = vmatmul.mubr.bf16.gmra.mrb[116].mxu0 %v4368_v28  ;;  %3901 = vmatmul.mubr.bf16.gmra.mrb[116].mxu1 %v4283_v59 }
 0x118   : > { %1965 = vmatprep.mubr.bf16.mxu0 %v4390_v40  ;;  %3904 = vmatprep.mubr.bf16.mxu1 %v4303_v2 }
 0x11a   : > { %v3410_v42 = vpop.f32.mrb[12].mxu0  ;;  %v3482_v51 = vpop.f32.mrb[12].mxu1 }
 0x11b   : > { %v3411_v54 = vpop.f32.mrb[13].mxu0  ;;  %v3483_v55 = vpop.f32.mrb[13].mxu1 }
 0x11c   : > { %v3412_v56 = vadd.f32 %v3411_v54, %v3410_v42  ;;  %v4562_v57 = vadd.f32 %v3483_v55, %v3482_v51  ;;  %v3413_v58 = vpop.f32.mrb[14].mxu0  ;;  %v3485_v60 = vpop.f32.mrb[14].mxu1 }
 0x11d   : > { %v3414_v61 = vpop.f32.mrb[15].mxu0  ;;  %v3486_v62 = vpop.f32.mrb[15].mxu1 }
 0x11e   : > { %v3415_v63 = vadd.f32 %v3414_v61, %v3413_v58  ;;  %v4564_v0 = vadd.f32 %v3486_v62, %v3485_v60 }
 0x11f   : > { %1966 = vmatmul.mubr.bf16.gmra.mrb[120].mxu0 %v4370_v30  ;;  %3905 = vmatmul.mubr.bf16.gmra.mrb[120].mxu1 %v4326_v10 }
 0x120   : > { %1973 = vmatprep.mubr.bf16.mxu0 %v4213_v29  ;;  %3908 = vmatprep.mubr.bf16.mxu1 %v4346_v19 }
 0x122   : > { %v3416_v59 = vpop.f32.mrb[16].mxu0  ;;  %v3802_v2 = vpop.f32.mrb[16].mxu1 }
 0x123   : > { %v4570_v1 = vadd.f32 %v3802_v2, %v3400_v24  ;;  %v3417_v3 = vpop.f32.mrb[17].mxu0  ;;  %v1018_v4 = vpop.f32.mrb[17].mxu1 }
 0x124   : > { %v3418_v14 = vadd.f32 %v3417_v3, %v3416_v59  ;;  %v4573_v5 = vadd.f32 %v4534_v8, %v1018_v4  ;;  %v3419_v6 = vpop.f32.mrb[18].mxu0  ;;  %v3803_v7 = vpop.f32.mrb[18].mxu1 }
 0x125   : > { %v1030_v11 = vadd.f32 %v3803_v7, %v3403_v36  ;;  %v3420_v12 = vpop.f32.mrb[19].mxu0  ;;  %v1021_v13 = vpop.f32.mrb[19].mxu1  ;;  %v2211_v19 = vrot.slane %v4570_v1, 7 }
 0x126   : > { %v3421_v10 = vadd.f32 %v3420_v12, %v3419_v6  ;;  %v1022_v15 = vadd.f32 %v4538_v17, %v1021_v13  ;;  %v2208_v21 = vrot.slane %v4573_v5, 7 }
 0x127   : > { %v2212_v20 = vrot.slane %v1030_v11, 7  ;;  %1974 = vmatmul.mubr.bf16.gmra.mrb[124].mxu0 %v4390_v40  ;;  %3909 = vmatmul.mubr.bf16.gmra.mrb[124].mxu1 %v4368_v28  ;;  %v2289_v5 = vsel %vm2207_vm0, 0.0, %v2211_v19 }
 0x128   : > { %v2209_v8 = vrot.slane %v1022_v15, 7  ;;  %1981 = vmatprep.mubr.bf16.mxu0 %v4183_v16  ;;  %3912 = vmatprep.mubr.bf16.mxu1 %v4370_v30 }
 0x129   : > { %v4585_v22 = vsel %vm2207_vm0, %v2211_v19, %v2212_v20 }
 0x12a   : > { %v3422_v17 = vpop.f32.mrb[20].mxu0  ;;  %v3806_v23 = vpop.f32.mrb[20].mxu1  ;;  %v4590_v24 = vsel %vm2207_vm0, %v2208_v21, %v2209_v8 }
 0x12b   : > { %v4592_v28 = vadd.f32 %v3806_v23, %v3412_v56  ;;  %v3423_v26 = vpop.f32.mrb[21].mxu0  ;;  %v1034_v27 = vpop.f32.mrb[21].mxu1 }
 0x12c   : > { %v3424_v31 = vadd.f32 %v3423_v26, %v3422_v17  ;;  %v4594_v34 = vadd.f32 %v3406_v43, %v1034_v27  ;;  %v3425_v30 = vpop.f32.mrb[22].mxu0  ;;  %v3807_v36 = vpop.f32.mrb[22].mxu1 }
 0x12d   : > { %v1046_v32 = vadd.f32 %v3807_v36, %v3415_v63  ;;  %v3426_v38 = vpop.f32.mrb[23].mxu0  ;;  %v1037_v39 = vpop.f32.mrb[23].mxu1  ;;  %v2217_v47 = vrot.slane %v4592_v28, 7 }
 0x12e   : > { %v3427_v41 = vadd.f32 %v3426_v38, %v3425_v30  ;;  %v1038_v46 = vadd.f32 %v3409_v50, %v1037_v39  ;;  %v2214_v49 = vrot.slane %v4594_v34, 7 }
 0x12f   : > { %v2218_v48 = vrot.slane %v1046_v32, 7  ;;  %1982 = vmatmul.mubr.bf16.gmra.mrb[128].mxu0 %v4213_v29  ;;  %3913 = vmatmul.mubr.bf16.gmra.mrb[128].mxu1 %v4390_v40 }
 0x130   : > { %v2215_v42 = vrot.slane %v1038_v46, 7  ;;  %1989 = vmatprep.mubr.bf16.mxu0 %v4221_v33  ;;  %3916 = vmatprep.mubr.bf16.mxu1 %v4213_v29  ;;  %v2290_v1 = vsel %vm2207_vm0, 0.0, %v2214_v49 }
 0x131   : > { %v4605_v43 = vsel %vm2207_vm0, %v2217_v47, %v2218_v48 }
 0x132   : > { %v3428_v50 = vpop.f32.mrb[24].mxu0  ;;  %v3810_v51 = vpop.f32.mrb[24].mxu1  ;;  %v4610_v54 = vsel %vm2207_vm0, %v2214_v49, %v2215_v42  ;;  %v2291_v49 = vsel %vm2207_vm0, 0.0, %v2217_v47 }
 0x133   : > { %v4612_v40 = vadd.f32 %v3810_v51, %v3424_v31  ;;  %v3429_v55 = vpop.f32.mrb[25].mxu0  ;;  %v1050_v56 = vpop.f32.mrb[25].mxu1 }
 0x134   : > { %v3430_v58 = vadd.f32 %v3429_v55, %v3428_v50  ;;  %v4614_v60 = vadd.f32 %v3418_v14, %v1050_v56  ;;  %v3431_v29 = vpop.f32.mrb[26].mxu0  ;;  %v3811_v61 = vpop.f32.mrb[26].mxu1 }
 0x135   : > { %v1062_v62 = vadd.f32 %v3811_v61, %v3427_v41  ;;  %v3432_v63 = vpop.f32.mrb[27].mxu0  ;;  %v1053_v59 = vpop.f32.mrb[27].mxu1  ;;  %v2223_v4 = vrot.slane %v4612_v40, 7 }
 0x136   : > { %v3433_v2 = vadd.f32 %v3432_v63, %v3431_v29  ;;  %v1054_v3 = vadd.f32 %v3421_v10, %v1053_v59  ;;  %v2220_v7 = vrot.slane %v4614_v60, 7 }
 0x137   : > { %v2224_v6 = vrot.slane %v1062_v62, 7  ;;  %1990 = vmatmul.mubr.bf16.gmra.mrb[132].mxu0 %v4183_v16  ;;  %3917 = vmatmul.mubr.bf16.gmra.mrb[132].mxu1 %v4183_v16 }
 0x138   : > { %v2221_v11 = vrot.slane %v1054_v3, 7  ;;  %1997 = vmatprep.mubr.bf16.mxu0 %v4245_v44  ;;  %3920 = vmatprep.mubr.bf16.mxu1 %v4221_v33 }
 0x139   : > { %v4625_v14 = vsel %vm2207_vm0, %v2223_v4, %v2224_v6 }
 0x13a   : > { %v3434_v12 = vpop.f32.mrb[28].mxu0  ;;  %v3814_v13 = vpop.f32.mrb[28].mxu1  ;;  %v4630_v10 = vsel %vm2207_vm0, %v2220_v7, %v2221_v11 }
 0x13b   : > { %v3435_v16 = vpop.f32.mrb[29].mxu0  ;;  %v1066_v15 = vpop.f32.mrb[29].mxu1 }
 0x13c   : > { %v3436_v20 = vadd.f32 %v3435_v16, %v3434_v12  ;;  %v4632_v8 = vadd.f32 %v3430_v58, %v1066_v15  ;;  %v3437_v17 = vpop.f32.mrb[30].mxu0  ;;  %v3815_v23 = vpop.f32.mrb[30].mxu1 }
 0x13d   : > { %v3438_v26 = vpop.f32.mrb[31].mxu0  ;;  %v1069_v27 = vpop.f32.mrb[31].mxu1 }
 0x13e   : > { %v4634_v31 = vadd.f32 %v3814_v13, %v3436_v20  ;;  %v3439_v30 = vadd.f32 %v3438_v26, %v3437_v17  ;;  %v1070_v36 = vadd.f32 %v3433_v2, %v1069_v27  ;;  %v2226_v32 = vrot.slane %v4632_v8, 7 }
 0x13f   : > { %1998 = vmatmul.mubr.bf16.gmra.mrb[136].mxu0 %v4221_v33  ;;  %3921 = vmatmul.mubr.bf16.gmra.mrb[136].mxu1 %v4245_v44 }
 0x140   : > { %v1078_v38 = vadd.f32 %v3815_v23, %v3439_v30  ;;  %v2227_v39 = vrot.slane %v1070_v36, 7  ;;  %2005 = vmatprep.mubr.bf16.mxu0 %v4266_v53  ;;  %3924 = vmatprep.mubr.bf16.mxu1 %v4266_v53  ;;  %v5156_v41 = vrot.slane %v4634_v31, 7 }
 0x142   : > { %v2230_v46 = vrot.slane %v1078_v38, 7  ;;  %v3440_v48 = vpop.f32.mrb[32].mxu0  ;;  %v3818_v42 = vpop.f32.mrb[32].mxu1  ;;  %v4645_v50 = vsel %vm2207_vm0, %v2226_v32, %v2227_v39 }
 0x143   : > { %v3441_v33 = vpop.f32.mrb[33].mxu0  ;;  %v1082_v51 = vpop.f32.mrb[33].mxu1 }
 0x144   : > { %v3442_v55 = vadd.f32 %v3441_v33, %v3440_v48  ;;  %v3443_v56 = vpop.f32.mrb[34].mxu0  ;;  %v3819_v58 = vpop.f32.mrb[34].mxu1  ;;  %v4650_v29 = vsel %vm2207_vm0, %v5156_v41, %v2230_v46 }
 0x145   : > { %v3444_v53 = vpop.f32.mrb[35].mxu0  ;;  %v1085_v61 = vpop.f32.mrb[35].mxu1 }
 0x146   : > { %v4652_v62 = vadd.f32 %v3442_v55, %v1082_v51  ;;  %v3445_v63 = vadd.f32 %v3444_v53, %v3443_v56 }
 0x147   : > { %2006 = vmatmul.mubr.bf16.gmra.mrb[140].mxu0 %v4245_v44  ;;  %3925 = vmatmul.mubr.bf16.gmra.mrb[140].mxu1 %v4066_v35 }
 0x148   : > { %v1086_v59 = vadd.f32 %v3445_v63, %v1085_v61  ;;  %v5155_v2 = vrot.slane %v4652_v62, 7 }
 0x14a   : > { %v2233_v3 = vrot.slane %v1086_v59, 7  ;;  %v3446_v6 = vpop.f32.mrb[36].mxu0  ;;  %v3822_v11 = vpop.f32.mrb[36].mxu1 }
 0x14b   : > { %v3447_v12 = vpop.f32.mrb[37].mxu0  ;;  %v1098_v13 = vpop.f32.mrb[37].mxu1 }
 0x14c   : > { %v3448_v16 = vadd.f32 %v3447_v12, %v3446_v6  ;;  %v3449_v15 = vpop.f32.mrb[38].mxu0  ;;  %v3823_v20 = vpop.f32.mrb[38].mxu1  ;;  %v4660_v17 = vsel %vm2207_vm0, %v5155_v2, %v2233_v3 }
 0x14d   : > { %v3450_v23 = vpop.f32.mrb[39].mxu0  ;;  %v1101_v44 = vpop.f32.mrb[39].mxu1 }
 0x14e   : > { %v4662_v26 = vadd.f32 %v3818_v42, %v3448_v16  ;;  %v3451_v35 = vadd.f32 %v3450_v23, %v3449_v15 }
 0x150   : > { %v1094_v27 = vadd.f32 %v3819_v58, %v3451_v35  ;;  %v5154_v30 = vrot.slane %v4662_v26, 7 }
 0x152   : > { %v2236_v36 = vrot.slane %v1094_v27, 7  ;;  %v3452_v38 = vpop.f32.mrb[40].mxu0  ;;  %v3826_v39 = vpop.f32.mrb[40].mxu1 }
 0x153   : > { %v4666_v46 = vadd.f32 %v3826_v39, %v4546_v25  ;;  %v3453_v48 = vpop.f32.mrb[41].mxu0  ;;  %v1114_v33 = vpop.f32.mrb[41].mxu1 }
 0x154   : > { %v3454_v51 = vadd.f32 %v3453_v48, %v3452_v38  ;;  %v4669_v55 = vadd.f32 %v4536_v9, %v1114_v33  ;;  %v3455_v56 = vpop.f32.mrb[42].mxu0  ;;  %v3827_v53 = vpop.f32.mrb[42].mxu1  ;;  %v4674_v42 = vsel %vm2207_vm0, %v5154_v30, %v2236_v36 }
 0x155   : > { %v1126_v58 = vadd.f32 %v3827_v53, %v4548_v37  ;;  %v3456_v61 = vpop.f32.mrb[43].mxu0  ;;  %v1117_v63 = vpop.f32.mrb[43].mxu1  ;;  %v5150_v6 = vrot.slane %v4666_v46, 7 }
 0x156   : > { %v4677_v59 = vadd.f32 %v3454_v51, %v1098_v13  ;;  %v3457_v25 = vadd.f32 %v3456_v61, %v3455_v56  ;;  %v1118_v3 = vadd.f32 %v4540_v18, %v1117_v63  ;;  %v5151_v12 = vrot.slane %v4669_v55, 7 }
 0x157   : > { %v2248_v9 = vrot.slane %v1126_v58, 7 }
 0x158   : > { %v1102_v16 = vadd.f32 %v3457_v25, %v1101_v44  ;;  %v2245_v15 = vrot.slane %v1118_v3, 7  ;;  %v5153_v37 = vrot.slane %v4677_v59, 7 }
 0x159   : > { %v4685_v23 = vsel %vm2207_vm0, %v5150_v6, %v2248_v9 }
 0x15a   : > { %v2239_v35 = vrot.slane %v1102_v16, 7  ;;  %v3458_v13 = vpop.f32.mrb[44].mxu0  ;;  %v3830_v27 = vpop.f32.mrb[44].mxu1  ;;  %v4691_v18 = vsel %vm2207_vm0, %v5151_v12, %v2245_v15 }
 0x15b   : > { %v1139_v36 = vadd.f32 %v3830_v27, %v4562_v57  ;;  %v3459_v38 = vpop.f32.mrb[45].mxu0  ;;  %v1130_v44 = vpop.f32.mrb[45].mxu1 }
 0x15c   : > { %v3460_v39 = vadd.f32 %v3459_v38, %v3458_v13  ;;  %v1131_v48 = vadd.f32 %v4554_v45, %v1130_v44  ;;  %v3461_v33 = vpop.f32.mrb[46].mxu0  ;;  %v3831_v51 = vpop.f32.mrb[46].mxu1  ;;  %v4698_v56 = vsel %vm2207_vm0, %v5153_v37, %v2239_v35 }
 0x15d   : > { %v2253_v53 = vrot.slane %v1139_v36, 7  ;;  %v1142_v58 = vadd.f32 %v3831_v51, %v4564_v0  ;;  %v3462_v61 = vpop.f32.mrb[47].mxu0  ;;  %v1133_v63 = vpop.f32.mrb[47].mxu1 }
 0x15e   : > { %v4701_v25 = vadd.f32 %v3822_v11, %v3460_v39  ;;  %v2250_v57 = vrot.slane %v1131_v48, 7  ;;  %v3463_v3 = vadd.f32 %v3462_v61, %v3461_v33  ;;  %v1134_v9 = vadd.f32 %v4556_v52, %v1133_v63 }
 0x15f   : > { %v4705_v45 = vsel %vm2207_vm0, 0.0, %v2253_v53  ;;  %v2254_v16 = vrot.slane %v1142_v58, 7 }
 0x160   : > { %v4708_v15 = vsel %vm2207_vm0, 0.0, %v2250_v57  ;;  %v1110_v35 = vadd.f32 %v3823_v20, %v3463_v3  ;;  %v2251_v13 = vrot.slane %v1134_v9, 7  ;;  %v5152_v0 = vrot.slane %v4701_v25, 7 }
 0x161   : > { %v4711_v27 = vsel %vm2207_vm0, %v2253_v53, %v2254_v16  ;;  %v2288_v3 = vsel %vm2207_vm0, 0.0, %v2208_v21 }
 0x162   : > { %v2242_v11 = vrot.slane %v1110_v35, 7  ;;  %v3528_v36 = vpop.f32.mrb[48].mxu1  ;;  %v3850_v38 = vpop.f32.mrb[48].mxu0  ;;  %v4715_v44 = vsel %vm2207_vm0, %v2250_v57, %v2251_v13 }
 0x163   : > { %v3529_v52 = vpop.f32.mrb[49].mxu1  ;;  %v1533_v39 = vpop.f32.mrb[49].mxu0 }
 0x164   : > { %v3530_v48 = vadd.f32 %v3529_v52, %v3528_v36  ;;  %v3531_v33 = vpop.f32.mrb[50].mxu1  ;;  %v3851_v51 = vpop.f32.mrb[50].mxu0  ;;  %v4720_v20 = vsel %vm2207_vm0, %v5152_v0, %v2242_v11 }
 0x165   : > { %v3532_v53 = vpop.f32.mrb[51].mxu1  ;;  %v1536_v58 = vpop.f32.mrb[51].mxu0 }
 0x166   : > { %v1534_v61 = vadd.f32 %v3530_v48, %v1533_v39  ;;  %v3533_v63 = vadd.f32 %v3532_v53, %v3531_v33 }
 0x168   : > { %v4725_v57 = vadd.f32 %v2288_v3, %v1534_v61  ;;  %v1537_v9 = vadd.f32 %v3533_v63, %v1536_v58 }
 0x16a   : > { %v4728_v16 = vadd.f32 %v4590_v24, %v1537_v9  ;;  %v3534_v35 = vpop.f32.mrb[52].mxu1  ;;  %v3854_v13 = vpop.f32.mrb[52].mxu0 }
 0x16b   : > { %v3535_v36 = vpop.f32.mrb[53].mxu1  ;;  %v1549_v52 = vpop.f32.mrb[53].mxu0 }
 0x16c   : > { %v3536_v11 = vadd.f32 %v3535_v36, %v3534_v35  ;;  %v3537_v6 = vpop.f32.mrb[54].mxu1  ;;  %v3855_v12 = vpop.f32.mrb[54].mxu0 }
 0x16d   : > { %v3538_v0 = vpop.f32.mrb[55].mxu1  ;;  %v1552_v39 = vpop.f32.mrb[55].mxu0 }
 0x16e   : > { %v1542_v48 = vadd.f32 %v3850_v38, %v3536_v11  ;;  %v3539_v33 = vadd.f32 %v3538_v0, %v3537_v6 }
 0x170   : > { %v4733_v21 = vadd.f32 %v2289_v5, %v1542_v48  ;;  %v1545_v53 = vadd.f32 %v3851_v51, %v3539_v33 }
 0x172   : > { %v4736_v24 = vadd.f32 %v4585_v22, %v1545_v53  ;;  %v3540_v58 = vpop.f32.mrb[56].mxu1  ;;  %v3858_v61 = vpop.f32.mrb[56].mxu0 }
 0x173   : > { %v3541_v63 = vpop.f32.mrb[57].mxu1  ;;  %v1565_v3 = vpop.f32.mrb[57].mxu0 }
 0x174   : > { %v3542_v9 = vadd.f32 %v3541_v63, %v3540_v58  ;;  %v3543_v35 = vpop.f32.mrb[58].mxu1  ;;  %v3859_v36 = vpop.f32.mrb[58].mxu0 }
 0x175   : > { %v3544_v37 = vpop.f32.mrb[59].mxu1  ;;  %v1568_v38 = vpop.f32.mrb[59].mxu0 }
 0x176   : > { %v1550_v6 = vadd.f32 %v3542_v9, %v1549_v52  ;;  %v3545_v0 = vadd.f32 %v3544_v37, %v3543_v35 }
 0x178   : > { %v4741_v19 = vadd.f32 %v2290_v1, %v1550_v6  ;;  %v1553_v51 = vadd.f32 %v3545_v0, %v1552_v39 }
 0x17a   : > { %v4744_v22 = vadd.f32 %v4610_v54, %v1553_v51  ;;  %v3546_v11 = vpop.f32.mrb[60].mxu1  ;;  %v4746_v48 = vpop.f32.mrb[60].mxu0 }
 0x17b   : > { %v3547_v33 = vpop.f32.mrb[61].mxu1  ;;  %v1581_v5 = vpop.f32.mrb[61].mxu0 }
 0x17c   : > { %v3548_v53 = vadd.f32 %v3547_v33, %v3546_v11  ;;  %v3549_v58 = vpop.f32.mrb[62].mxu1  ;;  %v4748_v63 = vpop.f32.mrb[62].mxu0 }
 0x17d   : > { %v3550_v37 = vpop.f32.mrb[63].mxu1  ;;  %v1584_v52 = vpop.f32.mrb[63].mxu0 }
 0x17e   : > { %v1558_v34 = vadd.f32 %v3854_v13, %v3548_v53  ;;  %v3551_v9 = vadd.f32 %v3550_v37, %v3549_v58 }
 0x180   : > { %v4753_v39 = vadd.f32 %v2291_v49, %v1558_v34  ;;  %v1561_v54 = vadd.f32 %v3855_v12, %v3551_v9 }
 0x182   : > { %v4756_v35 = vadd.f32 %v4605_v43, %v1561_v54  ;;  %v3552_v6 = vpop.f32.mrb[64].mxu1  ;;  %v4758_v0 = vpop.f32.mrb[64].mxu0  ;;  %v2292_v43 = vsel %vm2207_vm0, 0.0, %v2220_v7 }
 0x183   : > { %v3553_v1 = vpop.f32.mrb[65].mxu1  ;;  %v4760_v51 = vpop.f32.mrb[65].mxu0 }
 0x184   : > { %v3554_v11 = vadd.f32 %v3553_v1, %v3552_v6  ;;  %v3555_v33 = vpop.f32.mrb[66].mxu1  ;;  %v4762_v13 = vpop.f32.mrb[66].mxu0 }
 0x185   : > { %v3556_v53 = vpop.f32.mrb[67].mxu1  ;;  %v4764_v28 = vpop.f32.mrb[67].mxu0 }
 0x186   : > { %v1566_v47 = vadd.f32 %v3554_v11, %v1565_v3  ;;  %v3557_v58 = vadd.f32 %v3556_v53, %v3555_v33 }
 0x188   : > { %v4769_v12 = vadd.f32 %v2292_v43, %v1566_v47  ;;  %v1569_v37 = vadd.f32 %v3557_v58, %v1568_v38 }
 0x18a   : > { %v4772_v34 = vadd.f32 %v4630_v10, %v1569_v37  ;;  %v3558_v9 = vpop.f32.mrb[68].mxu1  ;;  %v4774_v49 = vpop.f32.mrb[68].mxu0  ;;  %v2293_v10 = vsel %vm2207_vm0, 0.0, %v2223_v4 }
 0x18b   : > { %v3559_v54 = vpop.f32.mrb[69].mxu1  ;;  %v4776_v6 = vpop.f32.mrb[69].mxu0 }
 0x18c   : > { %v3560_v1 = vadd.f32 %v3559_v54, %v3558_v9  ;;  %v3561_v30 = vpop.f32.mrb[70].mxu1  ;;  %v4778_v3 = vpop.f32.mrb[70].mxu0 }
 0x18d   : > { %v3562_v11 = vpop.f32.mrb[71].mxu1  ;;  %v4780_v60 = vpop.f32.mrb[71].mxu0 }
 0x18e   : > { %v1574_v7 = vadd.f32 %v3858_v61, %v3560_v1  ;;  %v3563_v33 = vadd.f32 %v3562_v11, %v3561_v30 }
 0x190   : > { %v4785_v38 = vadd.f32 %v2293_v10, %v1574_v7  ;;  %v1577_v53 = vadd.f32 %v3859_v36, %v3563_v33 }
 0x192   : > { %v4788_v47 = vadd.f32 %v4625_v14, %v1577_v53  ;;  %v3564_v58 = vpop.f32.mrb[72].mxu1  ;;  %v4790_v43 = vpop.f32.mrb[72].mxu0  ;;  %v2294_v14 = vsel %vm2207_vm0, 0.0, %v2226_v32 }
 0x193   : > { %v3565_v37 = vpop.f32.mrb[73].mxu1  ;;  %v4792_v9 = vpop.f32.mrb[73].mxu0 }
 0x194   : > { %v3566_v54 = vadd.f32 %v3565_v37, %v3564_v58  ;;  %v3567_v2 = vpop.f32.mrb[74].mxu1  ;;  %v4794_v61 = vpop.f32.mrb[74].mxu0 }
 0x195   : > { %v3568_v30 = vpop.f32.mrb[75].mxu1  ;;  %v4796_v40 = vpop.f32.mrb[75].mxu0 }
 0x196   : > { %v1582_v4 = vadd.f32 %v3566_v54, %v1581_v5  ;;  %v3569_v1 = vadd.f32 %v3568_v30, %v3567_v2 }
 0x198   : > { %v4801_v36 = vadd.f32 %v2294_v14, %v1582_v4  ;;  %v1585_v11 = vadd.f32 %v3569_v1, %v1584_v52  ;;  %v5159_v52 = vrot.slane %v4634_v31, 7 }
 0x19a   : > { %5157 = vst [vmem:[#allocation2_spill] sm:$0xff] %v4801_v36  ;;  %v4804_v7 = vadd.f32 %v4645_v50, %v1585_v11  ;;  %v3570_v33 = vpop.f32.mrb[76].mxu1  ;;  %v4806_v10 = vpop.f32.mrb[76].mxu0  ;;  %v2295_v50 = vsel %vm2207_vm0, 0.0, %v5159_v52 }
 0x19b   : > { %v3571_v53 = vpop.f32.mrb[77].mxu1  ;;  %v4808_v58 = vpop.f32.mrb[77].mxu0 }
 0x19c   : > { %5158 = vst [vmem:[#allocation3_spill] sm:$0xff] %v4804_v7  ;;  %v3572_v37 = vadd.f32 %v3571_v53, %v3570_v33  ;;  %v3573_v41 = vpop.f32.mrb[78].mxu1  ;;  %v4810_v5 = vpop.f32.mrb[78].mxu0 }
 0x19d   : > { %v3574_v2 = vpop.f32.mrb[79].mxu1  ;;  %v4812_v8 = vpop.f32.mrb[79].mxu0 }
 0x19e   : > { %v1590_v32 = vadd.f32 %v4746_v48, %v3572_v37  ;;  %v3575_v54 = vadd.f32 %v3574_v2, %v3573_v41 }
 0x1a0   : > { %v4818_v30 = vadd.f32 %v2295_v50, %v1590_v32  ;;  %v1593_v4 = vadd.f32 %v4748_v63, %v3575_v54  ;;  %v5160_v63 = vrot.slane %v4652_v62, 7 }
 0x1a2   : > { %v4822_v1 = vadd.f32 %v4650_v29, %v1593_v4  ;;  %v3576_v14 = vpop.f32.mrb[80].mxu1  ;;  %v3664_v11 = vpop.f32.mrb[80].mxu0  ;;  %v2296_v29 = vsel %vm2207_vm0, 0.0, %v5160_v63 }
 0x1a3   : > { %v3577_v33 = vpop.f32.mrb[81].mxu1  ;;  %v3665_v53 = vpop.f32.mrb[81].mxu0 }
 0x1a4   : > { %v3578_v7 = vadd.f32 %v3577_v33, %v3576_v14  ;;  %v4824_v36 = vadd.f32 %v3665_v53, %v3664_v11  ;;  %v3579_v48 = vpop.f32.mrb[82].mxu1  ;;  %v3667_v41 = vpop.f32.mrb[82].mxu0 }
 0x1a5   : > { %v3580_v37 = vpop.f32.mrb[83].mxu1  ;;  %v3668_v31 = vpop.f32.mrb[83].mxu0 }
 0x1a6   : > { %v1598_v2 = vadd.f32 %v3578_v7, %v4760_v51  ;;  %v3581_v32 = vadd.f32 %v3580_v37, %v3579_v48  ;;  %v4827_v52 = vadd.f32 %v3668_v31, %v3667_v41 }
 0x1a8   : > { %v4832_v54 = vadd.f32 %v2296_v29, %v1598_v2  ;;  %v1601_v50 = vadd.f32 %v3581_v32, %v4764_v28 }
 0x1aa   : > { %v4836_v4 = vadd.f32 %v4660_v17, %v1601_v50  ;;  %v3582_v14 = vpop.f32.mrb[84].mxu1  ;;  %v3670_v11 = vpop.f32.mrb[84].mxu0  ;;  %v5162_v17 = vrot.slane %v4662_v26, 7 }
 0x1ab   : > { %v3583_v33 = vpop.f32.mrb[85].mxu1  ;;  %v3671_v53 = vpop.f32.mrb[85].mxu0 }
 0x1ac   : > { %5161 = vst [vmem:[#allocation4_spill] sm:$0xff] %v4836_v4  ;;  %v3584_v51 = vadd.f32 %v3583_v33, %v3582_v14  ;;  %v4838_v7 = vadd.f32 %v3671_v53, %v3670_v11  ;;  %v3585_v48 = vpop.f32.mrb[86].mxu1  ;;  %v3673_v62 = vpop.f32.mrb[86].mxu0  ;;  %v2297_v32 = vsel %vm2207_vm0, 0.0, %v5162_v17 }
 0x1ad   : > { %v3586_v41 = vpop.f32.mrb[87].mxu1  ;;  %v3674_v37 = vpop.f32.mrb[87].mxu0 }
 0x1ae   : > { %v1606_v31 = vadd.f32 %v4758_v0, %v3584_v51  ;;  %v3587_v2 = vadd.f32 %v3586_v41, %v3585_v48  ;;  %v4841_v28 = vadd.f32 %v3674_v37, %v3673_v62  ;;  %v4067_v51 = vmov 0.0  }
 0x1af   : > { %2700 = vst [vmem:[%s4856_s15] sm:$0x1] %v4067_v51  ;;  %2701 = vst [vmem:[%s4862_s18] sm:$0x1] %v4067_v51 }
 0x1b0   : > { %v4846_v63 = vadd.f32 %v2297_v32, %v1606_v31  ;;  %v1609_v29 = vadd.f32 %v4762_v13, %v3587_v2  ;;  %v5163_v2 = vrot.slane %v4677_v59, 7 }
 0x1b2   : > { %v4850_v50 = vadd.f32 %v4674_v42, %v1609_v29  ;;  %v3588_v14 = vpop.f32.mrb[88].mxu1  ;;  %v3676_v11 = vpop.f32.mrb[88].mxu0  ;;  %v2298_v17 = vsel %vm2207_vm0, 0.0, %v5163_v2 }
 0x1b3   : > { %v3589_v26 = vpop.f32.mrb[89].mxu1  ;;  %v3677_v0 = vpop.f32.mrb[89].mxu0 }
 0x1b4   : > { %v3590_v13 = vadd.f32 %v3589_v26, %v3588_v14  ;;  %v4864_v33 = vadd.f32 %v3677_v0, %v3676_v11  ;;  %v3591_v42 = vpop.f32.mrb[90].mxu1  ;;  %v3679_v53 = vpop.f32.mrb[90].mxu0 }
 0x1b5   : > { %v3592_v48 = vpop.f32.mrb[91].mxu1  ;;  %v3680_v62 = vpop.f32.mrb[91].mxu0 }
 0x1b6   : > { %v1614_v41 = vadd.f32 %v3590_v13, %v4776_v6  ;;  %v3593_v37 = vadd.f32 %v3592_v48, %v3591_v42  ;;  %v4869_v31 = vadd.f32 %v3680_v62, %v3679_v53 }
 0x1b8   : > { %v4874_v32 = vadd.f32 %v2298_v17, %v1614_v41  ;;  %v1617_v29 = vadd.f32 %v3593_v37, %v4780_v60  ;;  %v5164_v60 = vrot.slane %v4701_v25, 7 }
 0x1ba   : > { %v4878_v14 = vadd.f32 %v4698_v56, %v1617_v29  ;;  %v3594_v11 = vpop.f32.mrb[92].mxu1  ;;  %v3682_v26 = vpop.f32.mrb[92].mxu0  ;;  %v2299_v56 = vsel %vm2207_vm0, 0.0, %v5164_v60 }
 0x1bb   : > { %v3595_v0 = vpop.f32.mrb[93].mxu1  ;;  %v3683_v51 = vpop.f32.mrb[93].mxu0 }
 0x1bc   : > { %v3596_v4 = vadd.f32 %v3595_v0, %v3594_v11  ;;  %v4880_v6 = vadd.f32 %v3683_v51, %v3682_v26  ;;  %v3597_v13 = vpop.f32.mrb[94].mxu1  ;;  %v3685_v42 = vpop.f32.mrb[94].mxu0 }
 0x1bd   : > { %v3598_v53 = vpop.f32.mrb[95].mxu1  ;;  %v3686_v59 = vpop.f32.mrb[95].mxu0 }
 0x1be   : > { %v1622_v48 = vadd.f32 %v4774_v49, %v3596_v4  ;;  %v3599_v62 = vadd.f32 %v3598_v53, %v3597_v13  ;;  %v4883_v41 = vadd.f32 %v3686_v59, %v3685_v42 }
 0x1c0   : > { %v4888_v37 = vadd.f32 %v2299_v56, %v1622_v48  ;;  %v1625_v2 = vadd.f32 %v4778_v3, %v3599_v62  ;;  %v5165_v3 = vrot.slane %v4669_v55, 7 }
 0x1c2   : > { %v4892_v17 = vadd.f32 %v4720_v20, %v1625_v2  ;;  %v3600_v29 = vpop.f32.mrb[96].mxu1  ;;  %v3688_v11 = vpop.f32.mrb[96].mxu0  ;;  %v2300_v20 = vsel %vm2207_vm0, 0.0, %v5165_v3 }
 0x1c3   : > { %v3601_v26 = vpop.f32.mrb[97].mxu1  ;;  %v3689_v0 = vpop.f32.mrb[97].mxu0 }
 0x1c4   : > { %v3602_v51 = vadd.f32 %v3601_v26, %v3600_v29  ;;  %v4894_v49 = vadd.f32 %v3689_v0, %v3688_v11  ;;  %v3603_v4 = vpop.f32.mrb[98].mxu1  ;;  %v3691_v13 = vpop.f32.mrb[98].mxu0 }
 0x1c5   : > { %v3604_v42 = vpop.f32.mrb[99].mxu1  ;;  %v3692_v25 = vpop.f32.mrb[99].mxu0 }
 0x1c6   : > { %v1630_v53 = vadd.f32 %v3602_v51, %v4792_v9  ;;  %v3605_v59 = vadd.f32 %v3604_v42, %v3603_v4  ;;  %v4897_v48 = vadd.f32 %v3692_v25, %v3691_v13 }
 0x1c8   : > { %v4902_v62 = vadd.f32 %v2300_v20, %v1630_v53  ;;  %v1633_v60 = vadd.f32 %v3605_v59, %v4796_v40  ;;  %v5166_v40 = vrot.slane %v4666_v46, 7 }
 0x1ca   : > { %v4906_v56 = vadd.f32 %v4691_v18, %v1633_v60  ;;  %v3606_v2 = vpop.f32.mrb[100].mxu1  ;;  %v3694_v29 = vpop.f32.mrb[100].mxu0  ;;  %v2301_v18 = vsel %vm2207_vm0, 0.0, %v5166_v40 }
 0x1cb   : > { %v3607_v11 = vpop.f32.mrb[101].mxu1  ;;  %v3695_v26 = vpop.f32.mrb[101].mxu0 }
 0x1cc   : > { %v3608_v0 = vadd.f32 %v3607_v11, %v3606_v2  ;;  %v4908_v9 = vadd.f32 %v3695_v26, %v3694_v29  ;;  %v3609_v51 = vpop.f32.mrb[102].mxu1  ;;  %v3697_v4 = vpop.f32.mrb[102].mxu0 }
 0x1cd   : > { %v3610_v13 = vpop.f32.mrb[103].mxu1  ;;  %v3698_v55 = vpop.f32.mrb[103].mxu0 }
 0x1ce   : > { %v1638_v42 = vadd.f32 %v4790_v43, %v3608_v0  ;;  %v3611_v25 = vadd.f32 %v3610_v13, %v3609_v51  ;;  %v4911_v53 = vadd.f32 %v3698_v55, %v3697_v4 }
 0x1d0   : > { %v4916_v59 = vadd.f32 %v2301_v18, %v1638_v42  ;;  %v1641_v3 = vadd.f32 %v4794_v61, %v3611_v25 }
 0x1d2   : > { %v4920_v20 = vadd.f32 %v4685_v23, %v1641_v3  ;;  %v3612_v60 = vpop.f32.mrb[104].mxu1  ;;  %v3700_v2 = vpop.f32.mrb[104].mxu0 }
 0x1d3   : > { %v3613_v29 = vpop.f32.mrb[105].mxu1  ;;  %v3701_v11 = vpop.f32.mrb[105].mxu0 }
 0x1d4   : > { %v3614_v26 = vadd.f32 %v3613_v29, %v3612_v60  ;;  %v4922_v43 = vadd.f32 %v3701_v11, %v3700_v2  ;;  %v3615_v0 = vpop.f32.mrb[106].mxu1  ;;  %v3703_v51 = vpop.f32.mrb[106].mxu0 }
 0x1d5   : > { %v3616_v4 = vpop.f32.mrb[107].mxu1  ;;  %v3704_v46 = vpop.f32.mrb[107].mxu0 }
 0x1d6   : > { %v1646_v13 = vadd.f32 %v3614_v26, %v4808_v58  ;;  %v3617_v55 = vadd.f32 %v3616_v4, %v3615_v0  ;;  %v4925_v42 = vadd.f32 %v3704_v46, %v3703_v51 }
 0x1d8   : > { %v4928_v61 = vadd.f32 %v4708_v15, %v1646_v13  ;;  %v1649_v23 = vadd.f32 %v3617_v55, %v4812_v8 }
 0x1da   : > { %v4932_v25 = vadd.f32 %v4715_v44, %v1649_v23  ;;  %v3618_v40 = vpop.f32.mrb[108].mxu1  ;;  %v3706_v18 = vpop.f32.mrb[108].mxu0 }
 0x1db   : > { %v3619_v3 = vpop.f32.mrb[109].mxu1  ;;  %v3707_v60 = vpop.f32.mrb[109].mxu0 }
 0x1dc   : > { %5167 = vst [vmem:[#allocation5_spill] sm:$0xff] %v4932_v25  ;;  %v3620_v2 = vadd.f32 %v3619_v3, %v3618_v40  ;;  %v4934_v29 = vadd.f32 %v3707_v60, %v3706_v18  ;;  %v3621_v11 = vpop.f32.mrb[110].mxu1  ;;  %v3709_v58 = vpop.f32.mrb[110].mxu0 }
 0x1dd   : > { %v3622_v26 = vpop.f32.mrb[111].mxu1  ;;  %v3710_v0 = vpop.f32.mrb[111].mxu0 }
 0x1de   : > { %v1654_v51 = vadd.f32 %v4806_v10, %v3620_v2  ;;  %v3623_v15 = vadd.f32 %v3622_v26, %v3621_v11  ;;  %v4937_v4 = vadd.f32 %v3710_v0, %v3709_v58 }
 0x1e0   : > { %v4940_v8 = vadd.f32 %v4705_v45, %v1654_v51  ;;  %v1657_v44 = vadd.f32 %v4810_v5, %v3623_v15 }
 0x1e2   : > { %v4944_v46 = vadd.f32 %v4711_v27, %v1657_v44  ;;  %v3712_v13 = vpop.f32.mrb[112].mxu0  ;;  %v3898_v55 = vpop.f32.mrb[112].mxu1  ;;  %v4959_v44 = vld [vmem:[%s5144_s4] ss:$0 sm:$0xff] }
 0x1e3   : > { %v2057_v23 = vadd.f32 %v3898_v55, %v4838_v7  ;;  %v3713_v40 = vpop.f32.mrb[113].mxu0  ;;  %v2048_v18 = vpop.f32.mrb[113].mxu1 }
 0x1e4   : > { %v4947_v3 = vadd.f32 %v3713_v40, %v3712_v13  ;;  %v2049_v10 = vadd.f32 %v4824_v36, %v2048_v18  ;;  %v3715_v60 = vpop.f32.mrb[114].mxu0  ;;  %v3899_v2 = vpop.f32.mrb[114].mxu1 }
 0x1e5   : > { %v2060_v45 = vadd.f32 %v3899_v2, %v4841_v28  ;;  %v3716_v11 = vpop.f32.mrb[115].mxu0  ;;  %v2051_v5 = vpop.f32.mrb[115].mxu1  ;;  %v2372_v26 = vrot.slane %v2057_v23, 1 }
 0x1e6   : > { %v4951_v27 = vadd.f32 %v3716_v11, %v3715_v60  ;;  %v2052_v58 = vadd.f32 %v4827_v52, %v2051_v5  ;;  %v2369_v0 = vrot.slane %v2049_v10, 1 }
 0x1e7   : > { %v2373_v7 = vrot.slane %v2060_v45, 1 }
 0x1e8   : > { %v2370_v51 = vrot.slane %v2052_v58, 1 }
 0x1e9   : > { %v2374_v15 = vsel %vm2368_vm1, %v2372_v26, %v2373_v7  ;;  %v2450_v36 = vsel %vm2368_vm1, %v2373_v7, 0.0 }
 0x1ea   : > { %v2467_v28 = vadd.f32 %v2374_v15, %v4733_v21  ;;  %v2468_v13 = vadd.f32 %v2450_v36, %v4736_v24  ;;  %v2371_v52 = vsel %vm2368_vm1, %v2369_v0, %v2370_v51  ;;  %v2449_v55 = vsel %vm2368_vm1, %v2370_v51, 0.0  ;;  %v3718_v23 = vpop.f32.mrb[116].mxu0  ;;  %v3902_v40 = vpop.f32.mrb[116].mxu1 }
 0x1eb   : > { %v2465_v18 = vadd.f32 %v2371_v52, %v4725_v57  ;;  %v2466_v10 = vadd.f32 %v2449_v55, %v4728_v16  ;;  %v2073_v60 = vadd.f32 %v3902_v40, %v4880_v6  ;;  %v3719_v2 = vpop.f32.mrb[117].mxu0  ;;  %v2064_v45 = vpop.f32.mrb[117].mxu1 }
 0x1ec   : > { %v2506_v11 = vadd.f32 %v4959_v44, %v2467_v28  ;;  %v2507_v21 = vadd.f32 %v4959_v44, %v2468_v13  ;;  %v4971_v5 = vadd.f32 %v3719_v2, %v3718_v23  ;;  %v2065_v24 = vadd.f32 %v4864_v33, %v2064_v45  ;;  %v3721_v58 = vpop.f32.mrb[118].mxu0  ;;  %v3903_v26 = vpop.f32.mrb[118].mxu1 }
 0x1ed   : > { %v2504_v57 = vadd.f32 %v4959_v44, %v2465_v18  ;;  %v2505_v16 = vadd.f32 %v4959_v44, %v2466_v10  ;;  %v2076_v6 = vadd.f32 %v3903_v26, %v4883_v41  ;;  %v3722_v7 = vpop.f32.mrb[119].mxu0  ;;  %v2067_v0 = vpop.f32.mrb[119].mxu1  ;;  %v2378_v13 = vrot.slane %v2073_v60, 1 }
 0x1ee   : > { %v3289_v51 = vpack.c.bf16 %v2507_v21, %v2506_v11  ;;  %v4983_v55 = vadd.f32 %v3722_v7, %v3721_v58  ;;  %v2068_v23 = vadd.f32 %v4869_v31, %v2067_v0  ;;  %v2745_v40 = vmul.f32 %v2506_v11, %v2506_v11 }
 0x1ef   : > { %v3284_v15 = vpack.c.bf16 %v2505_v16, %v2504_v57  ;;  %v2703_v33 = vadd.f32 %v2505_v16, %v2504_v57  ;;  %v2743_v36 = vmul.f32 %v2504_v57, %v2504_v57  ;;  %v2744_v28 = vmul.f32 %v2505_v16, %v2505_v16 }
 0x1f0   : > { %3361 = vst [vmem:[%s4977_s23 + $0x8] sm:$0xff] %v3289_v51   ;;  %v2379_v52 = vrot.slane %v2076_v6, 1  ;;  %v2746_v18 = vmul.f32 %v2507_v21, %v2507_v21  ;;  %v2375_v41 = vrot.slane %v2065_v24, 1  ;;  %v2376_v25 = vrot.slane %v2068_v23, 1 }
 0x1f1   : > { %3285 = vst [vmem:[%s4977_s23] sm:$0xff] %v3284_v15   ;;  %v2704_v10 = vadd.f32 %v2703_v33, %v2506_v11  ;;  %v2775_v2 = vadd.f32 %v2744_v28, %v2743_v36 }
 0x1f2   : > { %v2380_v45 = vsel %vm2368_vm1, %v2378_v13, %v2379_v52  ;;  %v2452_v26 = vsel %vm2368_vm1, %v2379_v52, 0.0  ;;  %v3724_v57 = vpop.f32.mrb[120].mxu0  ;;  %v3906_v16 = vpop.f32.mrb[120].mxu1  ;;  %v2377_v0 = vsel %vm2368_vm1, %v2375_v41, %v2376_v25  ;;  %v2451_v11 = vsel %vm2368_vm1, %v2376_v25, 0.0 }
 0x1f3   : > { %v2776_v51 = vadd.f32 %v2775_v2, %v2745_v40  ;;  %v2471_v60 = vadd.f32 %v2380_v45, %v4753_v39  ;;  %v2472_v58 = vadd.f32 %v2452_v26, %v4756_v35  ;;  %v2705_v6 = vadd.f32 %v2704_v10, %v2507_v21  ;;  %v3725_v31 = vpop.f32.mrb[121].mxu0  ;;  %v2080_v7 = vpop.f32.mrb[121].mxu1 }
 0x1f4   : > { %v2089_v24 = vadd.f32 %v3906_v16, %v4908_v9  ;;  %v4994_v15 = vadd.f32 %v3725_v31, %v3724_v57  ;;  %v3727_v33 = vpop.f32.mrb[122].mxu0  ;;  %v3907_v36 = vpop.f32.mrb[122].mxu1  ;;  %v2469_v35 = vadd.f32 %v2377_v0, %v4741_v19  ;;  %v2470_v21 = vadd.f32 %v2451_v11, %v4744_v22 }
 0x1f5   : > { %v2510_v28 = vadd.f32 %v4959_v44, %v2471_v60  ;;  %v2511_v39 = vadd.f32 %v4959_v44, %v2472_v58  ;;  %v3728_v13 = vpop.f32.mrb[123].mxu0  ;;  %v2083_v52 = vpop.f32.mrb[123].mxu1  ;;  %v2777_v23 = vadd.f32 %v2776_v51, %v2746_v18  ;;  %v2081_v25 = vadd.f32 %v4894_v49, %v2080_v7 }
 0x1f6   : > { %v2092_v9 = vadd.f32 %v3907_v36, %v4911_v53  ;;  %v2508_v10 = vadd.f32 %v4959_v44, %v2469_v35  ;;  %v2384_v2 = vrot.slane %v2089_v24, 1  ;;  %v2509_v45 = vadd.f32 %v4959_v44, %v2470_v21 }
 0x1f7   : > { %v3299_v40 = vpack.c.bf16 %v2511_v39, %v2510_v28  ;;  %v2749_v41 = vmul.f32 %v2510_v28, %v2510_v28  ;;  %v5004_v57 = vadd.f32 %v3728_v13, %v3727_v33  ;;  %v2381_v16 = vrot.slane %v2081_v25, 1 }
 0x1f8   : > { %v2385_v26 = vrot.slane %v2092_v9, 1  ;;  %v2706_v19 = vadd.f32 %v2705_v6, %v2508_v10  ;;  %v2747_v22 = vmul.f32 %v2508_v10, %v2508_v10  ;;  %v2084_v18 = vadd.f32 %v4897_v48, %v2083_v52 }
 0x1f9   : > { %3363 = vst [vmem:[%s4977_s23 + $0x18] sm:$0xff] %v3299_v40   ;;  %v3294_v49 = vpack.c.bf16 %v2509_v45, %v2508_v10  ;;  %v2748_v51 = vmul.f32 %v2509_v45, %v2509_v45 }
 0x1fa   : > { %v2386_v53 = vsel %vm2368_vm1, %v2384_v2, %v2385_v26  ;;  %v2454_v60 = vsel %vm2368_vm1, %v2385_v26, 0.0  ;;  %v3730_v58 = vpop.f32.mrb[124].mxu0  ;;  %v3910_v31 = vpop.f32.mrb[124].mxu1  ;;  %v2707_v7 = vadd.f32 %v2706_v19, %v2509_v45  ;;  %v2778_v0 = vadd.f32 %v2777_v23, %v2747_v22 }
 0x1fb   : > { %v2475_v11 = vadd.f32 %v2386_v53, %v4785_v38  ;;  %v2476_v24 = vadd.f32 %v2454_v60, %v4788_v47  ;;  %v3731_v6 = vpop.f32.mrb[125].mxu0  ;;  %v2096_v33 = vpop.f32.mrb[125].mxu1  ;;  %3362 = vst [vmem:[%s4977_s23 + $0x10] sm:$0xff] %v3294_v49   ;;  %v2382_v36 = vrot.slane %v2084_v18, 1  ;;  %v2105_v48 = vadd.f32 %v3910_v31, %v4934_v29 }
 0x1fc   : > { %v5014_v35 = vadd.f32 %v3731_v6, %v3730_v58  ;;  %v2097_v21 = vadd.f32 %v4922_v43, %v2096_v33  ;;  %v3733_v13 = vpop.f32.mrb[126].mxu0  ;;  %v3911_v52 = vpop.f32.mrb[126].mxu1  ;;  %v2708_v25 = vadd.f32 %v2707_v7, %v2510_v28  ;;  %v2779_v9 = vadd.f32 %v2778_v0, %v2748_v51 }
 0x1fd   : > { %v2514_v23 = vadd.f32 %v4959_v44, %v2475_v11  ;;  %v5019_v38 = vadd.f32 %v4959_v44, %v2476_v24  ;;  %v3734_v47 = vpop.f32.mrb[127].mxu0  ;;  %v2099_v40 = vpop.f32.mrb[127].mxu1  ;;  %v2383_v10 = vsel %vm2368_vm1, %v2381_v16, %v2382_v36  ;;  %v2453_v29 = vsel %vm2368_vm1, %v2382_v36, 0.0 }
 0x1fe   : > { %v2750_v2 = vmul.f32 %v2511_v39, %v2511_v39  ;;  %v2780_v45 = vadd.f32 %v2779_v9, %v2749_v41  ;;  %v2473_v26 = vadd.f32 %v2383_v10, %v4769_v12  ;;  %v2474_v28 = vadd.f32 %v2453_v29, %v4772_v34 }
 0x1ff   : > { %v3309_v43 = vpack.c.bf16 %v5019_v38, %v2514_v23  ;;  %v2709_v19 = vadd.f32 %v2708_v25, %v2511_v39  ;;  %v2108_v22 = vadd.f32 %v3911_v52, %v4937_v4  ;;  %v5028_v49 = vadd.f32 %v3734_v47, %v3733_v13 }
 0x200   : > { %v2781_v18 = vadd.f32 %v2780_v45, %v2750_v2  ;;  %v2100_v51 = vadd.f32 %v4925_v42, %v2099_v40  ;;  %v2512_v16 = vadd.f32 %v4959_v44, %v2473_v26  ;;  %v2513_v53 = vadd.f32 %v4959_v44, %v2474_v28  ;;  %v5168_v2 = vld [vmem:[#allocation2_spill] sm:$0xff] }
 0x201   : > { %3365 = vst [vmem:[%s4977_s23 + $0x28] sm:$0xff] %v3309_v43   ;;  %v2390_v41 = vrot.slane %v2105_v48, 1  ;;  %v2391_v60 = vrot.slane %v2108_v22, 1  ;;  %v2753_v12 = vmul.f32 %v2514_v23, %v2514_v23  ;;  %v2387_v7 = vrot.slane %v2097_v21, 1  ;;  %v5169_v43 = vld [vmem:[#allocation3_spill] sm:$0xff] }
 0x202   : > { %v3736_v58 = vpop.f32.mrb[128].mxu0  ;;  %v3914_v31 = vpop.f32.mrb[128].mxu1  ;;  %v2388_v34 = vrot.slane %v2100_v51, 1  ;;  %v3304_v11 = vpack.c.bf16 %v2513_v53, %v2512_v16  ;;  %v2710_v24 = vadd.f32 %v2709_v19, %v2512_v16  ;;  %v2751_v6 = vmul.f32 %v2512_v16, %v2512_v16 }
 0x203   : > { %v2121_v4 = vadd.f32 %v3914_v31, %v4971_v5  ;;  %v3737_v39 = vpop.f32.mrb[129].mxu0  ;;  %v2112_v0 = vpop.f32.mrb[129].mxu1  ;;  %v2752_v42 = vmul.f32 %v2513_v53, %v2513_v53  ;;  %v2392_v13 = vsel %vm2368_vm1, %v2390_v41, %v2391_v60  ;;  %v2456_v48 = vsel %vm2368_vm1, %v2391_v60, 0.0 }
 0x204   : > { %v3739_v33 = vpop.f32.mrb[130].mxu0  ;;  %v3915_v36 = vpop.f32.mrb[130].mxu1  ;;  %v2389_v52 = vsel %vm2368_vm1, %v2387_v7, %v2388_v34  ;;  %v2455_v21 = vsel %vm2368_vm1, %v2388_v34, 0.0  ;;  %3364 = vst [vmem:[%s4977_s23 + $0x20] sm:$0xff] %v3304_v11   ;;  %v2711_v5 = vadd.f32 %v2710_v24, %v2513_v53  ;;  %v2782_v47 = vadd.f32 %v2781_v18, %v2751_v6 }
 0x205   : > { %v3740_v25 = vpop.f32.mrb[131].mxu0  ;;  %v2115_v9 = vpop.f32.mrb[131].mxu1  ;;  %v2479_v40 = vadd.f32 %v2392_v13, %v4818_v30  ;;  %v2480_v10 = vadd.f32 %v2456_v48, %v4822_v1  ;;  %v2754_v29 = vmul.f32 %v5019_v38, %v5019_v38  ;;  %v2477_v45 = vadd.f32 %v2389_v52, %v5168_v2 }
 0x206   : > { %v2478_v26 = vadd.f32 %v2455_v21, %v5169_v43  ;;  %v5045_v28 = vadd.f32 %v3737_v39, %v3736_v58  ;;  %v2712_v19 = vadd.f32 %v2711_v5, %v2514_v23  ;;  %v2783_v22 = vadd.f32 %v2782_v47, %v2752_v42 }
 0x207   : > { %v2518_v51 = vadd.f32 %v4959_v44, %v2479_v40  ;;  %v2519_v16 = vadd.f32 %v4959_v44, %v2480_v10  ;;  %v2516_v18 = vadd.f32 %v4959_v44, %v2477_v45  ;;  %v2113_v1 = vadd.f32 %v4947_v3, %v2112_v0 }
 0x208   : > { %v2517_v30 = vadd.f32 %v4959_v44, %v2478_v26  ;;  %v2124_v53 = vadd.f32 %v3915_v36, %v4983_v55  ;;  %v2784_v41 = vadd.f32 %v2783_v22, %v2753_v12  ;;  %v2396_v58 = vrot.slane %v2121_v4, 1 }
 0x209   : > { %v3319_v60 = vpack.c.bf16 %v2519_v16, %v2518_v51  ;;  %v2757_v31 = vmul.f32 %v2518_v51, %v2518_v51  ;;  %v2713_v39 = vadd.f32 %v2712_v19, %v5019_v38  ;;  %v2755_v11 = vmul.f32 %v2516_v18, %v2516_v18 }
 0x20a   : > { %v3742_v23 = vpop.f32.mrb[132].mxu0  ;;  %v3918_v7 = vpop.f32.mrb[132].mxu1  ;;  %v3314_v34 = vpack.c.bf16 %v2517_v30, %v2516_v18  ;;  %v2756_v24 = vmul.f32 %v2517_v30, %v2517_v30  ;;  %v2785_v13 = vadd.f32 %v2784_v41, %v2754_v29  ;;  %v2393_v48 = vrot.slane %v2113_v1, 1 }
 0x20b   : > { %v3743_v6 = vpop.f32.mrb[133].mxu0  ;;  %v2128_v42 = vpop.f32.mrb[133].mxu1  ;;  %3367 = vst [vmem:[%s4977_s23 + $0x38] sm:$0xff] %v3319_v60   ;;  %v2397_v3 = vrot.slane %v2124_v53, 1  ;;  %v5055_v0 = vadd.f32 %v3740_v25, %v3739_v33  ;;  %v2714_v4 = vadd.f32 %v2713_v39, %v2516_v18  ;;  %v2116_v36 = vadd.f32 %v4951_v27, %v2115_v9  ;;  %v5170_v60 = vld [vmem:[#allocation4_spill] sm:$0xff] }
 0x20c   : > { %v3745_v55 = vpop.f32.mrb[134].mxu0  ;;  %v3919_v12 = vpop.f32.mrb[134].mxu1  ;;  %3366 = vst [vmem:[%s4977_s23 + $0x30] sm:$0xff] %v3314_v34   ;;  %v2137_v52 = vadd.f32 %v3918_v7, %v5014_v35  ;;  %v3744_v21 = vadd.f32 %v3743_v6, %v3742_v23  ;;  %v2786_v47 = vadd.f32 %v2785_v13, %v2755_v11  ;;  %v2129_v29 = vadd.f32 %v4994_v15, %v2128_v42 }
 0x20d   : > { %v3746_v38 = vpop.f32.mrb[135].mxu0  ;;  %v2131_v5 = vpop.f32.mrb[135].mxu1  ;;  %v2398_v40 = vsel %vm2368_vm1, %v2396_v58, %v2397_v3  ;;  %v2458_v10 = vsel %vm2368_vm1, %v2397_v3, 0.0  ;;  %v2715_v33 = vadd.f32 %v2714_v4, %v2517_v30  ;;  %v2394_v45 = vrot.slane %v2116_v36, 1 }
 0x20e   : > { %v2483_v25 = vadd.f32 %v2398_v40, %v4846_v63  ;;  %v2484_v2 = vadd.f32 %v2458_v10, %v4850_v50  ;;  %v2758_v43 = vmul.f32 %v2519_v16, %v2519_v16  ;;  %v2787_v27 = vadd.f32 %v2786_v47, %v2756_v24 }
 0x20f   : > { %v2402_v9 = vrot.slane %v2137_v52, 1  ;;  %v2140_v35 = vadd.f32 %v3919_v12, %v5028_v49  ;;  %v2716_v26 = vadd.f32 %v2715_v33, %v2518_v51  ;;  %v2395_v18 = vsel %vm2368_vm1, %v2393_v48, %v2394_v45 }
 0x210   : > { %v2522_v19 = vadd.f32 %v4959_v44, %v2483_v25  ;;  %v2523_v22 = vadd.f32 %v4959_v44, %v2484_v2  ;;  %v2788_v1 = vadd.f32 %v2787_v27, %v2757_v31  ;;  %v2457_v15 = vsel %vm2368_vm1, %v2394_v45, 0.0 }
 0x211   : > { %v2481_v63 = vadd.f32 %v2395_v18, %v4832_v54  ;;  %v2403_v50 = vrot.slane %v2140_v35, 1  ;;  %v2482_v58 = vadd.f32 %v2457_v15, %v5170_v60  ;;  %v2399_v49 = vrot.slane %v2129_v29, 1 }
 0x212   : > { %v3748_v30 = vpop.f32.mrb[136].mxu0  ;;  %v3922_v53 = vpop.f32.mrb[136].mxu1  ;;  %v3329_v41 = vpack.c.bf16 %v2523_v22, %v2522_v19  ;;  %v2717_v34 = vadd.f32 %v2716_v26, %v2519_v16  ;;  %v2789_v39 = vadd.f32 %v2788_v1, %v2758_v43  ;;  %v3747_v13 = vadd.f32 %v3746_v38, %v3745_v55 }
 0x213   : > { %v3749_v51 = vpop.f32.mrb[137].mxu0  ;;  %v2144_v23 = vpop.f32.mrb[137].mxu1  ;;  %v2520_v7 = vadd.f32 %v4959_v44, %v2481_v63  ;;  %v2404_v31 = vsel %vm2368_vm1, %v2402_v9, %v2403_v50  ;;  %v2521_v54 = vadd.f32 %v4959_v44, %v2482_v58  ;;  %v2460_v6 = vsel %vm2368_vm1, %v2403_v50, 0.0 }
 0x214   : > { %v3751_v11 = vpop.f32.mrb[138].mxu0  ;;  %v3923_v24 = vpop.f32.mrb[138].mxu1  ;;  %3369 = vst [vmem:[%s4977_s23 + $0x48] sm:$0xff] %v3329_v41   ;;  %v2487_v42 = vadd.f32 %v2404_v31, %v4888_v37  ;;  %v2488_v16 = vadd.f32 %v2460_v6, %v4892_v17  ;;  %v2132_v36 = vadd.f32 %v5004_v57, %v2131_v5  ;;  %v2153_v10 = vadd.f32 %v3922_v53, %v3744_v21 }
 0x215   : > { %v3752_v48 = vpop.f32.mrb[139].mxu0  ;;  %v2147_v3 = vpop.f32.mrb[139].mxu1  ;;  %v2718_v12 = vadd.f32 %v2717_v34, %v2520_v7  ;;  %v2759_v4 = vmul.f32 %v2520_v7, %v2520_v7  ;;  %v3324_v52 = vpack.c.bf16 %v2521_v54, %v2520_v7  ;;  %v2760_v47 = vmul.f32 %v2521_v54, %v2521_v54 }
 0x216   : > { %v2526_v40 = vadd.f32 %v4959_v44, %v2487_v42  ;;  %v5082_v25 = vadd.f32 %v4959_v44, %v2488_v16  ;;  %v2400_v37 = vrot.slane %v2132_v36, 1  ;;  %v2761_v55 = vmul.f32 %v2522_v19, %v2522_v19 }
 0x217   : > { %v2719_v29 = vadd.f32 %v2718_v12, %v2521_v54  ;;  %v2790_v33 = vadd.f32 %v2789_v39, %v2759_v4  ;;  %v2762_v38 = vmul.f32 %v2523_v22, %v2523_v22  ;;  %3368 = vst [vmem:[%s4977_s23 + $0x40] sm:$0xff] %v3324_v52   ;;  %v3750_v2 = vadd.f32 %v3749_v51, %v3748_v30 }
 0x218   : > { %v2145_v17 = vadd.f32 %v5045_v28, %v2144_v23  ;;  %v3339_v5 = vpack.c.bf16 %v5082_v25, %v2526_v40  ;;  %v2408_v43 = vrot.slane %v2153_v10, 1  ;;  %v2401_v9 = vsel %vm2368_vm1, %v2399_v49, %v2400_v37 }
 0x219   : > { %v2720_v45 = vadd.f32 %v2719_v29, %v2522_v19  ;;  %v2791_v57 = vadd.f32 %v2790_v33, %v2760_v47  ;;  %v2459_v35 = vsel %vm2368_vm1, %v2400_v37, 0.0  ;;  %v2156_v18 = vadd.f32 %v3923_v24, %v3747_v13 }
 0x21a   : > { %v3754_v27 = vpop.f32.mrb[140].mxu0  ;;  %v3926_v21 = vpop.f32.mrb[140].mxu1  ;;  %v2405_v26 = vrot.slane %v2145_v17, 1  ;;  %3371 = vst [vmem:[%s4977_s23 + $0x58] sm:$0xff] %v3339_v5   ;;  %v2485_v50 = vadd.f32 %v2401_v9, %v4874_v32  ;;  %v2486_v28 = vadd.f32 %v2459_v35, %v4878_v14  ;;  %v3753_v60 = vadd.f32 %v3752_v48, %v3751_v11 }
 0x21b   : > { %v3755_v1 = vpop.f32.mrb[141].mxu0  ;;  %v2160_v15 = vpop.f32.mrb[141].mxu1  ;;  %v2792_v63 = vadd.f32 %v2791_v57, %v2761_v55  ;;  %v2721_v19 = vadd.f32 %v2720_v45, %v2523_v22  ;;  %v2409_v41 = vrot.slane %v2156_v18, 1  ;;  %v2148_v58 = vadd.f32 %v5055_v0, %v2147_v3 }
 0x21c   : > { %v3757_v30 = vpop.f32.mrb[142].mxu0  ;;  %v3927_v53 = vpop.f32.mrb[142].mxu1  ;;  %v3756_v49 = vadd.f32 %v3755_v1, %v3754_v27  ;;  %v2524_v7 = vadd.f32 %v4959_v44, %v2485_v50  ;;  %v2525_v34 = vadd.f32 %v4959_v44, %v2486_v28  ;;  %v2161_v31 = vadd.f32 %v3750_v2, %v2160_v15 }
 0x21d   : > { %v3758_v51 = vpop.f32.mrb[143].mxu0  ;;  %v2163_v23 = vpop.f32.mrb[143].mxu1  ;;  %v2793_v39 = vadd.f32 %v2792_v63, %v2762_v38  ;;  %v2410_v32 = vsel %vm2368_vm1, %v2408_v43, %v2409_v41  ;;  %v2462_v14 = vsel %vm2368_vm1, %v2409_v41, 0.0  ;;  %v2406_v22 = vrot.slane %v2148_v58, 1  ;;  %v5171_v58 = vld [vmem:[#allocation5_spill] sm:$0xff] }
 0x21e   : > { %v2169_v24 = vadd.f32 %v3926_v21, %v3756_v49  ;;  %v3334_v54 = vpack.c.bf16 %v2525_v34, %v2524_v7  ;;  %v2722_v11 = vadd.f32 %v2721_v19, %v2524_v7  ;;  %v2763_v6 = vmul.f32 %v2524_v7, %v2524_v7 }
 0x21f   : > { %v2764_v0 = vmul.f32 %v2525_v34, %v2525_v34  ;;  %v2491_v42 = vadd.f32 %v2410_v32, %v4916_v59  ;;  %v2492_v13 = vadd.f32 %v2462_v14, %v4920_v20  ;;  %v2407_v48 = vsel %vm2368_vm1, %v2405_v26, %v2406_v22 }
 0x220   : > { %v2461_v3 = vsel %vm2368_vm1, %v2406_v22, 0.0  ;;  %3370 = vst [vmem:[%s4977_s23 + $0x50] sm:$0xff] %v3334_v54   ;;  %v2723_v12 = vadd.f32 %v2722_v11, %v2525_v34  ;;  %v2794_v4 = vadd.f32 %v2793_v39, %v2763_v6  ;;  %v2489_v16 = vadd.f32 %v2407_v48, %v4902_v62 }
 0x221   : > { %v2490_v36 = vadd.f32 %v2461_v3, %v4906_v56  ;;  %v2765_v52 = vmul.f32 %v2526_v40, %v2526_v40  ;;  %v2530_v47 = vadd.f32 %v4959_v44, %v2491_v42  ;;  %v2531_v59 = vadd.f32 %v4959_v44, %v2492_v13 }
 0x222   : > { %v2724_v10 = vadd.f32 %v2723_v12, %v2526_v40  ;;  %v2795_v20 = vadd.f32 %v2794_v4, %v2764_v0  ;;  %v2528_v29 = vadd.f32 %v4959_v44, %v2489_v16  ;;  %v2766_v37 = vmul.f32 %v5082_v25, %v5082_v25 }
 0x223   : > { %v2529_v33 = vadd.f32 %v4959_v44, %v2490_v36  ;;  %v3349_v55 = vpack.c.bf16 %v2531_v59, %v2530_v47  ;;  %v3759_v62 = vadd.f32 %v3758_v51, %v3757_v30  ;;  %v2164_v57 = vadd.f32 %v3753_v60, %v2163_v23 }
 0x224   : > { %v2796_v38 = vadd.f32 %v2795_v20, %v2765_v52  ;;  %v2725_v56 = vadd.f32 %v2724_v10, %v5082_v25  ;;  %v2767_v17 = vmul.f32 %v2528_v29, %v2528_v29  ;;  %v2414_v43 = vrot.slane %v2169_v24, 1  ;;  %v2702_v20 = vld [vmem:[%s4856_s15] sm:$0x1] }
 0x225   : > { %v3344_v2 = vpack.c.bf16 %v2529_v33, %v2528_v29  ;;  %3373 = vst [vmem:[%s4977_s23 + $0x68] sm:$0xff] %v3349_v55   ;;  %v2172_v45 = vadd.f32 %v3927_v53, %v3759_v62  ;;  %v2411_v27 = vrot.slane %v2161_v31, 1  ;;  %v2412_v9 = vrot.slane %v2164_v57, 1 }
 0x226   : > { %v2726_v40 = vadd.f32 %v2725_v56, %v2528_v29  ;;  %v2797_v5 = vadd.f32 %v2796_v38, %v2766_v37  ;;  %v2769_v35 = vmul.f32 %v2530_v47, %v2530_v47  ;;  %v2768_v18 = vmul.f32 %v2529_v33, %v2529_v33  ;;  %v2742_v37 = vld [vmem:[%s4862_s18] sm:$0x1] }
 0x227   : > { %3372 = vst [vmem:[%s4977_s23 + $0x60] sm:$0xff] %v3344_v2   ;;  %v2415_v21 = vrot.slane %v2172_v45, 1  ;;  %v2413_v25 = vsel %vm2368_vm1, %v2411_v27, %v2412_v9  ;;  %v2463_v50 = vsel %vm2368_vm1, %v2412_v9, 0.0  ;;  %v2770_v41 = vmul.f32 %v2531_v59, %v2531_v59 }
 0x228   : > { %v2727_v26 = vadd.f32 %v2726_v40, %v2529_v33  ;;  %v2798_v1 = vadd.f32 %v2797_v5, %v2767_v17  ;;  %v2493_v60 = vadd.f32 %v2413_v25, %v4928_v61  ;;  %v2494_v49 = vadd.f32 %v2463_v50, %v5171_v58 }
 0x229   : > { %v2416_v15 = vsel %vm2368_vm1, %v2414_v43, %v2415_v21  ;;  %v2464_v63 = vsel %vm2368_vm1, %v2415_v21, 0.0 }
 0x22a   : > { %v2728_v28 = vadd.f32 %v2727_v26, %v2530_v47  ;;  %v2799_v19 = vadd.f32 %v2798_v1, %v2768_v18  ;;  %v2495_v30 = vadd.f32 %v2416_v15, %v4940_v8  ;;  %v2496_v53 = vadd.f32 %v2464_v63, %v4944_v46 }
 0x22b   : > { %v2532_v39 = vadd.f32 %v4959_v44, %v2493_v60  ;;  %v2533_v31 = vadd.f32 %v4959_v44, %v2494_v49 }
 0x22c   : > { %v2800_v51 = vadd.f32 %v2799_v19, %v2769_v35  ;;  %v2534_v23 = vadd.f32 %v4959_v44, %v2495_v30  ;;  %v2535_v7 = vadd.f32 %v4959_v44, %v2496_v53  ;;  %v2729_v34 = vadd.f32 %v2728_v28, %v2531_v59 }
 0x22d   : > { %v3354_v14 = vpack.c.bf16 %v2533_v31, %v2532_v39  ;;  %v2771_v22 = vmul.f32 %v2532_v39, %v2532_v39  ;;  %v2772_v24 = vmul.f32 %v2533_v31, %v2533_v31 }
 0x22e   : > { %v3359_v8 = vpack.c.bf16 %v2535_v7, %v2534_v23  ;;  %v2801_v32 = vadd.f32 %v2800_v51, %v2770_v41  ;;  %v2730_v46 = vadd.f32 %v2729_v34, %v2532_v39  ;;  %v2773_v11 = vmul.f32 %v2534_v23, %v2534_v23 }
 0x22f   : > { %3374 = vst [vmem:[%s4977_s23 + $0x70] sm:$0xff] %v3354_v14   ;;  %v2774_v42 = vmul.f32 %v2535_v7, %v2535_v7 }
 0x230   : > { %3375 = vst [vmem:[%s4977_s23 + $0x78] sm:$0xff] %v3359_v8   ;;  %v2731_v61 = vadd.f32 %v2730_v46, %v2533_v31  ;;  %v2802_v54 = vadd.f32 %v2801_v32, %v2771_v22 }
 0x232   : > { %v2732_v6 = vadd.f32 %v2731_v61, %v2534_v23  ;;  %v2803_v0 = vadd.f32 %v2802_v54, %v2772_v24 }
 0x234   : > { %v2733_v13 = vadd.f32 %v2732_v6, %v2535_v7  ;;  %v2804_v48 = vadd.f32 %v2803_v0, %v2773_v11 }
 0x236   : > { %v2734_v3 = vrot.slane %v2733_v13, 4  ;;  %v2805_v44 = vadd.f32 %v2804_v48, %v2774_v42 }
 0x238   : > { %v2735_v12 = vadd.f32 %v2734_v3, %v2733_v13  ;;  %v2806_v4 = vrot.slane %v2805_v44, 4 }
 0x23a   : > { %v2736_v16 = vrot.slane %v2735_v12, 2  ;;  %v2807_v36 = vadd.f32 %v2806_v4, %v2805_v44 }
 0x23c   : > { %v2737_v52 = vadd.f32 %v2736_v16, %v2735_v12  ;;  %v2808_v47 = vrot.slane %v2807_v36, 2 }
 0x23e   : > { %v2738_v59 = vrot.slane %v2737_v52, 1  ;;  %v2809_v10 = vadd.f32 %v2808_v47, %v2807_v36 }
 0x240   : > { %v2739_v29 = vadd.f32 %v2738_v59, %v2737_v52  ;;  %v2810_v33 = vrot.slane %v2809_v10, 1 }
 0x242   : > { %v2740_v55 = vadd.f32 %v2739_v29, %v2702_v20  ;;  %v2811_v62 = vadd.f32 %v2810_v33, %v2809_v10 }
 0x244   : > { %2741 = vst [vmem:[%s4856_s15] sm:$0x1] %v2740_v55  ;;  %v2812_v38 = vadd.f32 %v2811_v62, %v2742_v37 }
 0x246   : > { %2813 = vst [vmem:[%s4862_s18] sm:$0x1] %v2812_v38 }
 0x247 PF: > { %s20_s30 = sadd.s32 1, %s4064_s30   ;;  %s5172_s28 = smov %s4060_s29 }
 0x248   : > { %p17_p5 = scmp.ge.s32.totalorder %s20_s30, 4   ;;  %s5173_s29 = smov %s5175_s5 }
 0x24a   :  { %19 = sbr.rel (!%p17_p5) target bundleno = 2 (0x2), region = 114 }

// kernel: double_conv_apply.4
= control target key start
LH: loop header
LB: loop body
LE: loop exit
PB: predicated region body
PF: predicated region fallthrough
CT: control target
= control target key end

     0   :  { %s4357_s28 = smov 0   ;;  %s4359_s29 = smov 0   ;;  %s5440_s0 = inlined_call_operand.vmem [shape: bf16[2,16,16,128], index: 0, kind: input, shape index: {}, may-alias: {0,1,2}]   ;;  %s5441_s1 = inlined_call_operand.vmem [shape: bf16[2,16,16,128], index: 1, kind: input, shape index: {}, may-alias: {0,1,2}]   ;;  %s5442_s2 = inlined_call_operand.vmem [shape: bf16[2,16,16,128], index: 2, kind: input, shape index: {}, may-alias: {0,1,2}]   ;;  %s5443_s3 = inlined_call_operand.vmem [shape: bf16[3,384,128], index: 3, kind: input, shape index: {}]   ;;  %s5444_s4 = inlined_call_operand.vmem [shape: f32[1,128], index: 4, kind: input, shape index: {}]   ;;  %s5445_s5 = inlined_call_operand.vmem [shape: f32[1,128], index: 5, kind: input, shape index: {}]   ;;  %s5446_s6 = inlined_call_operand.vmem [shape: f32[1,128], index: 6, kind: input, shape index: {}]   ;;  %s5447_s7 = inlined_call_operand.vmem [shape: bf16[2,16,16,128], index: 7, kind: output, shape index: {0}]   ;;  %s5448_s8 = inlined_call_operand.vmem [shape: f32[2,1,1,128], index: 8, kind: output, shape index: {1}]   ;;  %s5449_s9 = inlined_call_operand.vmem [shape: f32[2,1,1,128], index: 9, kind: output, shape index: {2}]  }
   0x1   :  { %s4361_s30 = smov 0  }
   0x2 LB: > { %s39_s10 = sadd.s32 1, %s4299_s29  ;;  %p3190_p0 = scmp.ge.s32.totalorder %s4303_s30, 1  ;;  %s4303_s30 = sphi %s4361_s30, %s20_s30   ;;  %s4299_s29 = sphi %s4359_s29, %s5473_s29   ;;  %s4295_s28 = sphi %s4357_s28, %s5472_s28  }
   0x3   : > { %p41_p1 = scmp.ge.s32.totalorder %s39_s10, 2  ;;  %p403_p2 = scmp.lt.s32.totalorder %s4303_s30, 3 }
   0x5   : > { %s5475_s10 = smov (%p41_p1, %s39_s10), 0  ;;  %p404_p3 = pnand %p3190_p0, %p403_p2 }
   0x7   : > { %407 = sbr.rel (%p404_p3) target bundleno = 583 (0x247), region = 48 }
   0xe   : > { %v4209_v0 = vld [vmem:[%s5443_s3 + $0x40] sm:$0xff]   ;;  %v4211_v2 = vld [vmem:[%s5443_s3 + $0x48] sm:$0xff]   ;;  %p512_p4 = scmp.lt.s32.totalorder %s4295_s28, 1  ;;  %v4213_v4 = vld [vmem:[%s5443_s3 + $0x50] sm:$0xff]   ;;  %vm2365_vm0 = vcmask 1040384   ;;  %vm2526_vm1 = vcmask 1046528  }
   0xf   : > { %v4210_v1 = vld [vmem:[%s5443_s3] sm:$0xff]   ;;  %3615 = vmatprep.subr.bf16.mxu0 %v4209_v0  ;;  %4167 = vmatprep.subr.bf16.mxu1 %v4209_v0  ;;  %v4212_v3 = vld [vmem:[%s5443_s3 + $0x8] sm:$0xff]   ;;  %v4214_v5 = vld [vmem:[%s5443_s3 + $0x10] sm:$0xff]  }
  0x10   : > { %3616 = vmatpush3.bf16.msra.mxu0 %v4210_v1  ;;  %4175 = vmatpush3.bf16.msra.mxu1 %v4210_v1  ;;  %s5477_s28 = smov (!%p512_p4, %s4295_s28), 1  ;;  %v4215_v6 = vld [vmem:[%s5443_s3 + $0x58] sm:$0xff]   ;;  %v4217_v8 = vld [vmem:[%s5443_s3 + $0x60] sm:$0xff]   ;;  %v4219_v10 = vld [vmem:[%s5443_s3 + $0x68] sm:$0xff]  }
  0x11   : > { %3617 = vmatprep.subr.bf16.mxu0 %v4211_v2  ;;  %4168 = vmatprep.subr.bf16.mxu1 %v4211_v2  ;;  %s3405_s0 = sshll.u32 %s5477_s28, 7  ;;  %v4216_v7 = vld [vmem:[%s5443_s3 + $0x18] sm:$0xff]   ;;  %v4218_v9 = vld [vmem:[%s5443_s3 + $0x20] sm:$0xff]   ;;  %v4220_v22 = vld [vmem:[%s5443_s3 + $0x28] sm:$0xff]   ;;  %s5155_s23 = scalar_lea.vmem %s5448_s8, %s5477_s28 }
  0x12   : > { %s4410_s13 = scalar_lea.vmem %s5441_s1, %s3405_s0  ;;  %v4421_v11 = vld [vmem:[%s5445_s5] ss:$0 sm:$0xff]  ;;  %v4221_v25 = vld [vmem:[%s5443_s3 + $0x70] sm:$0xff]   ;;  %v4223_v40 = vld [vmem:[%s5443_s3 + $0x78] sm:$0xff]   ;;  %s5161_s26 = scalar_lea.vmem %s5449_s9, %s5477_s28 }
  0x13   : > { %v3442_v12 = vld [vmem:[%s4410_s13] sm:$0xff]   ;;  %v3595_v16 = vld [vmem:[%s4410_s13 + $0x58] sm:$0xff]   ;;  %v3585_v29 = vld [vmem:[%s4410_s13 + $0x8] sm:$0xff]   ;;  %s5277_s12 = scalar_lea.vmem %s5447_s7, %s3405_s0 }
  0x14   : > { %3618 = vmatpush3.bf16.msra.mxu0 %v4212_v3  ;;  %4176 = vmatpush3.bf16.msra.mxu1 %v4212_v3  ;;  %v3443_v13 = vunpack.c.l.bf16 %v3442_v12  ;;  %v3444_v14 = vunpack.c.h.bf16 %v3442_v12  ;;  %v3596_v15 = vld [vmem:[%s4410_s13 + $0x60] sm:$0xff]   ;;  %v3487_v20 = vunpack.c.l.bf16 %v3595_v16  ;;  %v3488_v21 = vunpack.c.h.bf16 %v3595_v16  ;;  %v3597_v38 = vld [vmem:[%s4410_s13 + $0x68] sm:$0xff]   ;;  %v4222_v39 = vld [vmem:[%s5443_s3 + $0x30] sm:$0xff]  }
  0x15   : > { %3619 = vmatprep.subr.bf16.mxu0 %v4213_v4  ;;  %4169 = vmatprep.subr.bf16.mxu1 %v4213_v4  ;;  %v4429_v17 = vld [vmem:[%s5446_s6] ss:$0 sm:$0xff]  ;;  %v3491_v18 = vunpack.c.l.bf16 %v3596_v15  ;;  %v3492_v19 = vunpack.c.h.bf16 %v3596_v15  ;;  %v3447_v33 = vunpack.c.l.bf16 %v3585_v29  ;;  %v3448_v37 = vunpack.c.h.bf16 %v3585_v29  ;;  %v3586_v49 = vld [vmem:[%s4410_s13 + $0x10] sm:$0xff]   ;;  %v4224_v59 = vld [vmem:[%s5443_s3 + $0x38] sm:$0xff]  }
  0x16   : > { %v657_v23 = vmul.f32 %v3443_v13, %v4421_v11  ;;  %v658_v24 = vmul.f32 %v3444_v14, %v4421_v11  ;;  %v679_v28 = vmul.f32 %v3487_v20, %v4421_v11  ;;  %v680_v32 = vmul.f32 %v3488_v21, %v4421_v11  ;;  %v3598_v54 = vld [vmem:[%s4410_s13 + $0x70] sm:$0xff]   ;;  %v4225_v60 = vld [vmem:[%s5443_s3 + $0x80] sm:$0xff]   ;;  %v3587_v0 = vld [vmem:[%s4410_s13 + $0x18] sm:$0xff]  }
  0x17   : > { %v681_v26 = vmul.f32 %v3491_v18, %v4421_v11  ;;  %v682_v27 = vmul.f32 %v3492_v19, %v4421_v11  ;;  %v659_v44 = vmul.f32 %v3447_v33, %v4421_v11  ;;  %v660_v48 = vmul.f32 %v3448_v37, %v4421_v11  ;;  %v4226_v1 = vld [vmem:[%s5443_s3 + $0x140] sm:$0xff]   ;;  %v3599_v15 = vld [vmem:[%s4410_s13 + $0x78] sm:$0xff]   ;;  %v4227_v21 = vld [vmem:[%s5443_s3 + $0x88] sm:$0xff]  }
  0x18   : > { %3620 = vmatpush3.bf16.msra.mxu0 %v4214_v5  ;;  %4177 = vmatpush3.bf16.msra.mxu1 %v4214_v5  ;;  %v689_v30 = vadd.f32 %v4429_v17, %v657_v23  ;;  %v690_v31 = vadd.f32 %v4429_v17, %v658_v24  ;;  %v711_v36 = vadd.f32 %v4429_v17, %v679_v28  ;;  %v3495_v53 = vunpack.c.l.bf16 %v3597_v38 }
  0x19   : > { %3621 = vmatprep.subr.bf16.mxu0 %v4215_v6  ;;  %4170 = vmatprep.subr.bf16.mxu1 %v4215_v6  ;;  %v713_v34 = vadd.f32 %v4429_v17, %v681_v26  ;;  %v714_v35 = vadd.f32 %v4429_v17, %v682_v27  ;;  %v712_v43 = vadd.f32 %v4429_v17, %v680_v32  ;;  %v3496_v57 = vunpack.c.h.bf16 %v3597_v38 }
  0x1a   : > { %v721_v41 = vmax.f32 %v689_v30, 0.0  ;;  %v722_v42 = vmax.f32 %v690_v31, 0.0  ;;  %v743_v47 = vmax.f32 %v711_v36, 0.0  ;;  %v691_v52 = vadd.f32 %v4429_v17, %v659_v44  ;;  %v3588_v31 = vld [vmem:[%s4410_s13 + $0x20] sm:$0xff]   ;;  %v4228_v36 = vld [vmem:[%s5443_s3 + $0x90] sm:$0xff]  }
  0x1b   : > { %v745_v45 = vmax.f32 %v713_v34, 0.0  ;;  %v746_v46 = vmax.f32 %v714_v35, 0.0  ;;  %v744_v51 = vmax.f32 %v712_v43, 0.0  ;;  %v692_v56 = vadd.f32 %v4429_v17, %v660_v48 }
  0x1c   : > { %3622 = vmatpush3.bf16.msra.mxu0 %v4216_v7  ;;  %4178 = vmatpush3.bf16.msra.mxu1 %v4216_v7  ;;  %v4460_v50 = vpack.c.bf16 %v722_v42, %v721_v41  ;;  %v3451_v58 = vunpack.c.l.bf16 %v3586_v49  ;;  %v723_v61 = vmax.f32 %v691_v52, 0.0  ;;  %v683_v62 = vmul.f32 %v3495_v53, %v4421_v11  ;;  %v4234_v41 = vld [vmem:[%s5443_s3 + $0x150] sm:$0xff]   ;;  %v4231_v52 = vld [vmem:[%s5443_s3 + $0xa0] sm:$0xff]  }
  0x1d   : > { %3623 = vmatprep.subr.bf16.mxu0 %v4217_v8  ;;  %4171 = vmatprep.subr.bf16.mxu1 %v4217_v8  ;;  %v4464_v55 = vpack.c.bf16 %v746_v46, %v745_v45  ;;  %v3452_v63 = vunpack.c.h.bf16 %v3586_v49  ;;  %v724_v2 = vmax.f32 %v692_v56, 0.0  ;;  %v684_v3 = vmul.f32 %v3496_v57, %v4421_v11  ;;  %v3589_v56 = vld [vmem:[%s4410_s13 + $0x28] sm:$0xff]  }
  0x1e   : > { %v661_v4 = vmul.f32 %v3451_v58, %v4421_v11  ;;  %v3499_v5 = vunpack.c.l.bf16 %v3598_v54  ;;  %1013 = vmatprep.mubr.bf16.mxu0 %v4460_v50  ;;  %v4482_v6 = vpack.c.bf16 %v744_v51, %v743_v47  ;;  %v715_v7 = vadd.f32 %v4429_v17, %v683_v62  ;;  %v4229_v47 = vld [vmem:[%s5443_s3 + $0x98] sm:$0xff]   ;;  %v3594_v62 = vld [vmem:[%s4410_s13 + $0x50] sm:$0xff]  }
  0x1f   : > { %1109 = vmatprep.mubr.bf16.mxu1 %v4464_v55  ;;  %v662_v8 = vmul.f32 %v3452_v63, %v4421_v11  ;;  %v3455_v14 = vunpack.c.l.bf16 %v3587_v0  ;;  %v3456_v20 = vunpack.c.h.bf16 %v3587_v0  ;;  %v3503_v27 = vunpack.c.l.bf16 %v3599_v15 }
  0x20   : > { %3624 = vmatpush3.bf16.msra.mxu0 %v4218_v9  ;;  %4179 = vmatpush3.bf16.msra.mxu1 %v4218_v9  ;;  %v3500_v9 = vunpack.c.h.bf16 %v3598_v54  ;;  %v693_v12 = vadd.f32 %v4429_v17, %v661_v4  ;;  %v685_v13 = vmul.f32 %v3499_v5, %v4421_v11  ;;  %v747_v16 = vmax.f32 %v715_v7, 0.0  ;;  %v4238_v54 = vld [vmem:[%s5443_s3 + $0x158] sm:$0xff]   ;;  %v4232_v4 = vld [vmem:[%s5443_s3 + $0xa8] sm:$0xff]  }
  0x21   : > { %3625 = vmatprep.subr.bf16.mxu0 %v4219_v10  ;;  %4172 = vmatprep.subr.bf16.mxu1 %v4219_v10  ;;  %v716_v10 = vadd.f32 %v4429_v17, %v684_v3  ;;  %v694_v18 = vadd.f32 %v4429_v17, %v662_v8  ;;  %v4305_v28 = vmov 0.0|0.0   ;;  %v3504_v30 = vunpack.c.h.bf16 %v3599_v15  ;;  %v4243_v8 = vld [vmem:[%s5443_s3 + $0x160] sm:$0xff]  }
  0x22   : > { %v686_v19 = vmul.f32 %v3500_v9, %v4421_v11  ;;  %v717_v24 = vadd.f32 %v4429_v17, %v685_v13  ;;  %v725_v32 = vmax.f32 %v693_v12, 0.0  ;;  %v663_v34 = vmul.f32 %v3455_v14, %v4421_v11 }
  0x23   : > { %v748_v23 = vmax.f32 %v716_v10, 0.0  ;;  %v726_v33 = vmax.f32 %v694_v18, 0.0  ;;  %v664_v35 = vmul.f32 %v3456_v20, %v4421_v11  ;;  %v3459_v42 = vunpack.c.l.bf16 %v3588_v31  ;;  %v3590_v10 = vld [vmem:[%s4410_s13 + $0x30] sm:$0xff]   ;;  %v4246_v18 = vld [vmem:[%s5443_s3 + $0x168] sm:$0xff]  }
  0x24   : > { %3626 = vmatpush3.bf16.msra.mxu0 %v4220_v22  ;;  %4180 = vmatpush3.bf16.msra.mxu1 %v4220_v22  ;;  %v4495_v22 = vpack.c.bf16 %v724_v2, %v723_v61  ;;  %v718_v26 = vadd.f32 %v4429_v17, %v686_v19  ;;  %v749_v37 = vmax.f32 %v717_v24, 0.0  ;;  %v695_v44 = vadd.f32 %v4429_v17, %v663_v34  ;;  %v4233_v19 = vld [vmem:[%s5443_s3 + $0xb0] sm:$0xff]   ;;  %v3591_v34 = vld [vmem:[%s4410_s13 + $0x38] sm:$0xff]  }
  0x25   : > { %3627 = vmatprep.subr.bf16.mxu0 %v4221_v25  ;;  %4173 = vmatprep.subr.bf16.mxu1 %v4221_v25  ;;  %v4230_v25 = vld [vmem:[%s5443_s3 + $0x148] sm:$0xff]   ;;  %v4504_v29 = vpack.c.bf16 %v748_v23, %v747_v16  ;;  %v4519_v43 = vpack.c.bf16 %v726_v33, %v725_v32  ;;  %v696_v45 = vadd.f32 %v4429_v17, %v664_v35  ;;  %v3460_v46 = vunpack.c.h.bf16 %v3588_v31  ;;  %v4235_v32 = vld [vmem:[%s5443_s3 + $0xb8] sm:$0xff]  }
  0x26   : > { %v750_v38 = vmax.f32 %v718_v26, 0.0  ;;  %v665_v53 = vmul.f32 %v3459_v42, %v4421_v11  ;;  %v727_v57 = vmax.f32 %v695_v44, 0.0  ;;  %v3463_v2 = vunpack.c.l.bf16 %v3589_v56 }
  0x27   : > { %v728_v58 = vmax.f32 %v696_v45, 0.0  ;;  %v3464_v3 = vunpack.c.h.bf16 %v3589_v56  ;;  %v3483_v7 = vunpack.c.l.bf16 %v3594_v62  ;;  %v3484_v12 = vunpack.c.h.bf16 %v3594_v62  ;;  %v4237_v45 = vld [vmem:[%s5443_s3 + $0xc0] sm:$0xff]   ;;  %v4241_v56 = vld [vmem:[%s5443_s3 + $0x110] sm:$0xff]   ;;  %v3593_v62 = vld [vmem:[%s4410_s13 + $0x48] sm:$0xff]  }
  0x28   : > { %3628 = vmatpush3.bf16.msra.mxu0 %v4222_v39  ;;  %4181 = vmatpush3.bf16.msra.mxu1 %v4222_v39  ;;  %v687_v39 = vmul.f32 %v3503_v27, %v4421_v11  ;;  %v4526_v48 = vpack.c.bf16 %v750_v38, %v749_v37  ;;  %v697_v63 = vadd.f32 %v4429_v17, %v665_v53  ;;  %v3467_v23 = vunpack.c.l.bf16 %v3590_v10  ;;  %v4251_v37 = vld [vmem:[%s5443_s3 + $0x170] sm:$0xff]   ;;  %v4254_v53 = vld [vmem:[%s5443_s3 + $0x178] sm:$0xff]  }
  0x29   : > { %3629 = vmatprep.subr.bf16.mxu0 %v4223_v40  ;;  %4174 = vmatprep.subr.bf16.mxu1 %v4223_v40  ;;  %v688_v40 = vmul.f32 %v3504_v30, %v4421_v11  ;;  %v4545_v0 = vpack.c.bf16 %v728_v58, %v727_v57  ;;  %v677_v13 = vmul.f32 %v3483_v7, %v4421_v11  ;;  %v3468_v31 = vunpack.c.h.bf16 %v3590_v10  ;;  %v3592_v58 = vld [vmem:[%s4410_s13 + $0x40] sm:$0xff]   ;;  %v4244_v10 = vld [vmem:[%s5443_s3 + $0x118] sm:$0xff]  }
  0x2a   : > { %v719_v49 = vadd.f32 %v4429_v17, %v687_v39  ;;  %v729_v9 = vmax.f32 %v697_v63, 0.0  ;;  %v667_v15 = vmul.f32 %v3463_v2, %v4421_v11  ;;  %v668_v16 = vmul.f32 %v3464_v3, %v4421_v11 }
  0x2b   : > { %v720_v51 = vadd.f32 %v4429_v17, %v688_v40  ;;  %v678_v20 = vmul.f32 %v3484_v12, %v4421_v11  ;;  %v669_v35 = vmul.f32 %v3467_v23, %v4421_v11  ;;  %v670_v40 = vmul.f32 %v3468_v31, %v4421_v11 }
  0x2c   : > { %3630 = vmatpush3.bf16.msra.mxu0 %v4224_v59  ;;  %4182 = vmatpush3.bf16.msra.mxu1 %v4224_v59  ;;  %v666_v59 = vmul.f32 %v3460_v46, %v4421_v11  ;;  %v699_v27 = vadd.f32 %v4429_v17, %v667_v15  ;;  %v700_v30 = vadd.f32 %v4429_v17, %v668_v16  ;;  %v3471_v44 = vunpack.c.l.bf16 %v3591_v34 }
  0x2d   : > { %4023 = vmatprep.subr.bf16.mxu1 %v4225_v60  ;;  %4071 = vmatprep.subr.bf16.mxu0 %v4226_v1  ;;  %v752_v61 = vmax.f32 %v720_v51, 0.0  ;;  %v710_v24 = vadd.f32 %v4429_v17, %v678_v20  ;;  %v701_v42 = vadd.f32 %v4429_v17, %v669_v35  ;;  %v4239_v51 = vld [vmem:[%s5443_s3 + $0x108] sm:$0xff]   ;;  %v3476_v2 = vunpack.c.h.bf16 %v3592_v58  ;;  %v4247_v20 = vld [vmem:[%s5443_s3 + $0x120] sm:$0xff]   ;;  %v4252_v35 = vld [vmem:[%s5443_s3 + $0x130] sm:$0xff]  }
  0x2e   : > { %v731_v38 = vmax.f32 %v699_v27, 0.0  ;;  %v732_v39 = vmax.f32 %v700_v30, 0.0  ;;  %v671_v57 = vmul.f32 %v3471_v44, %v4421_v11  ;;  %v3479_v7 = vunpack.c.l.bf16 %v3593_v62  ;;  %v4249_v30 = vld [vmem:[%s5443_s3 + $0x128] sm:$0xff]   ;;  %v4259_v44 = vld [vmem:[%s5443_s3 + $0x180] sm:$0xff]  }
  0x2f   : > { %1014 = vmatmul.mubr.bf16.vlgmr.msra.gmra.mrb[0].mxu0 %v4305_v28  ;;  %1110 = vmatmul.mubr.bf16.vlgmr.msra.gmra.mrb[0].mxu1 %v4482_v6  ;;  %v742_v33 = vmax.f32 %v710_v24, 0.0 }
  0x30   : > { %4024 = vmatpush3.bf16.msra.mxu1 %v4225_v60  ;;  %4072 = vmatpush3.bf16.msra.mxu0 %v4226_v1  ;;  %v751_v60 = vmax.f32 %v719_v49, 0.0  ;;  %v698_v1 = vadd.f32 %v4429_v17, %v666_v59  ;;  %v4599_v46 = vpack.c.bf16 %v732_v39, %v731_v38  ;;  %v3472_v49 = vunpack.c.h.bf16 %v3591_v34  ;;  %v4250_v34 = vld [vmem:[%s5443_s3 + $0xe8] sm:$0xff]   ;;  %v4253_v39 = vld [vmem:[%s5443_s3 + $0xf0] sm:$0xff]  }
  0x31   : > { %4025 = vmatprep.subr.bf16.mxu1 %v4227_v21  ;;  %1021 = vmatprep.mubr.bf16.mxu0 %v4495_v22  ;;  %v703_v63 = vadd.f32 %v4429_v17, %v671_v57  ;;  %v4266_v57 = vld [vmem:[%s5443_s3 + $0x198] sm:$0xff]  }
  0x32   : > { %1117 = vmatprep.mubr.bf16.mxu1 %v4504_v29  ;;  %4073 = vmatprep.subr.bf16.mxu0 %v4230_v25  ;;  %v4551_v5 = vpack.c.bf16 %v752_v61, %v751_v60  ;;  %v730_v14 = vmax.f32 %v698_v1, 0.0  ;;  %v672_v60 = vmul.f32 %v3472_v49, %v4421_v11  ;;  %v4258_v61 = vld [vmem:[%s5443_s3 + $0x1c0] sm:$0xff]   ;;  %v3475_v1 = vunpack.c.l.bf16 %v3592_v58  ;;  %v4261_v49 = vld [vmem:[%s5443_s3 + $0x188] sm:$0xff]  }
  0x33   : > { %v735_v15 = vmax.f32 %v703_v63, 0.0  ;;  %v4268_v58 = vld [vmem:[%s5443_s3 + $0x1e0] sm:$0xff]   ;;  %v4271_v63 = vld [vmem:[%s5443_s3 + $0x1a8] sm:$0xff]  }
  0x34   : > { %4026 = vmatpush3.bf16.msra.mxu1 %v4227_v21  ;;  %4074 = vmatpush3.bf16.msra.mxu0 %v4230_v25  ;;  %v709_v21 = vadd.f32 %v4429_v17, %v677_v13  ;;  %v4573_v26 = vpack.c.bf16 %v730_v14, %v729_v9  ;;  %v4242_v9 = vld [vmem:[%s5443_s3 + $0xd0] sm:$0xff]   ;;  %v673_v12 = vmul.f32 %v3475_v1, %v4421_v11  ;;  %v4245_v14 = vld [vmem:[%s5443_s3 + $0xd8] sm:$0xff]  }
  0x35   : > { %4027 = vmatprep.subr.bf16.mxu1 %v4228_v36  ;;  %4075 = vmatprep.subr.bf16.mxu0 %v4234_v41  ;;  %v674_v13 = vmul.f32 %v3476_v2, %v4421_v11  ;;  %v4273_v1 = vld [vmem:[%s5443_s3 + $0x1f0] sm:$0xff]  }
  0x36   : > { %v741_v25 = vmax.f32 %v709_v21, 0.0  ;;  %v705_v21 = vadd.f32 %v4429_v17, %v673_v12  ;;  %v4279_v2 = vld [vmem:[%s5443_s3 + $0x230] sm:$0xff]  }
  0x37   : > { %1022 = vmatmul.mubr.bf16.gmra.mrb[4].mxu0 %v4460_v50  ;;  %1118 = vmatmul.mubr.bf16.gmra.mrb[4].mxu1 %v4464_v55  ;;  %v706_v23 = vadd.f32 %v4429_v17, %v674_v13 }
  0x38   : > { %4028 = vmatpush3.bf16.msra.mxu1 %v4228_v36  ;;  %1029 = vmatprep.mubr.bf16.mxu0 %v4519_v43  ;;  %v4584_v36 = vpack.c.bf16 %v742_v33, %v741_v25  ;;  %v737_v31 = vmax.f32 %v705_v21, 0.0 }
  0x39   : > { %4029 = vmatprep.subr.bf16.mxu1 %v4229_v47  ;;  %1125 = vmatprep.mubr.bf16.mxu1 %v4526_v48 }
  0x3a   : > { %4076 = vmatpush3.bf16.msra.mxu0 %v4234_v41  ;;  %v4236_v41 = vld [vmem:[%s5443_s3 + $0x100] sm:$0xff]  }
  0x3b   : > { %4077 = vmatprep.subr.bf16.mxu0 %v4238_v54 }
  0x3c   : > { %4030 = vmatpush3.bf16.msra.mxu1 %v4229_v47  ;;  %v702_v47 = vadd.f32 %v4429_v17, %v670_v40  ;;  %v4255_v40 = vld [vmem:[%s5443_s3 + $0x138] sm:$0xff]  }
  0x3d   : > { %4031 = vmatprep.subr.bf16.mxu1 %v4231_v52 }
  0x3e   : > { %4078 = vmatpush3.bf16.msra.mxu0 %v4238_v54  ;;  %v733_v54 = vmax.f32 %v701_v42, 0.0  ;;  %v734_v59 = vmax.f32 %v702_v47, 0.0  ;;  %v4257_v42 = vld [vmem:[%s5443_s3 + $0x200] sm:$0xff]   ;;  %v4262_v47 = vld [vmem:[%s5443_s3 + $0x208] sm:$0xff]  }
  0x3f   : > { %1030 = vmatmul.mubr.bf16.gmra.mrb[8].mxu0 %v4495_v22  ;;  %1126 = vmatmul.mubr.bf16.gmra.mrb[8].mxu1 %v4504_v29 }
  0x40   : > { %4032 = vmatpush3.bf16.msra.mxu1 %v4231_v52  ;;  %1037 = vmatprep.mubr.bf16.mxu0 %v4545_v0  ;;  %v4240_v52 = vld [vmem:[%s5443_s3 + $0xc8] sm:$0xff]   ;;  %v4626_v3 = vpack.c.bf16 %v734_v59, %v733_v54  ;;  %v4265_v54 = vld [vmem:[%s5443_s3 + $0x1d8] sm:$0xff]   ;;  %v4277_v59 = vld [vmem:[%s5443_s3 + $0x220] sm:$0xff]  }
  0x41   : > { %4033 = vmatprep.subr.bf16.mxu1 %v4232_v4  ;;  %1133 = vmatprep.mubr.bf16.mxu1 %v4551_v5 }
  0x42   : > { %4079 = vmatprep.subr.bf16.mxu0 %v4243_v8 }
  0x43   : > { %4080 = vmatpush3.bf16.msra.mxu0 %v4243_v8  ;;  %v3480_v8 = vunpack.c.h.bf16 %v3593_v62  ;;  %v4278_v62 = vld [vmem:[%s5443_s3 + $0x228] sm:$0xff]  }
  0x44   : > { %4034 = vmatpush3.bf16.msra.mxu1 %v4232_v4  ;;  %4081 = vmatprep.subr.bf16.mxu0 %v4246_v18  ;;  %v704_v4 = vadd.f32 %v4429_v17, %v672_v60  ;;  %v4269_v60 = vld [vmem:[%s5443_s3 + $0x1a0] sm:$0xff]  }
  0x45   : > { %4035 = vmatprep.subr.bf16.mxu1 %v4233_v19 }
  0x46   : > { %v736_v16 = vmax.f32 %v704_v4, 0.0  ;;  %v4274_v4 = vld [vmem:[%s5443_s3 + $0x1b0] sm:$0xff]  }
  0x47   : > { %1038 = vmatmul.mubr.bf16.gmra.mrb[12].mxu0 %v4519_v43  ;;  %1134 = vmatmul.mubr.bf16.gmra.mrb[12].mxu1 %v4526_v48 }
  0x48   : > { %4036 = vmatpush3.bf16.msra.mxu1 %v4233_v19  ;;  %1045 = vmatprep.mubr.bf16.mxu0 %v4573_v26  ;;  %v676_v19 = vmul.f32 %v3480_v8, %v4421_v11  ;;  %v4651_v24 = vpack.c.bf16 %v736_v16, %v735_v15  ;;  %v4280_v8 = vld [vmem:[%s5443_s3 + $0x238] sm:$0xff]  }
  0x49   : > { %4037 = vmatprep.subr.bf16.mxu1 %v4235_v32  ;;  %4039 = vmatprep.mubr.bf16.mxu1 %v4495_v22 }
  0x4a   : > { %4082 = vmatpush3.bf16.msra.mxu0 %v4246_v18  ;;  %v675_v18 = vmul.f32 %v3479_v7, %v4421_v11  ;;  %v708_v27 = vadd.f32 %v4429_v17, %v676_v19  ;;  %v4248_v11 = vld [vmem:[%s5443_s3 + $0xe0] sm:$0xff]   ;;  %v4275_v7 = vld [vmem:[%s5443_s3 + $0x1f8] sm:$0xff]  }
  0x4b   : > { %4083 = vmatprep.subr.bf16.mxu0 %v4251_v37 }
  0x4c   : > { %4038 = vmatpush3.bf16.msra.mxu1 %v4235_v32  ;;  %v707_v25 = vadd.f32 %v4429_v17, %v675_v18  ;;  %v738_v32 = vmax.f32 %v706_v23, 0.0  ;;  %v740_v33 = vmax.f32 %v708_v27, 0.0 }
  0x4d   : > { %3751 = vmatprep.subr.bf16.mxu1 %v4236_v41  ;;  %v4256_v41 = vld [vmem:[%s5443_s3 + $0xf8] sm:$0xff]  }
  0x4e   : > { %4084 = vmatpush3.bf16.msra.mxu0 %v4251_v37  ;;  %v739_v17 = vmax.f32 %v707_v25, 0.0  ;;  %v4671_v37 = vpack.c.bf16 %v738_v32, %v737_v31 }
  0x4f   : > { %1046 = vmatmul.mubr.bf16.gmra.mrb[16].mxu0 %v4545_v0  ;;  %4040 = vmatmul.mubr.bf16.vlgmr.msra.gmra.mrb[16].mxu1 %v4519_v43 }
  0x50   : > { %3752 = vmatpush3.bf16.msra.mxu1 %v4237_v45  ;;  %1053 = vmatprep.mubr.bf16.mxu0 %v4599_v46  ;;  %v4673_v38 = vpack.c.bf16 %v740_v33, %v739_v17  ;;  %v4260_v45 = vld [vmem:[%s5443_s3 + $0x1c8] sm:$0xff]  }
  0x51   : > { %4043 = vmatprep.mubr.bf16.mxu1 %v4545_v0  ;;  %3753 = vmatprep.subr.bf16.mxu1 %v4239_v51  ;;  %v4263_v51 = vld [vmem:[%s5443_s3 + $0x1d0] sm:$0xff]  }
  0x52   : > { %4085 = vmatprep.subr.bf16.mxu0 %v4254_v53 }
  0x53   : > { %4086 = vmatpush3.bf16.msra.mxu0 %v4254_v53  ;;  %v4264_v53 = vld [vmem:[%s5443_s3 + $0x190] sm:$0xff]  }
  0x54   : > { %3754 = vmatpush3.bf16.msra.mxu1 %v4240_v52  ;;  %3887 = vmatprep.subr.bf16.mxu0 %v4258_v61  ;;  %v4267_v52 = vld [vmem:[%s5443_s3 + $0x210] sm:$0xff]   ;;  %v4270_v61 = vld [vmem:[%s5443_s3 + $0x1e8] sm:$0xff]  }
  0x55   : > { %3755 = vmatprep.subr.bf16.mxu1 %v4241_v56  ;;  %v4272_v56 = vld [vmem:[%s5443_s3 + $0x218] sm:$0xff]  }
  0x57   : > { %1054 = vmatmul.mubr.bf16.gmra.mrb[20].mxu0 %v4573_v26  ;;  %4044 = vmatmul.mubr.bf16.gmra.mrb[20].mxu1 %v4573_v26 }
  0x58   : > { %1061 = vmatprep.mubr.bf16.mxu0 %v4626_v3  ;;  %4047 = vmatprep.mubr.bf16.mxu1 %v4599_v46 }
  0x59   : > { %3756 = vmatpush3.bf16.msra.mxu1 %v4242_v9  ;;  %v4276_v9 = vld [vmem:[%s5443_s3 + $0x1b8] sm:$0xff]  }
  0x5a   : > { %3757 = vmatprep.subr.bf16.mxu1 %v4244_v10 }
  0x5d   : > { %3758 = vmatpush3.bf16.msra.mxu1 %v4245_v14 }
  0x5e   : > { %3759 = vmatprep.subr.bf16.mxu1 %v4247_v20 }
  0x5f   : > { %1062 = vmatmul.mubr.bf16.gmra.mrb[24].mxu0 %v4599_v46  ;;  %4048 = vmatmul.mubr.bf16.gmra.mrb[24].mxu1 %v4626_v3 }
  0x60   : > { %1069 = vmatprep.mubr.bf16.mxu0 %v4651_v24  ;;  %4051 = vmatprep.mubr.bf16.mxu1 %v4651_v24 }
  0x61   : > { %3760 = vmatpush3.bf16.msra.mxu1 %v4248_v11 }
  0x62   : > { %3761 = vmatprep.subr.bf16.mxu1 %v4249_v30 }
  0x65   : > { %3762 = vmatpush3.bf16.msra.mxu1 %v4250_v34 }
  0x66   : > { %3763 = vmatprep.subr.bf16.mxu1 %v4252_v35 }
  0x67   : > { %1070 = vmatmul.mubr.bf16.gmra.mrb[28].mxu0 %v4626_v3  ;;  %4052 = vmatmul.mubr.bf16.gmra.mrb[28].mxu1 %v4671_v37 }
  0x68   : > { %1077 = vmatprep.mubr.bf16.mxu0 %v4671_v37  ;;  %4055 = vmatprep.mubr.bf16.mxu1 %v4673_v38 }
  0x69   : > { %3764 = vmatpush3.bf16.msra.mxu1 %v4253_v39 }
  0x6a   : > { %3765 = vmatprep.subr.bf16.mxu1 %v4255_v40 }
  0x6d   : > { %3766 = vmatpush3.bf16.msra.mxu1 %v4256_v41 }
  0x6e   : > { %4119 = vmatprep.subr.bf16.mxu1 %v4257_v42 }
  0x6f   : > { %1078 = vmatmul.mubr.bf16.gmra.mrb[32].mxu0 %v4651_v24  ;;  %4056 = vmatmul.mubr.bf16.gmra.mrb[32].mxu1 %v4584_v36 }
  0x70   : > { %1085 = vmatprep.mubr.bf16.mxu0 %v4673_v38  ;;  %4059 = vmatprep.mubr.bf16.mxu1 %v4482_v6 }
  0x77   : > { %1086 = vmatmul.mubr.bf16.gmra.mrb[36].mxu0 %v4671_v37  ;;  %4060 = vmatmul.mubr.bf16.gmra.mrb[36].mxu1 %v4464_v55 }
  0x78   : > { %1093 = vmatprep.mubr.bf16.mxu0 %v4584_v36  ;;  %4063 = vmatprep.mubr.bf16.mxu1 %v4504_v29 }
  0x7f   : > { %1094 = vmatmul.mubr.bf16.gmra.mrb[40].mxu0 %v4673_v38  ;;  %4064 = vmatmul.mubr.bf16.gmra.mrb[40].mxu1 %v4526_v48 }
  0x80   : > { %1101 = vmatprep.mubr.bf16.mxu0 %v4482_v6  ;;  %4067 = vmatprep.mubr.bf16.mxu1 %v4551_v5 }
  0x87   : > { %1102 = vmatmul.mubr.bf16.gmra.mrb[44].mxu0 %v4584_v36  ;;  %4068 = vmatmul.mubr.bf16.gmra.mrb[44].mxu1 %v4305_v28 }
  0x88   : > { %1528 = vmatprep.mubr.bf16.mxu1 %v4460_v50  ;;  %4087 = vmatprep.mubr.bf16.mxu0 %v4495_v22 }
  0x8f   : > { %1529 = vmatmul.mubr.bf16.vlgmr.msra.gmra.mrb[48].mxu1 %v4305_v28  ;;  %4088 = vmatmul.mubr.bf16.vlgmr.msra.gmra.mrb[48].mxu0 %v4519_v43 }
  0x90   : > { %4120 = vmatpush3.bf16.msra.mxu1 %v4257_v42  ;;  %3888 = vmatpush3.bf16.msra.mxu0 %v4259_v44 }
  0x91   : > { %1536 = vmatprep.mubr.bf16.mxu1 %v4495_v22  ;;  %4091 = vmatprep.mubr.bf16.mxu0 %v4545_v0 }
  0x92   : > { %3889 = vmatprep.subr.bf16.mxu0 %v4260_v45  ;;  %4121 = vmatprep.subr.bf16.mxu1 %v4262_v47 }
  0x94   : > { %3890 = vmatpush3.bf16.msra.mxu0 %v4261_v49  ;;  %4122 = vmatpush3.bf16.msra.mxu1 %v4262_v47 }
  0x95   : > { %3891 = vmatprep.subr.bf16.mxu0 %v4263_v51  ;;  %4123 = vmatprep.subr.bf16.mxu1 %v4267_v52 }
  0x97   : > { %1537 = vmatmul.mubr.bf16.gmra.mrb[52].mxu1 %v4460_v50  ;;  %4092 = vmatmul.mubr.bf16.gmra.mrb[52].mxu0 %v4573_v26 }
  0x98   : > { %1544 = vmatprep.mubr.bf16.mxu1 %v4519_v43  ;;  %4095 = vmatprep.mubr.bf16.mxu0 %v4599_v46 }
  0x99   : > { %3892 = vmatpush3.bf16.msra.mxu0 %v4264_v53  ;;  %4124 = vmatpush3.bf16.msra.mxu1 %v4267_v52 }
  0x9a   : > { %3893 = vmatprep.subr.bf16.mxu0 %v4265_v54  ;;  %4125 = vmatprep.subr.bf16.mxu1 %v4272_v56 }
  0x9d   : > { %3894 = vmatpush3.bf16.msra.mxu0 %v4266_v57  ;;  %4126 = vmatpush3.bf16.msra.mxu1 %v4272_v56 }
  0x9e   : > { %3895 = vmatprep.subr.bf16.mxu0 %v4268_v58  ;;  %4127 = vmatprep.subr.bf16.mxu1 %v4277_v59 }
  0x9f   : > { %1545 = vmatmul.mubr.bf16.gmra.mrb[56].mxu1 %v4495_v22  ;;  %4096 = vmatmul.mubr.bf16.gmra.mrb[56].mxu0 %v4626_v3 }
  0xa0   : > { %1552 = vmatprep.mubr.bf16.mxu1 %v4545_v0  ;;  %4099 = vmatprep.mubr.bf16.mxu0 %v4651_v24 }
  0xa1   : > { %3896 = vmatpush3.bf16.msra.mxu0 %v4269_v60  ;;  %4128 = vmatpush3.bf16.msra.mxu1 %v4277_v59 }
  0xa2   : > { %3897 = vmatprep.subr.bf16.mxu0 %v4270_v61  ;;  %4129 = vmatprep.subr.bf16.mxu1 %v4278_v62 }
  0xa5   : > { %3898 = vmatpush3.bf16.msra.mxu0 %v4271_v63  ;;  %4130 = vmatpush3.bf16.msra.mxu1 %v4278_v62 }
  0xa6   : > { %3899 = vmatprep.subr.bf16.mxu0 %v4273_v1  ;;  %4131 = vmatprep.subr.bf16.mxu1 %v4279_v2 }
  0xa7   : > { %1553 = vmatmul.mubr.bf16.gmra.mrb[60].mxu1 %v4519_v43  ;;  %4100 = vmatmul.mubr.bf16.gmra.mrb[60].mxu0 %v4671_v37 }
  0xa8   : > { %1560 = vmatprep.mubr.bf16.mxu1 %v4573_v26  ;;  %4103 = vmatprep.mubr.bf16.mxu0 %v4673_v38 }
  0xa9   : > { %3900 = vmatpush3.bf16.msra.mxu0 %v4274_v4  ;;  %4132 = vmatpush3.bf16.msra.mxu1 %v4279_v2 }
  0xaa   : > { %3901 = vmatprep.subr.bf16.mxu0 %v4275_v7  ;;  %4133 = vmatprep.subr.bf16.mxu1 %v4280_v8 }
  0xad   : > { %3902 = vmatpush3.bf16.msra.mxu0 %v4276_v9  ;;  %4134 = vmatpush3.bf16.msra.mxu1 %v4280_v8 }
  0xaf   : > { %1561 = vmatmul.mubr.bf16.gmra.mrb[64].mxu1 %v4545_v0  ;;  %4104 = vmatmul.mubr.bf16.gmra.mrb[64].mxu0 %v4584_v36 }
  0xb0   : > { %1568 = vmatprep.mubr.bf16.mxu1 %v4599_v46  ;;  %4107 = vmatprep.mubr.bf16.mxu0 %v4482_v6 }
  0xb7   : > { %1569 = vmatmul.mubr.bf16.gmra.mrb[68].mxu1 %v4573_v26  ;;  %4108 = vmatmul.mubr.bf16.gmra.mrb[68].mxu0 %v4464_v55 }
  0xb8   : > { %1576 = vmatprep.mubr.bf16.mxu1 %v4626_v3  ;;  %4111 = vmatprep.mubr.bf16.mxu0 %v4504_v29 }
  0xbf   : > { %1577 = vmatmul.mubr.bf16.gmra.mrb[72].mxu1 %v4599_v46  ;;  %4112 = vmatmul.mubr.bf16.gmra.mrb[72].mxu0 %v4526_v48 }
  0xc0   : > { %1584 = vmatprep.mubr.bf16.mxu1 %v4651_v24  ;;  %4115 = vmatprep.mubr.bf16.mxu0 %v4551_v5 }
  0xc7   : > { %1585 = vmatmul.mubr.bf16.gmra.mrb[76].mxu1 %v4626_v3  ;;  %4116 = vmatmul.mubr.bf16.gmra.mrb[76].mxu0 %v4305_v28 }
  0xc8   : > { %1592 = vmatprep.mubr.bf16.mxu1 %v4671_v37  ;;  %2043 = vmatprep.mubr.bf16.mxu0 %v4460_v50 }
  0xcf   : > { %1593 = vmatmul.mubr.bf16.gmra.mrb[80].mxu1 %v4651_v24  ;;  %2044 = vmatmul.mubr.bf16.vlgmr.msra.gmra.mrb[80].mxu0 %v4305_v28 }
  0xd0   : > { %1600 = vmatprep.mubr.bf16.mxu1 %v4673_v38  ;;  %2051 = vmatprep.mubr.bf16.mxu0 %v4495_v22 }
  0xd7   : > { %1601 = vmatmul.mubr.bf16.gmra.mrb[84].mxu1 %v4671_v37  ;;  %2052 = vmatmul.mubr.bf16.gmra.mrb[84].mxu0 %v4460_v50 }
  0xd8   : > { %1608 = vmatprep.mubr.bf16.mxu1 %v4584_v36  ;;  %2059 = vmatprep.mubr.bf16.mxu0 %v4519_v43 }
  0xdf   : > { %1609 = vmatmul.mubr.bf16.gmra.mrb[88].mxu1 %v4673_v38  ;;  %2060 = vmatmul.mubr.bf16.gmra.mrb[88].mxu0 %v4495_v22 }
  0xe0   : > { %1616 = vmatprep.mubr.bf16.mxu1 %v4482_v6  ;;  %2067 = vmatprep.mubr.bf16.mxu0 %v4545_v0 }
  0xe7   : > { %1617 = vmatmul.mubr.bf16.gmra.mrb[92].mxu1 %v4584_v36  ;;  %2068 = vmatmul.mubr.bf16.gmra.mrb[92].mxu0 %v4519_v43 }
  0xe8   : > { %1624 = vmatprep.mubr.bf16.mxu1 %v4464_v55  ;;  %2075 = vmatprep.mubr.bf16.mxu0 %v4573_v26 }
  0xef   : > { %1625 = vmatmul.mubr.bf16.gmra.mrb[96].mxu1 %v4482_v6  ;;  %2076 = vmatmul.mubr.bf16.gmra.mrb[96].mxu0 %v4545_v0 }
  0xf0   : > { %1632 = vmatprep.mubr.bf16.mxu1 %v4504_v29  ;;  %2083 = vmatprep.mubr.bf16.mxu0 %v4599_v46 }
  0xf7   : > { %1633 = vmatmul.mubr.bf16.gmra.mrb[100].mxu1 %v4464_v55  ;;  %2084 = vmatmul.mubr.bf16.gmra.mrb[100].mxu0 %v4573_v26 }
  0xf8   : > { %1640 = vmatprep.mubr.bf16.mxu1 %v4526_v48  ;;  %2091 = vmatprep.mubr.bf16.mxu0 %v4626_v3 }
  0xff   : > { %1641 = vmatmul.mubr.bf16.gmra.mrb[104].mxu1 %v4504_v29  ;;  %2092 = vmatmul.mubr.bf16.gmra.mrb[104].mxu0 %v4599_v46 }
 0x100   : > { %1648 = vmatprep.mubr.bf16.mxu1 %v4551_v5  ;;  %2099 = vmatprep.mubr.bf16.mxu0 %v4651_v24 }
 0x102   : > { %v3631_v50 = vpop.f32.mrb[0].mxu0  ;;  %v3703_v10 = vpop.f32.mrb[0].mxu1 }
 0x103   : > { %v3632_v12 = vpop.f32.mrb[1].mxu0  ;;  %v3704_v13 = vpop.f32.mrb[1].mxu1 }
 0x104   : > { %v4833_v14 = vadd.f32 %v3632_v12, %v3631_v50  ;;  %v4835_v15 = vadd.f32 %v3704_v13, %v3703_v10  ;;  %v3634_v16 = vpop.f32.mrb[2].mxu0  ;;  %v3706_v18 = vpop.f32.mrb[2].mxu1 }
 0x105   : > { %v3635_v19 = vpop.f32.mrb[3].mxu0  ;;  %v3707_v20 = vpop.f32.mrb[3].mxu1 }
 0x106   : > { %v4837_v21 = vadd.f32 %v3635_v19, %v3634_v16  ;;  %v4839_v23 = vadd.f32 %v3707_v20, %v3706_v18 }
 0x107   : > { %1649 = vmatmul.mubr.bf16.gmra.mrb[108].mxu1 %v4526_v48  ;;  %2100 = vmatmul.mubr.bf16.gmra.mrb[108].mxu0 %v4626_v3 }
 0x108   : > { %2107 = vmatprep.mubr.bf16.mxu0 %v4671_v37  ;;  %4135 = vmatprep.mubr.bf16.mxu1 %v4495_v22 }
 0x10a   : > { %v3637_v25 = vpop.f32.mrb[4].mxu0  ;;  %v3709_v27 = vpop.f32.mrb[4].mxu1 }
 0x10b   : > { %v3638_v11 = vpop.f32.mrb[5].mxu0  ;;  %v3710_v30 = vpop.f32.mrb[5].mxu1 }
 0x10c   : > { %v3639_v31 = vadd.f32 %v3638_v11, %v3637_v25  ;;  %v4845_v32 = vadd.f32 %v3710_v30, %v3709_v27  ;;  %v3640_v17 = vpop.f32.mrb[6].mxu0  ;;  %v3712_v33 = vpop.f32.mrb[6].mxu1 }
 0x10d   : > { %v3641_v34 = vpop.f32.mrb[7].mxu0  ;;  %v3713_v35 = vpop.f32.mrb[7].mxu1 }
 0x10e   : > { %v3642_v39 = vadd.f32 %v3641_v34, %v3640_v17  ;;  %v4847_v40 = vadd.f32 %v3713_v35, %v3712_v33 }
 0x10f   : > { %2108 = vmatmul.mubr.bf16.gmra.mrb[112].mxu0 %v4651_v24  ;;  %4136 = vmatmul.mubr.bf16.vlgmr.msra.gmra.mrb[112].mxu1 %v4519_v43 }
 0x110   : > { %2115 = vmatprep.mubr.bf16.mxu0 %v4673_v38  ;;  %4139 = vmatprep.mubr.bf16.mxu1 %v4545_v0 }
 0x112   : > { %v3643_v22 = vpop.f32.mrb[8].mxu0  ;;  %v3715_v41 = vpop.f32.mrb[8].mxu1 }
 0x113   : > { %v3644_v42 = vpop.f32.mrb[9].mxu0  ;;  %v3716_v44 = vpop.f32.mrb[9].mxu1 }
 0x114   : > { %v3645_v45 = vadd.f32 %v3644_v42, %v3643_v22  ;;  %v4853_v47 = vadd.f32 %v3716_v44, %v3715_v41  ;;  %v3646_v49 = vpop.f32.mrb[10].mxu0  ;;  %v3718_v51 = vpop.f32.mrb[10].mxu1 }
 0x115   : > { %v3647_v52 = vpop.f32.mrb[11].mxu0  ;;  %v3719_v53 = vpop.f32.mrb[11].mxu1 }
 0x116   : > { %v3648_v54 = vadd.f32 %v3647_v52, %v3646_v49  ;;  %v4855_v56 = vadd.f32 %v3719_v53, %v3718_v51 }
 0x117   : > { %2116 = vmatmul.mubr.bf16.gmra.mrb[116].mxu0 %v4671_v37  ;;  %4140 = vmatmul.mubr.bf16.gmra.mrb[116].mxu1 %v4573_v26 }
 0x118   : > { %2123 = vmatprep.mubr.bf16.mxu0 %v4584_v36  ;;  %4143 = vmatprep.mubr.bf16.mxu1 %v4599_v46 }
 0x11a   : > { %v3649_v43 = vpop.f32.mrb[12].mxu0  ;;  %v3721_v0 = vpop.f32.mrb[12].mxu1 }
 0x11b   : > { %v3650_v57 = vpop.f32.mrb[13].mxu0  ;;  %v3722_v58 = vpop.f32.mrb[13].mxu1 }
 0x11c   : > { %v3651_v59 = vadd.f32 %v3650_v57, %v3649_v43  ;;  %v4861_v60 = vadd.f32 %v3722_v58, %v3721_v0  ;;  %v3652_v61 = vpop.f32.mrb[14].mxu0  ;;  %v3724_v62 = vpop.f32.mrb[14].mxu1 }
 0x11d   : > { %v3653_v63 = vpop.f32.mrb[15].mxu0  ;;  %v3725_v1 = vpop.f32.mrb[15].mxu1 }
 0x11e   : > { %v3654_v2 = vadd.f32 %v3653_v63, %v3652_v61  ;;  %v4863_v4 = vadd.f32 %v3725_v1, %v3724_v62 }
 0x11f   : > { %2124 = vmatmul.mubr.bf16.gmra.mrb[120].mxu0 %v4673_v38  ;;  %4144 = vmatmul.mubr.bf16.gmra.mrb[120].mxu1 %v4626_v3 }
 0x120   : > { %2131 = vmatprep.mubr.bf16.mxu0 %v4482_v6  ;;  %4147 = vmatprep.mubr.bf16.mxu1 %v4651_v24 }
 0x122   : > { %v3655_v26 = vpop.f32.mrb[16].mxu0  ;;  %v4041_v46 = vpop.f32.mrb[16].mxu1 }
 0x123   : > { %v4869_v7 = vadd.f32 %v4041_v46, %v3639_v31  ;;  %v3656_v8 = vpop.f32.mrb[17].mxu0  ;;  %v1176_v9 = vpop.f32.mrb[17].mxu1 }
 0x124   : > { %v3657_v50 = vadd.f32 %v3656_v8, %v3655_v26  ;;  %v4872_v10 = vadd.f32 %v4833_v14, %v1176_v9  ;;  %v3658_v12 = vpop.f32.mrb[18].mxu0  ;;  %v4042_v13 = vpop.f32.mrb[18].mxu1 }
 0x125   : > { %v1188_v16 = vadd.f32 %v4042_v13, %v3642_v39  ;;  %v3659_v18 = vpop.f32.mrb[19].mxu0  ;;  %v1179_v19 = vpop.f32.mrb[19].mxu1  ;;  %v2369_v24 = vrot.slane %v4869_v7, 7 }
 0x126   : > { %v3660_v3 = vadd.f32 %v3659_v18, %v3658_v12  ;;  %v1180_v20 = vadd.f32 %v4837_v21, %v1179_v19  ;;  %v2366_v27 = vrot.slane %v4872_v10, 7 }
 0x127   : > { %v2370_v25 = vrot.slane %v1188_v16, 7  ;;  %2132 = vmatmul.mubr.bf16.gmra.mrb[124].mxu0 %v4584_v36  ;;  %4148 = vmatmul.mubr.bf16.gmra.mrb[124].mxu1 %v4671_v37  ;;  %v2447_v10 = vsel %vm2365_vm0, 0.0, %v2369_v24 }
 0x128   : > { %v2367_v14 = vrot.slane %v1180_v20, 7  ;;  %2139 = vmatprep.mubr.bf16.mxu0 %v4464_v55  ;;  %4151 = vmatprep.mubr.bf16.mxu1 %v4673_v38 }
 0x129   : > { %v4884_v11 = vsel %vm2365_vm0, %v2369_v24, %v2370_v25 }
 0x12a   : > { %v3661_v21 = vpop.f32.mrb[20].mxu0  ;;  %v4045_v30 = vpop.f32.mrb[20].mxu1  ;;  %v4889_v31 = vsel %vm2365_vm0, %v2366_v27, %v2367_v14 }
 0x12b   : > { %v4891_v37 = vadd.f32 %v4045_v30, %v3651_v59  ;;  %v3662_v17 = vpop.f32.mrb[21].mxu0  ;;  %v1192_v33 = vpop.f32.mrb[21].mxu1 }
 0x12c   : > { %v3663_v34 = vadd.f32 %v3662_v17, %v3661_v21  ;;  %v4893_v35 = vadd.f32 %v3645_v45, %v1192_v33  ;;  %v3664_v38 = vpop.f32.mrb[22].mxu0  ;;  %v4046_v39 = vpop.f32.mrb[22].mxu1 }
 0x12d   : > { %v1204_v22 = vadd.f32 %v4046_v39, %v3654_v2  ;;  %v3665_v41 = vpop.f32.mrb[23].mxu0  ;;  %v1195_v42 = vpop.f32.mrb[23].mxu1  ;;  %v2375_v51 = vrot.slane %v4891_v37, 7 }
 0x12e   : > { %v3666_v44 = vadd.f32 %v3665_v41, %v3664_v38  ;;  %v1196_v49 = vadd.f32 %v3648_v54, %v1195_v42  ;;  %v2372_v53 = vrot.slane %v4893_v35, 7 }
 0x12f   : > { %v2376_v52 = vrot.slane %v1204_v22, 7  ;;  %2140 = vmatmul.mubr.bf16.gmra.mrb[128].mxu0 %v4482_v6  ;;  %4152 = vmatmul.mubr.bf16.gmra.mrb[128].mxu1 %v4584_v36 }
 0x130   : > { %v2373_v43 = vrot.slane %v1196_v49, 7  ;;  %2147 = vmatprep.mubr.bf16.mxu0 %v4504_v29  ;;  %4155 = vmatprep.mubr.bf16.mxu1 %v4482_v6  ;;  %v2448_v7 = vsel %vm2365_vm0, 0.0, %v2372_v53 }
 0x131   : > { %v4904_v45 = vsel %vm2365_vm0, %v2375_v51, %v2376_v52 }
 0x132   : > { %v3667_v54 = vpop.f32.mrb[24].mxu0  ;;  %v4049_v0 = vpop.f32.mrb[24].mxu1  ;;  %v4909_v57 = vsel %vm2365_vm0, %v2372_v53, %v2373_v43  ;;  %v2449_v53 = vsel %vm2365_vm0, 0.0, %v2375_v51 }
 0x133   : > { %v4911_v36 = vadd.f32 %v4049_v0, %v3663_v34  ;;  %v3668_v58 = vpop.f32.mrb[25].mxu0  ;;  %v1208_v59 = vpop.f32.mrb[25].mxu1 }
 0x134   : > { %v3669_v61 = vadd.f32 %v3668_v58, %v3667_v54  ;;  %v4913_v62 = vadd.f32 %v3657_v50, %v1208_v59  ;;  %v3670_v6 = vpop.f32.mrb[26].mxu0  ;;  %v4050_v63 = vpop.f32.mrb[26].mxu1 }
 0x135   : > { %v1220_v1 = vadd.f32 %v4050_v63, %v3666_v44  ;;  %v3671_v2 = vpop.f32.mrb[27].mxu0  ;;  %v1211_v26 = vpop.f32.mrb[27].mxu1  ;;  %v2381_v9 = vrot.slane %v4911_v36, 7 }
 0x136   : > { %v3672_v46 = vadd.f32 %v3671_v2, %v3670_v6  ;;  %v1212_v8 = vadd.f32 %v3660_v3, %v1211_v26  ;;  %v2378_v13 = vrot.slane %v4913_v62, 7 }
 0x137   : > { %v2382_v12 = vrot.slane %v1220_v1, 7  ;;  %2148 = vmatmul.mubr.bf16.gmra.mrb[132].mxu0 %v4464_v55  ;;  %4156 = vmatmul.mubr.bf16.gmra.mrb[132].mxu1 %v4464_v55 }
 0x138   : > { %v2379_v16 = vrot.slane %v1212_v8, 7  ;;  %2155 = vmatprep.mubr.bf16.mxu0 %v4526_v48  ;;  %4159 = vmatprep.mubr.bf16.mxu1 %v4504_v29 }
 0x139   : > { %v4924_v50 = vsel %vm2365_vm0, %v2381_v9, %v2382_v12 }
 0x13a   : > { %v3673_v18 = vpop.f32.mrb[28].mxu0  ;;  %v4053_v19 = vpop.f32.mrb[28].mxu1  ;;  %v4929_v3 = vsel %vm2365_vm0, %v2378_v13, %v2379_v16 }
 0x13b   : > { %v3674_v55 = vpop.f32.mrb[29].mxu0  ;;  %v1224_v20 = vpop.f32.mrb[29].mxu1 }
 0x13c   : > { %v3675_v25 = vadd.f32 %v3674_v55, %v3673_v18  ;;  %v4931_v14 = vadd.f32 %v3669_v61, %v1224_v20  ;;  %v3676_v21 = vpop.f32.mrb[30].mxu0  ;;  %v4054_v30 = vpop.f32.mrb[30].mxu1 }
 0x13d   : > { %v3677_v17 = vpop.f32.mrb[31].mxu0  ;;  %v1227_v33 = vpop.f32.mrb[31].mxu1 }
 0x13e   : > { %v4933_v34 = vadd.f32 %v4053_v19, %v3675_v25  ;;  %v3678_v38 = vadd.f32 %v3677_v17, %v3676_v21  ;;  %v1228_v39 = vadd.f32 %v3672_v46, %v1227_v33  ;;  %v2384_v22 = vrot.slane %v4931_v14, 7 }
 0x13f   : > { %2156 = vmatmul.mubr.bf16.gmra.mrb[136].mxu0 %v4504_v29  ;;  %4160 = vmatmul.mubr.bf16.gmra.mrb[136].mxu1 %v4526_v48 }
 0x140   : > { %v1236_v41 = vadd.f32 %v4054_v30, %v3678_v38  ;;  %v2385_v42 = vrot.slane %v1228_v39, 7  ;;  %2163 = vmatprep.mubr.bf16.mxu0 %v4551_v5  ;;  %4163 = vmatprep.mubr.bf16.mxu1 %v4551_v5  ;;  %v5456_v44 = vrot.slane %v4933_v34, 7 }
 0x142   : > { %v2388_v49 = vrot.slane %v1236_v41, 7  ;;  %v3679_v52 = vpop.f32.mrb[32].mxu0  ;;  %v4057_v43 = vpop.f32.mrb[32].mxu1  ;;  %v4944_v54 = vsel %vm2365_vm0, %v2384_v22, %v2385_v42 }
 0x143   : > { %v3680_v29 = vpop.f32.mrb[33].mxu0  ;;  %v1240_v0 = vpop.f32.mrb[33].mxu1 }
 0x144   : > { %v3681_v58 = vadd.f32 %v3680_v29, %v3679_v52  ;;  %v3682_v59 = vpop.f32.mrb[34].mxu0  ;;  %v4058_v61 = vpop.f32.mrb[34].mxu1  ;;  %v4949_v6 = vsel %vm2365_vm0, %v5456_v44, %v2388_v49 }
 0x145   : > { %v3683_v5 = vpop.f32.mrb[35].mxu0  ;;  %v1243_v63 = vpop.f32.mrb[35].mxu1 }
 0x146   : > { %v4951_v1 = vadd.f32 %v3681_v58, %v1240_v0  ;;  %v3684_v2 = vadd.f32 %v3683_v5, %v3682_v59 }
 0x147   : > { %2164 = vmatmul.mubr.bf16.gmra.mrb[140].mxu0 %v4526_v48  ;;  %4164 = vmatmul.mubr.bf16.gmra.mrb[140].mxu1 %v4305_v28 }
 0x148   : > { %v1244_v26 = vadd.f32 %v3684_v2, %v1243_v63  ;;  %v5455_v46 = vrot.slane %v4951_v1, 7 }
 0x14a   : > { %v2391_v8 = vrot.slane %v1244_v26, 7  ;;  %v3685_v12 = vpop.f32.mrb[36].mxu0  ;;  %v4061_v16 = vpop.f32.mrb[36].mxu1 }
 0x14b   : > { %v3686_v18 = vpop.f32.mrb[37].mxu0  ;;  %v1256_v19 = vpop.f32.mrb[37].mxu1 }
 0x14c   : > { %v3687_v55 = vadd.f32 %v3686_v18, %v3685_v12  ;;  %v3688_v20 = vpop.f32.mrb[38].mxu0  ;;  %v4062_v25 = vpop.f32.mrb[38].mxu1  ;;  %v4959_v21 = vsel %vm2365_vm0, %v5455_v46, %v2391_v8 }
 0x14d   : > { %v3689_v30 = vpop.f32.mrb[39].mxu0  ;;  %v1259_v48 = vpop.f32.mrb[39].mxu1 }
 0x14e   : > { %v4961_v17 = vadd.f32 %v4057_v43, %v3687_v55  ;;  %v3690_v28 = vadd.f32 %v3689_v30, %v3688_v20 }
 0x150   : > { %v1252_v33 = vadd.f32 %v4058_v61, %v3690_v28  ;;  %v5454_v38 = vrot.slane %v4961_v17, 7 }
 0x152   : > { %v2394_v39 = vrot.slane %v1252_v33, 7  ;;  %v3691_v41 = vpop.f32.mrb[40].mxu0  ;;  %v4065_v42 = vpop.f32.mrb[40].mxu1 }
 0x153   : > { %v4965_v49 = vadd.f32 %v4065_v42, %v4845_v32  ;;  %v3692_v52 = vpop.f32.mrb[41].mxu0  ;;  %v1272_v29 = vpop.f32.mrb[41].mxu1 }
 0x154   : > { %v3693_v0 = vadd.f32 %v3692_v52, %v3691_v41  ;;  %v4968_v58 = vadd.f32 %v4835_v15, %v1272_v29  ;;  %v3694_v59 = vpop.f32.mrb[42].mxu0  ;;  %v4066_v5 = vpop.f32.mrb[42].mxu1  ;;  %v4973_v43 = vsel %vm2365_vm0, %v5454_v38, %v2394_v39 }
 0x155   : > { %v1284_v61 = vadd.f32 %v4066_v5, %v4847_v40  ;;  %v3695_v63 = vpop.f32.mrb[43].mxu0  ;;  %v1275_v2 = vpop.f32.mrb[43].mxu1  ;;  %v5450_v12 = vrot.slane %v4965_v49, 7 }
 0x156   : > { %v4976_v26 = vadd.f32 %v3693_v0, %v1256_v19  ;;  %v3696_v32 = vadd.f32 %v3695_v63, %v3694_v59  ;;  %v1276_v8 = vadd.f32 %v4839_v23, %v1275_v2  ;;  %v5451_v18 = vrot.slane %v4968_v58, 7 }
 0x157   : > { %v2406_v15 = vrot.slane %v1284_v61, 7 }
 0x158   : > { %v1260_v55 = vadd.f32 %v3696_v32, %v1259_v48  ;;  %v2403_v20 = vrot.slane %v1276_v8, 7  ;;  %v5453_v40 = vrot.slane %v4976_v26, 7 }
 0x159   : > { %v4984_v30 = vsel %vm2365_vm0, %v5450_v12, %v2406_v15 }
 0x15a   : > { %v2397_v28 = vrot.slane %v1260_v55, 7  ;;  %v3697_v19 = vpop.f32.mrb[44].mxu0  ;;  %v4069_v33 = vpop.f32.mrb[44].mxu1  ;;  %v4990_v23 = vsel %vm2365_vm0, %v5451_v18, %v2403_v20 }
 0x15b   : > { %v1297_v39 = vadd.f32 %v4069_v33, %v4861_v60  ;;  %v3698_v41 = vpop.f32.mrb[45].mxu0  ;;  %v1288_v48 = vpop.f32.mrb[45].mxu1 }
 0x15c   : > { %v3699_v42 = vadd.f32 %v3698_v41, %v3697_v19  ;;  %v1289_v52 = vadd.f32 %v4853_v47, %v1288_v48  ;;  %v3700_v29 = vpop.f32.mrb[46].mxu0  ;;  %v4070_v0 = vpop.f32.mrb[46].mxu1  ;;  %v4997_v59 = vsel %vm2365_vm0, %v5453_v40, %v2397_v28 }
 0x15d   : > { %v2411_v5 = vrot.slane %v1297_v39, 7  ;;  %v1300_v61 = vadd.f32 %v4070_v0, %v4863_v4  ;;  %v3701_v63 = vpop.f32.mrb[47].mxu0  ;;  %v1291_v2 = vpop.f32.mrb[47].mxu1 }
 0x15e   : > { %v5000_v32 = vadd.f32 %v4061_v16, %v3699_v42  ;;  %v2408_v60 = vrot.slane %v1289_v52, 7  ;;  %v3702_v8 = vadd.f32 %v3701_v63, %v3700_v29  ;;  %v1292_v15 = vadd.f32 %v4855_v56, %v1291_v2 }
 0x15f   : > { %v5004_v47 = vsel %vm2365_vm0, 0.0, %v2411_v5  ;;  %v2412_v55 = vrot.slane %v1300_v61, 7 }
 0x160   : > { %v5007_v20 = vsel %vm2365_vm0, 0.0, %v2408_v60  ;;  %v1268_v28 = vadd.f32 %v4062_v25, %v3702_v8  ;;  %v2409_v19 = vrot.slane %v1292_v15, 7  ;;  %v5452_v4 = vrot.slane %v5000_v32, 7 }
 0x161   : > { %v5010_v33 = vsel %vm2365_vm0, %v2411_v5, %v2412_v55  ;;  %v2446_v8 = vsel %vm2365_vm0, 0.0, %v2366_v27 }
 0x162   : > { %v2400_v16 = vrot.slane %v1268_v28, 7  ;;  %v3767_v39 = vpop.f32.mrb[48].mxu1  ;;  %v4089_v41 = vpop.f32.mrb[48].mxu0  ;;  %v5014_v48 = vsel %vm2365_vm0, %v2408_v60, %v2409_v19 }
 0x163   : > { %v3768_v56 = vpop.f32.mrb[49].mxu1  ;;  %v1691_v42 = vpop.f32.mrb[49].mxu0 }
 0x164   : > { %v3769_v52 = vadd.f32 %v3768_v56, %v3767_v39  ;;  %v3770_v29 = vpop.f32.mrb[50].mxu1  ;;  %v4090_v0 = vpop.f32.mrb[50].mxu0  ;;  %v5019_v25 = vsel %vm2365_vm0, %v5452_v4, %v2400_v16 }
 0x165   : > { %v3771_v5 = vpop.f32.mrb[51].mxu1  ;;  %v1694_v61 = vpop.f32.mrb[51].mxu0 }
 0x166   : > { %v1692_v63 = vadd.f32 %v3769_v52, %v1691_v42  ;;  %v3772_v2 = vadd.f32 %v3771_v5, %v3770_v29 }
 0x168   : > { %v5024_v60 = vadd.f32 %v2446_v8, %v1692_v63  ;;  %v1695_v15 = vadd.f32 %v3772_v2, %v1694_v61 }
 0x16a   : > { %v5027_v55 = vadd.f32 %v4889_v31, %v1695_v15  ;;  %v3773_v28 = vpop.f32.mrb[52].mxu1  ;;  %v4093_v19 = vpop.f32.mrb[52].mxu0 }
 0x16b   : > { %v3774_v39 = vpop.f32.mrb[53].mxu1  ;;  %v1707_v56 = vpop.f32.mrb[53].mxu0 }
 0x16c   : > { %v3775_v16 = vadd.f32 %v3774_v39, %v3773_v28  ;;  %v3776_v12 = vpop.f32.mrb[54].mxu1  ;;  %v4094_v18 = vpop.f32.mrb[54].mxu0 }
 0x16d   : > { %v3777_v4 = vpop.f32.mrb[55].mxu1  ;;  %v1710_v42 = vpop.f32.mrb[55].mxu0 }
 0x16e   : > { %v1700_v52 = vadd.f32 %v4089_v41, %v3775_v16  ;;  %v3778_v29 = vadd.f32 %v3777_v4, %v3776_v12 }
 0x170   : > { %v5032_v27 = vadd.f32 %v2447_v10, %v1700_v52  ;;  %v1703_v5 = vadd.f32 %v4090_v0, %v3778_v29 }
 0x172   : > { %v5035_v31 = vadd.f32 %v4884_v11, %v1703_v5  ;;  %v3779_v61 = vpop.f32.mrb[56].mxu1  ;;  %v4097_v63 = vpop.f32.mrb[56].mxu0 }
 0x173   : > { %v3780_v2 = vpop.f32.mrb[57].mxu1  ;;  %v1723_v8 = vpop.f32.mrb[57].mxu0 }
 0x174   : > { %v3781_v15 = vadd.f32 %v3780_v2, %v3779_v61  ;;  %v3782_v28 = vpop.f32.mrb[58].mxu1  ;;  %v4098_v39 = vpop.f32.mrb[58].mxu0 }
 0x175   : > { %v3783_v40 = vpop.f32.mrb[59].mxu1  ;;  %v1726_v41 = vpop.f32.mrb[59].mxu0 }
 0x176   : > { %v1708_v12 = vadd.f32 %v3781_v15, %v1707_v56  ;;  %v3784_v4 = vadd.f32 %v3783_v40, %v3782_v28 }
 0x178   : > { %v5040_v24 = vadd.f32 %v2448_v7, %v1708_v12  ;;  %v1711_v0 = vadd.f32 %v3784_v4, %v1710_v42 }
 0x17a   : > { %v5043_v11 = vadd.f32 %v4909_v57, %v1711_v0  ;;  %v3785_v16 = vpop.f32.mrb[60].mxu1  ;;  %v5045_v52 = vpop.f32.mrb[60].mxu0 }
 0x17b   : > { %v3786_v29 = vpop.f32.mrb[61].mxu1  ;;  %v1739_v10 = vpop.f32.mrb[61].mxu0 }
 0x17c   : > { %v3787_v5 = vadd.f32 %v3786_v29, %v3785_v16  ;;  %v3788_v61 = vpop.f32.mrb[62].mxu1  ;;  %v5047_v2 = vpop.f32.mrb[62].mxu0 }
 0x17d   : > { %v3789_v40 = vpop.f32.mrb[63].mxu1  ;;  %v1742_v56 = vpop.f32.mrb[63].mxu0 }
 0x17e   : > { %v1716_v35 = vadd.f32 %v4093_v19, %v3787_v5  ;;  %v3790_v15 = vadd.f32 %v3789_v40, %v3788_v61 }
 0x180   : > { %v5052_v42 = vadd.f32 %v2449_v53, %v1716_v35  ;;  %v1719_v57 = vadd.f32 %v4094_v18, %v3790_v15 }
 0x182   : > { %v5055_v28 = vadd.f32 %v4904_v45, %v1719_v57  ;;  %v3791_v12 = vpop.f32.mrb[64].mxu1  ;;  %v5057_v4 = vpop.f32.mrb[64].mxu0  ;;  %v2450_v45 = vsel %vm2365_vm0, 0.0, %v2378_v13 }
 0x183   : > { %v3792_v7 = vpop.f32.mrb[65].mxu1  ;;  %v5059_v0 = vpop.f32.mrb[65].mxu0 }
 0x184   : > { %v3793_v16 = vadd.f32 %v3792_v7, %v3791_v12  ;;  %v3794_v29 = vpop.f32.mrb[66].mxu1  ;;  %v5061_v19 = vpop.f32.mrb[66].mxu0 }
 0x185   : > { %v3795_v5 = vpop.f32.mrb[67].mxu1  ;;  %v5063_v37 = vpop.f32.mrb[67].mxu0 }
 0x186   : > { %v1724_v51 = vadd.f32 %v3793_v16, %v1723_v8  ;;  %v3796_v61 = vadd.f32 %v3795_v5, %v3794_v29 }
 0x188   : > { %v5068_v18 = vadd.f32 %v2450_v45, %v1724_v51  ;;  %v1727_v40 = vadd.f32 %v3796_v61, %v1726_v41 }
 0x18a   : > { %v5071_v35 = vadd.f32 %v4929_v3, %v1727_v40  ;;  %v3797_v15 = vpop.f32.mrb[68].mxu1  ;;  %v5073_v53 = vpop.f32.mrb[68].mxu0  ;;  %v2451_v3 = vsel %vm2365_vm0, 0.0, %v2381_v9 }
 0x18b   : > { %v3798_v57 = vpop.f32.mrb[69].mxu1  ;;  %v5075_v12 = vpop.f32.mrb[69].mxu0 }
 0x18c   : > { %v3799_v7 = vadd.f32 %v3798_v57, %v3797_v15  ;;  %v3800_v38 = vpop.f32.mrb[70].mxu1  ;;  %v5077_v8 = vpop.f32.mrb[70].mxu0 }
 0x18d   : > { %v3801_v16 = vpop.f32.mrb[71].mxu1  ;;  %v5079_v62 = vpop.f32.mrb[71].mxu0 }
 0x18e   : > { %v1732_v13 = vadd.f32 %v4097_v63, %v3799_v7  ;;  %v3802_v29 = vadd.f32 %v3801_v16, %v3800_v38 }
 0x190   : > { %v5084_v41 = vadd.f32 %v2451_v3, %v1732_v13  ;;  %v1735_v5 = vadd.f32 %v4098_v39, %v3802_v29 }
 0x192   : > { %v5087_v51 = vadd.f32 %v4924_v50, %v1735_v5  ;;  %v3803_v61 = vpop.f32.mrb[72].mxu1  ;;  %v5089_v45 = vpop.f32.mrb[72].mxu0  ;;  %v2452_v50 = vsel %vm2365_vm0, 0.0, %v2384_v22 }
 0x193   : > { %v3804_v40 = vpop.f32.mrb[73].mxu1  ;;  %v5091_v15 = vpop.f32.mrb[73].mxu0 }
 0x194   : > { %v3805_v57 = vadd.f32 %v3804_v40, %v3803_v61  ;;  %v3806_v46 = vpop.f32.mrb[74].mxu1  ;;  %v5093_v63 = vpop.f32.mrb[74].mxu0 }
 0x195   : > { %v3807_v38 = vpop.f32.mrb[75].mxu1  ;;  %v5095_v36 = vpop.f32.mrb[75].mxu0 }
 0x196   : > { %v1740_v9 = vadd.f32 %v3805_v57, %v1739_v10  ;;  %v3808_v7 = vadd.f32 %v3807_v38, %v3806_v46 }
 0x198   : > { %v5100_v39 = vadd.f32 %v2452_v50, %v1740_v9  ;;  %v1743_v16 = vadd.f32 %v3808_v7, %v1742_v56  ;;  %v5459_v56 = vrot.slane %v4933_v34, 7 }
 0x19a   : > { %5457 = vst [vmem:[#allocation2_spill] sm:$0xff] %v5100_v39  ;;  %v5103_v13 = vadd.f32 %v4944_v54, %v1743_v16  ;;  %v3809_v29 = vpop.f32.mrb[76].mxu1  ;;  %v5105_v3 = vpop.f32.mrb[76].mxu0  ;;  %v2453_v54 = vsel %vm2365_vm0, 0.0, %v5459_v56 }
 0x19b   : > { %v3810_v5 = vpop.f32.mrb[77].mxu1  ;;  %v5107_v61 = vpop.f32.mrb[77].mxu0 }
 0x19c   : > { %5458 = vst [vmem:[#allocation3_spill] sm:$0xff] %v5103_v13  ;;  %v3811_v40 = vadd.f32 %v3810_v5, %v3809_v29  ;;  %v3812_v44 = vpop.f32.mrb[78].mxu1  ;;  %v5109_v10 = vpop.f32.mrb[78].mxu0 }
 0x19d   : > { %v3813_v46 = vpop.f32.mrb[79].mxu1  ;;  %v5111_v14 = vpop.f32.mrb[79].mxu0 }
 0x19e   : > { %v1748_v22 = vadd.f32 %v5045_v52, %v3811_v40  ;;  %v3814_v57 = vadd.f32 %v3813_v46, %v3812_v44 }
 0x1a0   : > { %v5117_v38 = vadd.f32 %v2453_v54, %v1748_v22  ;;  %v1751_v9 = vadd.f32 %v5047_v2, %v3814_v57  ;;  %v5460_v2 = vrot.slane %v4951_v1, 7 }
 0x1a2   : > { %v5121_v7 = vadd.f32 %v4949_v6, %v1751_v9  ;;  %v3815_v50 = vpop.f32.mrb[80].mxu1  ;;  %v3903_v16 = vpop.f32.mrb[80].mxu0  ;;  %v2454_v6 = vsel %vm2365_vm0, 0.0, %v5460_v2 }
 0x1a3   : > { %v3816_v29 = vpop.f32.mrb[81].mxu1  ;;  %v3904_v5 = vpop.f32.mrb[81].mxu0 }
 0x1a4   : > { %v3817_v13 = vadd.f32 %v3816_v29, %v3815_v50  ;;  %v5123_v39 = vadd.f32 %v3904_v5, %v3903_v16  ;;  %v3818_v52 = vpop.f32.mrb[82].mxu1  ;;  %v3906_v44 = vpop.f32.mrb[82].mxu0 }
 0x1a5   : > { %v3819_v40 = vpop.f32.mrb[83].mxu1  ;;  %v3907_v34 = vpop.f32.mrb[83].mxu0 }
 0x1a6   : > { %v1756_v46 = vadd.f32 %v3817_v13, %v5059_v0  ;;  %v3820_v22 = vadd.f32 %v3819_v40, %v3818_v52  ;;  %v5126_v56 = vadd.f32 %v3907_v34, %v3906_v44 }
 0x1a8   : > { %v5131_v57 = vadd.f32 %v2454_v6, %v1756_v46  ;;  %v1759_v54 = vadd.f32 %v3820_v22, %v5063_v37 }
 0x1aa   : > { %v5135_v9 = vadd.f32 %v4959_v21, %v1759_v54  ;;  %v3821_v50 = vpop.f32.mrb[84].mxu1  ;;  %v3909_v16 = vpop.f32.mrb[84].mxu0  ;;  %v5462_v21 = vrot.slane %v4961_v17, 7 }
 0x1ab   : > { %v3822_v29 = vpop.f32.mrb[85].mxu1  ;;  %v3910_v5 = vpop.f32.mrb[85].mxu0 }
 0x1ac   : > { %5461 = vst [vmem:[#allocation4_spill] sm:$0xff] %v5135_v9  ;;  %v3823_v0 = vadd.f32 %v3822_v29, %v3821_v50  ;;  %v5137_v13 = vadd.f32 %v3910_v5, %v3909_v16  ;;  %v3824_v52 = vpop.f32.mrb[86].mxu1  ;;  %v3912_v1 = vpop.f32.mrb[86].mxu0  ;;  %v2455_v22 = vsel %vm2365_vm0, 0.0, %v5462_v21 }
 0x1ad   : > { %v3825_v44 = vpop.f32.mrb[87].mxu1  ;;  %v3913_v40 = vpop.f32.mrb[87].mxu0 }
 0x1ae   : > { %v1764_v34 = vadd.f32 %v5057_v4, %v3823_v0  ;;  %v3826_v46 = vadd.f32 %v3825_v44, %v3824_v52  ;;  %v5140_v37 = vadd.f32 %v3913_v40, %v3912_v1  ;;  %v4306_v0 = vmov 0.0  }
 0x1af   : > { %2858 = vst [vmem:[%s5155_s23] sm:$0x1] %v4306_v0  ;;  %2859 = vst [vmem:[%s5161_s26] sm:$0x1] %v4306_v0 }
 0x1b0   : > { %v5145_v2 = vadd.f32 %v2455_v22, %v1764_v34  ;;  %v1767_v6 = vadd.f32 %v5061_v19, %v3826_v46  ;;  %v5463_v46 = vrot.slane %v4976_v26, 7 }
 0x1b2   : > { %v5149_v54 = vadd.f32 %v4973_v43, %v1767_v6  ;;  %v3827_v50 = vpop.f32.mrb[88].mxu1  ;;  %v3915_v16 = vpop.f32.mrb[88].mxu0  ;;  %v2456_v21 = vsel %vm2365_vm0, 0.0, %v5463_v46 }
 0x1b3   : > { %v3828_v17 = vpop.f32.mrb[89].mxu1  ;;  %v3916_v4 = vpop.f32.mrb[89].mxu0 }
 0x1b4   : > { %v3829_v19 = vadd.f32 %v3828_v17, %v3827_v50  ;;  %v5163_v29 = vadd.f32 %v3916_v4, %v3915_v16  ;;  %v3830_v43 = vpop.f32.mrb[90].mxu1  ;;  %v3918_v5 = vpop.f32.mrb[90].mxu0 }
 0x1b5   : > { %v3831_v52 = vpop.f32.mrb[91].mxu1  ;;  %v3919_v1 = vpop.f32.mrb[91].mxu0 }
 0x1b6   : > { %v1772_v44 = vadd.f32 %v3829_v19, %v5075_v12  ;;  %v3832_v40 = vadd.f32 %v3831_v52, %v3830_v43  ;;  %v5168_v34 = vadd.f32 %v3919_v1, %v3918_v5 }
 0x1b8   : > { %v5173_v22 = vadd.f32 %v2456_v21, %v1772_v44  ;;  %v1775_v6 = vadd.f32 %v3832_v40, %v5079_v62  ;;  %v5464_v62 = vrot.slane %v5000_v32, 7 }
 0x1ba   : > { %v5177_v50 = vadd.f32 %v4997_v59, %v1775_v6  ;;  %v3833_v16 = vpop.f32.mrb[92].mxu1  ;;  %v3921_v17 = vpop.f32.mrb[92].mxu0  ;;  %v2457_v59 = vsel %vm2365_vm0, 0.0, %v5464_v62 }
 0x1bb   : > { %v3834_v4 = vpop.f32.mrb[93].mxu1  ;;  %v3922_v0 = vpop.f32.mrb[93].mxu0 }
 0x1bc   : > { %v3835_v9 = vadd.f32 %v3834_v4, %v3833_v16  ;;  %v5179_v12 = vadd.f32 %v3922_v0, %v3921_v17  ;;  %v3836_v19 = vpop.f32.mrb[94].mxu1  ;;  %v3924_v43 = vpop.f32.mrb[94].mxu0 }
 0x1bd   : > { %v3837_v5 = vpop.f32.mrb[95].mxu1  ;;  %v3925_v26 = vpop.f32.mrb[95].mxu0 }
 0x1be   : > { %v1780_v52 = vadd.f32 %v5073_v53, %v3835_v9  ;;  %v3838_v1 = vadd.f32 %v3837_v5, %v3836_v19  ;;  %v5182_v44 = vadd.f32 %v3925_v26, %v3924_v43 }
 0x1c0   : > { %v5187_v40 = vadd.f32 %v2457_v59, %v1780_v52  ;;  %v1783_v46 = vadd.f32 %v5077_v8, %v3838_v1  ;;  %v5465_v8 = vrot.slane %v4968_v58, 7 }
 0x1c2   : > { %v5191_v21 = vadd.f32 %v5019_v25, %v1783_v46  ;;  %v3839_v6 = vpop.f32.mrb[96].mxu1  ;;  %v3927_v16 = vpop.f32.mrb[96].mxu0  ;;  %v2458_v25 = vsel %vm2365_vm0, 0.0, %v5465_v8 }
 0x1c3   : > { %v3840_v17 = vpop.f32.mrb[97].mxu1  ;;  %v3928_v4 = vpop.f32.mrb[97].mxu0 }
 0x1c4   : > { %v3841_v0 = vadd.f32 %v3840_v17, %v3839_v6  ;;  %v5193_v53 = vadd.f32 %v3928_v4, %v3927_v16  ;;  %v3842_v9 = vpop.f32.mrb[98].mxu1  ;;  %v3930_v19 = vpop.f32.mrb[98].mxu0 }
 0x1c5   : > { %v3843_v43 = vpop.f32.mrb[99].mxu1  ;;  %v3931_v32 = vpop.f32.mrb[99].mxu0 }
 0x1c6   : > { %v1788_v5 = vadd.f32 %v3841_v0, %v5091_v15  ;;  %v3844_v26 = vadd.f32 %v3843_v43, %v3842_v9  ;;  %v5196_v52 = vadd.f32 %v3931_v32, %v3930_v19 }
 0x1c8   : > { %v5201_v1 = vadd.f32 %v2458_v25, %v1788_v5  ;;  %v1791_v62 = vadd.f32 %v3844_v26, %v5095_v36  ;;  %v5466_v36 = vrot.slane %v4965_v49, 7 }
 0x1ca   : > { %v5205_v59 = vadd.f32 %v4990_v23, %v1791_v62  ;;  %v3845_v46 = vpop.f32.mrb[100].mxu1  ;;  %v3933_v6 = vpop.f32.mrb[100].mxu0  ;;  %v2459_v23 = vsel %vm2365_vm0, 0.0, %v5466_v36 }
 0x1cb   : > { %v3846_v16 = vpop.f32.mrb[101].mxu1  ;;  %v3934_v17 = vpop.f32.mrb[101].mxu0 }
 0x1cc   : > { %v3847_v4 = vadd.f32 %v3846_v16, %v3845_v46  ;;  %v5207_v15 = vadd.f32 %v3934_v17, %v3933_v6  ;;  %v3848_v0 = vpop.f32.mrb[102].mxu1  ;;  %v3936_v9 = vpop.f32.mrb[102].mxu0 }
 0x1cd   : > { %v3849_v19 = vpop.f32.mrb[103].mxu1  ;;  %v3937_v58 = vpop.f32.mrb[103].mxu0 }
 0x1ce   : > { %v1796_v43 = vadd.f32 %v5089_v45, %v3847_v4  ;;  %v3850_v32 = vadd.f32 %v3849_v19, %v3848_v0  ;;  %v5210_v5 = vadd.f32 %v3937_v58, %v3936_v9 }
 0x1d0   : > { %v5215_v26 = vadd.f32 %v2459_v23, %v1796_v43  ;;  %v1799_v8 = vadd.f32 %v5093_v63, %v3850_v32 }
 0x1d2   : > { %v5219_v25 = vadd.f32 %v4984_v30, %v1799_v8  ;;  %v3851_v62 = vpop.f32.mrb[104].mxu1  ;;  %v3939_v46 = vpop.f32.mrb[104].mxu0 }
 0x1d3   : > { %v3852_v6 = vpop.f32.mrb[105].mxu1  ;;  %v3940_v16 = vpop.f32.mrb[105].mxu0 }
 0x1d4   : > { %v3853_v17 = vadd.f32 %v3852_v6, %v3851_v62  ;;  %v5221_v45 = vadd.f32 %v3940_v16, %v3939_v46  ;;  %v3854_v4 = vpop.f32.mrb[106].mxu1  ;;  %v3942_v0 = vpop.f32.mrb[106].mxu0 }
 0x1d5   : > { %v3855_v9 = vpop.f32.mrb[107].mxu1  ;;  %v3943_v49 = vpop.f32.mrb[107].mxu0 }
 0x1d6   : > { %v1804_v19 = vadd.f32 %v3853_v17, %v5107_v61  ;;  %v3856_v58 = vadd.f32 %v3855_v9, %v3854_v4  ;;  %v5224_v43 = vadd.f32 %v3943_v49, %v3942_v0 }
 0x1d8   : > { %v5227_v63 = vadd.f32 %v5007_v20, %v1804_v19  ;;  %v1807_v30 = vadd.f32 %v3856_v58, %v5111_v14 }
 0x1da   : > { %v5231_v32 = vadd.f32 %v5014_v48, %v1807_v30  ;;  %v3857_v36 = vpop.f32.mrb[108].mxu1  ;;  %v3945_v23 = vpop.f32.mrb[108].mxu0 }
 0x1db   : > { %v3858_v8 = vpop.f32.mrb[109].mxu1  ;;  %v3946_v62 = vpop.f32.mrb[109].mxu0 }
 0x1dc   : > { %5467 = vst [vmem:[#allocation5_spill] sm:$0xff] %v5231_v32  ;;  %v3859_v46 = vadd.f32 %v3858_v8, %v3857_v36  ;;  %v5233_v6 = vadd.f32 %v3946_v62, %v3945_v23  ;;  %v3860_v16 = vpop.f32.mrb[110].mxu1  ;;  %v3948_v61 = vpop.f32.mrb[110].mxu0 }
 0x1dd   : > { %v3861_v17 = vpop.f32.mrb[111].mxu1  ;;  %v3949_v4 = vpop.f32.mrb[111].mxu0 }
 0x1de   : > { %v1812_v0 = vadd.f32 %v5105_v3, %v3859_v46  ;;  %v3862_v20 = vadd.f32 %v3861_v17, %v3860_v16  ;;  %v5236_v9 = vadd.f32 %v3949_v4, %v3948_v61 }
 0x1e0   : > { %v5239_v14 = vadd.f32 %v5004_v47, %v1812_v0  ;;  %v1815_v48 = vadd.f32 %v5109_v10, %v3862_v20 }
 0x1e2   : > { %v5243_v49 = vadd.f32 %v5010_v33, %v1815_v48  ;;  %v3951_v19 = vpop.f32.mrb[112].mxu0  ;;  %v4137_v58 = vpop.f32.mrb[112].mxu1 }
 0x1e3   : > { %v2215_v30 = vadd.f32 %v4137_v58, %v5137_v13  ;;  %v3952_v36 = vpop.f32.mrb[113].mxu0  ;;  %v2206_v23 = vpop.f32.mrb[113].mxu1 }
 0x1e4   : > { %v5246_v8 = vadd.f32 %v3952_v36, %v3951_v19  ;;  %v2207_v3 = vadd.f32 %v5123_v39, %v2206_v23  ;;  %v3954_v62 = vpop.f32.mrb[114].mxu0  ;;  %v4138_v46 = vpop.f32.mrb[114].mxu1  ;;  %v5258_v39 = vld [vmem:[%s5444_s4] ss:$0 sm:$0xff] }
 0x1e5   : > { %v2218_v47 = vadd.f32 %v4138_v46, %v5140_v37  ;;  %v3955_v16 = vpop.f32.mrb[115].mxu0  ;;  %v2209_v61 = vpop.f32.mrb[115].mxu1  ;;  %v2530_v17 = vrot.slane %v2215_v30, 1 }
 0x1e6   : > { %v5250_v10 = vadd.f32 %v3955_v16, %v3954_v62  ;;  %v2210_v33 = vadd.f32 %v5126_v56, %v2209_v61  ;;  %v2527_v13 = vrot.slane %v2207_v3, 1 }
 0x1e7   : > { %v2531_v4 = vrot.slane %v2218_v47, 1 }
 0x1e8   : > { %v2528_v0 = vrot.slane %v2210_v33, 1 }
 0x1e9   : > { %v2532_v20 = vsel %vm2526_vm1, %v2530_v17, %v2531_v4  ;;  %v2608_v48 = vsel %vm2526_vm1, %v2531_v4, 0.0 }
 0x1ea   : > { %v2625_v37 = vadd.f32 %v2532_v20, %v5032_v27  ;;  %v2626_v19 = vadd.f32 %v2608_v48, %v5035_v31  ;;  %v2529_v56 = vsel %vm2526_vm1, %v2527_v13, %v2528_v0  ;;  %v2607_v58 = vsel %vm2526_vm1, %v2528_v0, 0.0  ;;  %v3957_v30 = vpop.f32.mrb[116].mxu0  ;;  %v4141_v36 = vpop.f32.mrb[116].mxu1 }
 0x1eb   : > { %v2623_v23 = vadd.f32 %v2529_v56, %v5024_v60  ;;  %v2624_v3 = vadd.f32 %v2607_v58, %v5027_v55  ;;  %v2231_v62 = vadd.f32 %v4141_v36, %v5179_v12  ;;  %v3958_v46 = vpop.f32.mrb[117].mxu0  ;;  %v2222_v47 = vpop.f32.mrb[117].mxu1 }
 0x1ec   : > { %v2664_v16 = vadd.f32 %v5258_v39, %v2625_v37  ;;  %v2665_v27 = vadd.f32 %v5258_v39, %v2626_v19  ;;  %v5269_v31 = vadd.f32 %v3958_v46, %v3957_v30  ;;  %v2223_v61 = vadd.f32 %v5163_v29, %v2222_v47  ;;  %v3960_v33 = vpop.f32.mrb[118].mxu0  ;;  %v4142_v17 = vpop.f32.mrb[118].mxu1 }
 0x1ed   : > { %v2662_v60 = vadd.f32 %v5258_v39, %v2623_v23  ;;  %v2663_v55 = vadd.f32 %v5258_v39, %v2624_v3  ;;  %v2234_v12 = vadd.f32 %v4142_v17, %v5182_v44  ;;  %v3961_v4 = vpop.f32.mrb[119].mxu0  ;;  %v2225_v13 = vpop.f32.mrb[119].mxu1  ;;  %v2536_v19 = vrot.slane %v2231_v62, 1 }
 0x1ee   : > { %v3513_v0 = vpack.c.bf16 %v2665_v27, %v2664_v16  ;;  %v5283_v58 = vadd.f32 %v3961_v4, %v3960_v33  ;;  %v2226_v30 = vadd.f32 %v5168_v34, %v2225_v13  ;;  %v2903_v36 = vmul.f32 %v2664_v16, %v2664_v16 }
 0x1ef   : > { %v3508_v29 = vpack.c.bf16 %v2663_v55, %v2662_v60  ;;  %v2861_v20 = vadd.f32 %v2663_v55, %v2662_v60  ;;  %v2901_v48 = vmul.f32 %v2662_v60, %v2662_v60  ;;  %v2902_v37 = vmul.f32 %v2663_v55, %v2663_v55 }
 0x1f0   : > { %3600 = vst [vmem:[%s5277_s12 + $0x8] sm:$0xff] %v3513_v0   ;;  %v2537_v56 = vrot.slane %v2234_v12, 1  ;;  %v2904_v23 = vmul.f32 %v2665_v27, %v2665_v27  ;;  %v2533_v44 = vrot.slane %v2223_v61, 1  ;;  %v2534_v32 = vrot.slane %v2226_v30, 1 }
 0x1f1   : > { %3509 = vst [vmem:[%s5277_s12] sm:$0xff] %v3508_v29   ;;  %v2862_v3 = vadd.f32 %v2861_v20, %v2664_v16  ;;  %v2933_v46 = vadd.f32 %v2902_v37, %v2901_v48 }
 0x1f2   : > { %v2538_v47 = vsel %vm2526_vm1, %v2536_v19, %v2537_v56  ;;  %v2610_v17 = vsel %vm2526_vm1, %v2537_v56, 0.0  ;;  %v3963_v60 = vpop.f32.mrb[120].mxu0  ;;  %v4145_v55 = vpop.f32.mrb[120].mxu1  ;;  %v2535_v13 = vsel %vm2526_vm1, %v2533_v44, %v2534_v32  ;;  %v2609_v16 = vsel %vm2526_vm1, %v2534_v32, 0.0 }
 0x1f3   : > { %v2934_v0 = vadd.f32 %v2933_v46, %v2903_v36  ;;  %v2629_v62 = vadd.f32 %v2538_v47, %v5052_v42  ;;  %v2630_v33 = vadd.f32 %v2610_v17, %v5055_v28  ;;  %v2863_v12 = vadd.f32 %v2862_v3, %v2665_v27  ;;  %v3964_v34 = vpop.f32.mrb[121].mxu0  ;;  %v2238_v4 = vpop.f32.mrb[121].mxu1 }
 0x1f4   : > { %v2247_v61 = vadd.f32 %v4145_v55, %v5207_v15  ;;  %v5294_v29 = vadd.f32 %v3964_v34, %v3963_v60  ;;  %v3966_v20 = vpop.f32.mrb[122].mxu0  ;;  %v4146_v48 = vpop.f32.mrb[122].mxu1  ;;  %v2627_v28 = vadd.f32 %v2535_v13, %v5040_v24  ;;  %v2628_v27 = vadd.f32 %v2609_v16, %v5043_v11 }
 0x1f5   : > { %v2668_v37 = vadd.f32 %v5258_v39, %v2629_v62  ;;  %v2669_v42 = vadd.f32 %v5258_v39, %v2630_v33  ;;  %v3967_v19 = vpop.f32.mrb[123].mxu0  ;;  %v2241_v56 = vpop.f32.mrb[123].mxu1  ;;  %v2935_v30 = vadd.f32 %v2934_v0, %v2904_v23  ;;  %v2239_v32 = vadd.f32 %v5193_v53, %v2238_v4 }
 0x1f6   : > { %v2250_v15 = vadd.f32 %v4146_v48, %v5210_v5  ;;  %v2666_v3 = vadd.f32 %v5258_v39, %v2627_v28  ;;  %v2542_v46 = vrot.slane %v2247_v61, 1  ;;  %v2667_v47 = vadd.f32 %v5258_v39, %v2628_v27 }
 0x1f7   : > { %v3523_v36 = vpack.c.bf16 %v2669_v42, %v2668_v37  ;;  %v2907_v44 = vmul.f32 %v2668_v37, %v2668_v37  ;;  %v5304_v60 = vadd.f32 %v3967_v19, %v3966_v20  ;;  %v2539_v55 = vrot.slane %v2239_v32, 1 }
 0x1f8   : > { %v2543_v17 = vrot.slane %v2250_v15, 1  ;;  %v2864_v24 = vadd.f32 %v2863_v12, %v2666_v3  ;;  %v2905_v11 = vmul.f32 %v2666_v3, %v2666_v3  ;;  %v2242_v23 = vadd.f32 %v5196_v52, %v2241_v56 }
 0x1f9   : > { %3602 = vst [vmem:[%s5277_s12 + $0x18] sm:$0xff] %v3523_v36   ;;  %v3518_v53 = vpack.c.bf16 %v2667_v47, %v2666_v3  ;;  %v2906_v0 = vmul.f32 %v2667_v47, %v2667_v47 }
 0x1fa   : > { %v2544_v5 = vsel %vm2526_vm1, %v2542_v46, %v2543_v17  ;;  %v2612_v62 = vsel %vm2526_vm1, %v2543_v17, 0.0  ;;  %v3969_v33 = vpop.f32.mrb[124].mxu0  ;;  %v4149_v34 = vpop.f32.mrb[124].mxu1  ;;  %v2865_v4 = vadd.f32 %v2864_v24, %v2667_v47  ;;  %v2936_v13 = vadd.f32 %v2935_v30, %v2905_v11 }
 0x1fb   : > { %v2633_v16 = vadd.f32 %v2544_v5, %v5084_v41  ;;  %v2634_v61 = vadd.f32 %v2612_v62, %v5087_v51  ;;  %v3970_v12 = vpop.f32.mrb[125].mxu0  ;;  %v2254_v20 = vpop.f32.mrb[125].mxu1  ;;  %3601 = vst [vmem:[%s5277_s12 + $0x10] sm:$0xff] %v3518_v53   ;;  %v2540_v48 = vrot.slane %v2242_v23, 1  ;;  %v2263_v52 = vadd.f32 %v4149_v34, %v5233_v6 }
 0x1fc   : > { %v5314_v28 = vadd.f32 %v3970_v12, %v3969_v33  ;;  %v2255_v27 = vadd.f32 %v5221_v45, %v2254_v20  ;;  %v3972_v19 = vpop.f32.mrb[126].mxu0  ;;  %v4150_v56 = vpop.f32.mrb[126].mxu1  ;;  %v2866_v32 = vadd.f32 %v2865_v4, %v2668_v37  ;;  %v2937_v15 = vadd.f32 %v2936_v13, %v2906_v0 }
 0x1fd   : > { %v2672_v30 = vadd.f32 %v5258_v39, %v2633_v16  ;;  %v5319_v41 = vadd.f32 %v5258_v39, %v2634_v61  ;;  %v3973_v51 = vpop.f32.mrb[127].mxu0  ;;  %v2257_v36 = vpop.f32.mrb[127].mxu1  ;;  %v2541_v3 = vsel %vm2526_vm1, %v2539_v55, %v2540_v48  ;;  %v2611_v6 = vsel %vm2526_vm1, %v2540_v48, 0.0 }
 0x1fe   : > { %v2908_v46 = vmul.f32 %v2669_v42, %v2669_v42  ;;  %v2938_v47 = vadd.f32 %v2937_v15, %v2907_v44  ;;  %v2631_v17 = vadd.f32 %v2541_v3, %v5068_v18  ;;  %v2632_v37 = vadd.f32 %v2611_v6, %v5071_v35 }
 0x1ff   : > { %v3533_v45 = vpack.c.bf16 %v5319_v41, %v2672_v30  ;;  %v2867_v24 = vadd.f32 %v2866_v32, %v2669_v42  ;;  %v2266_v11 = vadd.f32 %v4150_v56, %v5236_v9  ;;  %v5328_v53 = vadd.f32 %v3973_v51, %v3972_v19 }
 0x200   : > { %v2939_v23 = vadd.f32 %v2938_v47, %v2908_v46  ;;  %v2258_v0 = vadd.f32 %v5224_v43, %v2257_v36  ;;  %v2670_v55 = vadd.f32 %v5258_v39, %v2631_v17  ;;  %v2671_v5 = vadd.f32 %v5258_v39, %v2632_v37  ;;  %v5468_v46 = vld [vmem:[#allocation2_spill] sm:$0xff] }
 0x201   : > { %3604 = vst [vmem:[%s5277_s12 + $0x28] sm:$0xff] %v3533_v45   ;;  %v2548_v44 = vrot.slane %v2263_v52, 1  ;;  %v2549_v62 = vrot.slane %v2266_v11, 1  ;;  %v2911_v18 = vmul.f32 %v2672_v30, %v2672_v30  ;;  %v2545_v4 = vrot.slane %v2255_v27, 1  ;;  %v5469_v45 = vld [vmem:[#allocation3_spill] sm:$0xff] }
 0x202   : > { %v3975_v33 = vpop.f32.mrb[128].mxu0  ;;  %v4153_v34 = vpop.f32.mrb[128].mxu1  ;;  %v2546_v35 = vrot.slane %v2258_v0, 1  ;;  %v3528_v16 = vpack.c.bf16 %v2671_v5, %v2670_v55  ;;  %v2868_v61 = vadd.f32 %v2867_v24, %v2670_v55  ;;  %v2909_v12 = vmul.f32 %v2670_v55, %v2670_v55 }
 0x203   : > { %v2279_v9 = vadd.f32 %v4153_v34, %v5269_v31  ;;  %v3976_v42 = vpop.f32.mrb[129].mxu0  ;;  %v2270_v13 = vpop.f32.mrb[129].mxu1  ;;  %v2910_v43 = vmul.f32 %v2671_v5, %v2671_v5  ;;  %v2550_v19 = vsel %vm2526_vm1, %v2548_v44, %v2549_v62  ;;  %v2614_v52 = vsel %vm2526_vm1, %v2549_v62, 0.0 }
 0x204   : > { %v3978_v20 = vpop.f32.mrb[130].mxu0  ;;  %v4154_v48 = vpop.f32.mrb[130].mxu1  ;;  %v2547_v56 = vsel %vm2526_vm1, %v2545_v4, %v2546_v35  ;;  %v2613_v27 = vsel %vm2526_vm1, %v2546_v35, 0.0  ;;  %3603 = vst [vmem:[%s5277_s12 + $0x20] sm:$0xff] %v3528_v16   ;;  %v2869_v31 = vadd.f32 %v2868_v61, %v2671_v5  ;;  %v2940_v51 = vadd.f32 %v2939_v23, %v2909_v12 }
 0x205   : > { %v3979_v32 = vpop.f32.mrb[131].mxu0  ;;  %v2273_v15 = vpop.f32.mrb[131].mxu1  ;;  %v2637_v36 = vadd.f32 %v2550_v19, %v5117_v38  ;;  %v2638_v3 = vadd.f32 %v2614_v52, %v5121_v7  ;;  %v2912_v6 = vmul.f32 %v5319_v41, %v5319_v41  ;;  %v2635_v47 = vadd.f32 %v2547_v56, %v5468_v46 }
 0x206   : > { %v2636_v17 = vadd.f32 %v2613_v27, %v5469_v45  ;;  %v5345_v37 = vadd.f32 %v3976_v42, %v3975_v33  ;;  %v2870_v24 = vadd.f32 %v2869_v31, %v2672_v30  ;;  %v2941_v11 = vadd.f32 %v2940_v51, %v2910_v43 }
 0x207   : > { %v2676_v0 = vadd.f32 %v5258_v39, %v2637_v36  ;;  %v2677_v55 = vadd.f32 %v5258_v39, %v2638_v3  ;;  %v2674_v23 = vadd.f32 %v5258_v39, %v2635_v47  ;;  %v2271_v7 = vadd.f32 %v5246_v8, %v2270_v13 }
 0x208   : > { %v2675_v38 = vadd.f32 %v5258_v39, %v2636_v17  ;;  %v2282_v5 = vadd.f32 %v4154_v48, %v5283_v58  ;;  %v2942_v44 = vadd.f32 %v2941_v11, %v2911_v18  ;;  %v2554_v33 = vrot.slane %v2279_v9, 1 }
 0x209   : > { %v3543_v62 = vpack.c.bf16 %v2677_v55, %v2676_v0  ;;  %v2915_v34 = vmul.f32 %v2676_v0, %v2676_v0  ;;  %v2871_v42 = vadd.f32 %v2870_v24, %v5319_v41  ;;  %v2913_v16 = vmul.f32 %v2674_v23, %v2674_v23 }
 0x20a   : > { %v3981_v30 = vpop.f32.mrb[132].mxu0  ;;  %v4157_v4 = vpop.f32.mrb[132].mxu1  ;;  %v3538_v35 = vpack.c.bf16 %v2675_v38, %v2674_v23  ;;  %v2914_v61 = vmul.f32 %v2675_v38, %v2675_v38  ;;  %v2943_v19 = vadd.f32 %v2942_v44, %v2912_v6  ;;  %v2551_v52 = vrot.slane %v2271_v7, 1 }
 0x20b   : > { %v3982_v12 = vpop.f32.mrb[133].mxu0  ;;  %v2286_v43 = vpop.f32.mrb[133].mxu1  ;;  %3606 = vst [vmem:[%s5277_s12 + $0x38] sm:$0xff] %v3543_v62   ;;  %v2555_v8 = vrot.slane %v2282_v5, 1  ;;  %v5355_v13 = vadd.f32 %v3979_v32, %v3978_v20  ;;  %v2872_v9 = vadd.f32 %v2871_v42, %v2674_v23  ;;  %v2274_v48 = vadd.f32 %v5250_v10, %v2273_v15  ;;  %v5470_v62 = vld [vmem:[#allocation4_spill] sm:$0xff] }
 0x20c   : > { %v3984_v58 = vpop.f32.mrb[134].mxu0  ;;  %v4158_v18 = vpop.f32.mrb[134].mxu1  ;;  %3605 = vst [vmem:[%s5277_s12 + $0x30] sm:$0xff] %v3538_v35   ;;  %v2295_v56 = vadd.f32 %v4157_v4, %v5314_v28  ;;  %v3983_v27 = vadd.f32 %v3982_v12, %v3981_v30  ;;  %v2944_v51 = vadd.f32 %v2943_v19, %v2913_v16  ;;  %v2287_v6 = vadd.f32 %v5294_v29, %v2286_v43 }
 0x20d   : > { %v3985_v41 = vpop.f32.mrb[135].mxu0  ;;  %v2289_v31 = vpop.f32.mrb[135].mxu1  ;;  %v2556_v36 = vsel %vm2526_vm1, %v2554_v33, %v2555_v8  ;;  %v2616_v3 = vsel %vm2526_vm1, %v2555_v8, 0.0  ;;  %v2873_v20 = vadd.f32 %v2872_v9, %v2675_v38  ;;  %v2552_v47 = vrot.slane %v2274_v48, 1 }
 0x20e   : > { %v2641_v32 = vadd.f32 %v2556_v36, %v5145_v2  ;;  %v2642_v46 = vadd.f32 %v2616_v3, %v5149_v54  ;;  %v2916_v45 = vmul.f32 %v2677_v55, %v2677_v55  ;;  %v2945_v10 = vadd.f32 %v2944_v51, %v2914_v61 }
 0x20f   : > { %v2560_v15 = vrot.slane %v2295_v56, 1  ;;  %v2298_v28 = vadd.f32 %v4158_v18, %v5328_v53  ;;  %v2874_v17 = vadd.f32 %v2873_v20, %v2676_v0  ;;  %v2553_v23 = vsel %vm2526_vm1, %v2551_v52, %v2552_v47 }
 0x210   : > { %v2680_v24 = vadd.f32 %v5258_v39, %v2641_v32  ;;  %v2681_v11 = vadd.f32 %v5258_v39, %v2642_v46  ;;  %v2946_v7 = vadd.f32 %v2945_v10, %v2915_v34  ;;  %v2615_v29 = vsel %vm2526_vm1, %v2552_v47, 0.0 }
 0x211   : > { %v2639_v2 = vadd.f32 %v2553_v23, %v5131_v57  ;;  %v2561_v54 = vrot.slane %v2298_v28, 1  ;;  %v2640_v33 = vadd.f32 %v2615_v29, %v5470_v62  ;;  %v2557_v53 = vrot.slane %v2287_v6, 1 }
 0x212   : > { %v3987_v38 = vpop.f32.mrb[136].mxu0  ;;  %v4161_v5 = vpop.f32.mrb[136].mxu1  ;;  %v3553_v44 = vpack.c.bf16 %v2681_v11, %v2680_v24  ;;  %v2875_v35 = vadd.f32 %v2874_v17, %v2677_v55  ;;  %v2947_v42 = vadd.f32 %v2946_v7, %v2916_v45  ;;  %v3986_v19 = vadd.f32 %v3985_v41, %v3984_v58 }
 0x213   : > { %v3988_v0 = vpop.f32.mrb[137].mxu0  ;;  %v2302_v30 = vpop.f32.mrb[137].mxu1  ;;  %v2678_v4 = vadd.f32 %v5258_v39, %v2639_v2  ;;  %v2562_v34 = vsel %vm2526_vm1, %v2560_v15, %v2561_v54  ;;  %v2679_v57 = vadd.f32 %v5258_v39, %v2640_v33  ;;  %v2618_v12 = vsel %vm2526_vm1, %v2561_v54, 0.0 }
 0x214   : > { %v3990_v16 = vpop.f32.mrb[138].mxu0  ;;  %v4162_v61 = vpop.f32.mrb[138].mxu1  ;;  %3608 = vst [vmem:[%s5277_s12 + $0x48] sm:$0xff] %v3553_v44   ;;  %v2645_v43 = vadd.f32 %v2562_v34, %v5187_v40  ;;  %v2646_v55 = vadd.f32 %v2618_v12, %v5191_v21  ;;  %v2290_v48 = vadd.f32 %v5304_v60, %v2289_v31  ;;  %v2311_v3 = vadd.f32 %v4161_v5, %v3983_v27 }
 0x215   : > { %v3991_v52 = vpop.f32.mrb[139].mxu0  ;;  %v2305_v8 = vpop.f32.mrb[139].mxu1  ;;  %v2876_v18 = vadd.f32 %v2875_v35, %v2678_v4  ;;  %v2917_v9 = vmul.f32 %v2678_v4, %v2678_v4  ;;  %v3548_v56 = vpack.c.bf16 %v2679_v57, %v2678_v4  ;;  %v2918_v51 = vmul.f32 %v2679_v57, %v2679_v57 }
 0x216   : > { %v2684_v36 = vadd.f32 %v5258_v39, %v2645_v43  ;;  %v5382_v32 = vadd.f32 %v5258_v39, %v2646_v55  ;;  %v2558_v40 = vrot.slane %v2290_v48, 1  ;;  %v2919_v58 = vmul.f32 %v2680_v24, %v2680_v24 }
 0x217   : > { %v2877_v6 = vadd.f32 %v2876_v18, %v2679_v57  ;;  %v2948_v20 = vadd.f32 %v2947_v42, %v2917_v9  ;;  %v2920_v41 = vmul.f32 %v2681_v11, %v2681_v11  ;;  %3607 = vst [vmem:[%s5277_s12 + $0x40] sm:$0xff] %v3548_v56   ;;  %v3989_v46 = vadd.f32 %v3988_v0, %v3987_v38 }
 0x218   : > { %v2303_v21 = vadd.f32 %v5345_v37, %v2302_v30  ;;  %v3563_v31 = vpack.c.bf16 %v5382_v32, %v2684_v36  ;;  %v2566_v45 = vrot.slane %v2311_v3, 1  ;;  %v2559_v15 = vsel %vm2526_vm1, %v2557_v53, %v2558_v40 }
 0x219   : > { %v2878_v47 = vadd.f32 %v2877_v6, %v2680_v24  ;;  %v2949_v60 = vadd.f32 %v2948_v20, %v2918_v51  ;;  %v2617_v28 = vsel %vm2526_vm1, %v2558_v40, 0.0  ;;  %v2314_v23 = vadd.f32 %v4162_v61, %v3986_v19 }
 0x21a   : > { %v3993_v10 = vpop.f32.mrb[140].mxu0  ;;  %v4165_v27 = vpop.f32.mrb[140].mxu1  ;;  %v2563_v17 = vrot.slane %v2303_v21, 1  ;;  %3610 = vst [vmem:[%s5277_s12 + $0x58] sm:$0xff] %v3563_v31   ;;  %v2643_v54 = vadd.f32 %v2559_v15, %v5173_v22  ;;  %v2644_v37 = vadd.f32 %v2617_v28, %v5177_v50  ;;  %v3992_v62 = vadd.f32 %v3991_v52, %v3990_v16 }
 0x21b   : > { %v3994_v7 = vpop.f32.mrb[141].mxu0  ;;  %v2318_v29 = vpop.f32.mrb[141].mxu1  ;;  %v2950_v2 = vadd.f32 %v2949_v60, %v2919_v58  ;;  %v2879_v24 = vadd.f32 %v2878_v47, %v2681_v11  ;;  %v2567_v44 = vrot.slane %v2314_v23, 1  ;;  %v2306_v33 = vadd.f32 %v5355_v13, %v2305_v8 }
 0x21c   : > { %v3996_v38 = vpop.f32.mrb[142].mxu0  ;;  %v4166_v5 = vpop.f32.mrb[142].mxu1  ;;  %v3995_v53 = vadd.f32 %v3994_v7, %v3993_v10  ;;  %v2682_v4 = vadd.f32 %v5258_v39, %v2643_v54  ;;  %v2683_v35 = vadd.f32 %v5258_v39, %v2644_v37  ;;  %v2319_v34 = vadd.f32 %v3989_v46, %v2318_v29 }
 0x21d   : > { %v3997_v0 = vpop.f32.mrb[143].mxu0  ;;  %v2321_v30 = vpop.f32.mrb[143].mxu1  ;;  %v2951_v42 = vadd.f32 %v2950_v2, %v2920_v41  ;;  %v2568_v22 = vsel %vm2526_vm1, %v2566_v45, %v2567_v44  ;;  %v2620_v50 = vsel %vm2526_vm1, %v2567_v44, 0.0  ;;  %v2564_v11 = vrot.slane %v2306_v33, 1  ;;  %v5471_v33 = vld [vmem:[#allocation5_spill] sm:$0xff] }
 0x21e   : > { %v2327_v61 = vadd.f32 %v4165_v27, %v3995_v53  ;;  %v3558_v57 = vpack.c.bf16 %v2683_v35, %v2682_v4  ;;  %v2880_v16 = vadd.f32 %v2879_v24, %v2682_v4  ;;  %v2921_v12 = vmul.f32 %v2682_v4, %v2682_v4 }
 0x21f   : > { %v2922_v13 = vmul.f32 %v2683_v35, %v2683_v35  ;;  %v2649_v43 = vadd.f32 %v2568_v22, %v5215_v26  ;;  %v2650_v19 = vadd.f32 %v2620_v50, %v5219_v25  ;;  %v2565_v52 = vsel %vm2526_vm1, %v2563_v17, %v2564_v11 }
 0x220   : > { %v2619_v8 = vsel %vm2526_vm1, %v2564_v11, 0.0  ;;  %3609 = vst [vmem:[%s5277_s12 + $0x50] sm:$0xff] %v3558_v57   ;;  %v2881_v18 = vadd.f32 %v2880_v16, %v2683_v35  ;;  %v2952_v9 = vadd.f32 %v2951_v42, %v2921_v12  ;;  %v2647_v55 = vadd.f32 %v2565_v52, %v5201_v1 }
 0x221   : > { %v2648_v48 = vadd.f32 %v2619_v8, %v5205_v59  ;;  %v2923_v56 = vmul.f32 %v2684_v36, %v2684_v36  ;;  %v2688_v51 = vadd.f32 %v5258_v39, %v2649_v43  ;;  %v2689_v26 = vadd.f32 %v5258_v39, %v2650_v19 }
 0x222   : > { %v2882_v3 = vadd.f32 %v2881_v18, %v2684_v36  ;;  %v2953_v25 = vadd.f32 %v2952_v9, %v2922_v13  ;;  %v2686_v6 = vadd.f32 %v5258_v39, %v2647_v55  ;;  %v2924_v40 = vmul.f32 %v5382_v32, %v5382_v32 }
 0x223   : > { %v2687_v20 = vadd.f32 %v5258_v39, %v2648_v48  ;;  %v3573_v58 = vpack.c.bf16 %v2689_v26, %v2688_v51  ;;  %v3998_v1 = vadd.f32 %v3997_v0, %v3996_v38  ;;  %v2322_v60 = vadd.f32 %v3992_v62, %v2321_v30 }
 0x224   : > { %v2954_v41 = vadd.f32 %v2953_v25, %v2923_v56  ;;  %v2883_v59 = vadd.f32 %v2882_v3, %v5382_v32  ;;  %v2925_v21 = vmul.f32 %v2686_v6, %v2686_v6  ;;  %v2572_v45 = vrot.slane %v2327_v61, 1  ;;  %v2860_v25 = vld [vmem:[%s5155_s23] sm:$0x1] }
 0x225   : > { %v3568_v46 = vpack.c.bf16 %v2687_v20, %v2686_v6  ;;  %3612 = vst [vmem:[%s5277_s12 + $0x68] sm:$0xff] %v3573_v58   ;;  %v2330_v47 = vadd.f32 %v4166_v5, %v3998_v1  ;;  %v2569_v10 = vrot.slane %v2319_v34, 1  ;;  %v2570_v15 = vrot.slane %v2322_v60, 1 }
 0x226   : > { %v2884_v36 = vadd.f32 %v2883_v59, %v2686_v6  ;;  %v2955_v31 = vadd.f32 %v2954_v41, %v2924_v40  ;;  %v2927_v28 = vmul.f32 %v2688_v51, %v2688_v51  ;;  %v2926_v23 = vmul.f32 %v2687_v20, %v2687_v20  ;;  %v2900_v40 = vld [vmem:[%s5161_s26] sm:$0x1] }
 0x227   : > { %3611 = vst [vmem:[%s5277_s12 + $0x60] sm:$0xff] %v3568_v46   ;;  %v2573_v27 = vrot.slane %v2330_v47, 1  ;;  %v2571_v32 = vsel %vm2526_vm1, %v2569_v10, %v2570_v15  ;;  %v2621_v54 = vsel %vm2526_vm1, %v2570_v15, 0.0  ;;  %v2928_v44 = vmul.f32 %v2689_v26, %v2689_v26 }
 0x228   : > { %v2885_v17 = vadd.f32 %v2884_v36, %v2687_v20  ;;  %v2956_v7 = vadd.f32 %v2955_v31, %v2925_v21  ;;  %v2651_v62 = vadd.f32 %v2571_v32, %v5227_v63  ;;  %v2652_v53 = vadd.f32 %v2621_v54, %v5471_v33 }
 0x229   : > { %v2574_v29 = vsel %vm2526_vm1, %v2572_v45, %v2573_v27  ;;  %v2622_v2 = vsel %vm2526_vm1, %v2573_v27, 0.0 }
 0x22a   : > { %v2886_v37 = vadd.f32 %v2885_v17, %v2688_v51  ;;  %v2957_v24 = vadd.f32 %v2956_v7, %v2926_v23  ;;  %v2653_v38 = vadd.f32 %v2574_v29, %v5239_v14  ;;  %v2654_v5 = vadd.f32 %v2622_v2, %v5243_v49 }
 0x22b   : > { %v2690_v42 = vadd.f32 %v5258_v39, %v2651_v62  ;;  %v2691_v34 = vadd.f32 %v5258_v39, %v2652_v53 }
 0x22c   : > { %v2958_v0 = vadd.f32 %v2957_v24, %v2927_v28  ;;  %v2692_v30 = vadd.f32 %v5258_v39, %v2653_v38  ;;  %v2693_v4 = vadd.f32 %v5258_v39, %v2654_v5  ;;  %v2887_v35 = vadd.f32 %v2886_v37, %v2689_v26 }
 0x22d   : > { %v3578_v50 = vpack.c.bf16 %v2691_v34, %v2690_v42  ;;  %v2929_v11 = vmul.f32 %v2690_v42, %v2690_v42  ;;  %v2930_v61 = vmul.f32 %v2691_v34, %v2691_v34 }
 0x22e   : > { %v3583_v14 = vpack.c.bf16 %v2693_v4, %v2692_v30  ;;  %v2959_v22 = vadd.f32 %v2958_v0, %v2928_v44  ;;  %v2888_v49 = vadd.f32 %v2887_v35, %v2690_v42  ;;  %v2931_v16 = vmul.f32 %v2692_v30, %v2692_v30 }
 0x22f   : > { %3613 = vst [vmem:[%s5277_s12 + $0x70] sm:$0xff] %v3578_v50   ;;  %v2932_v43 = vmul.f32 %v2693_v4, %v2693_v4 }
 0x230   : > { %3614 = vst [vmem:[%s5277_s12 + $0x78] sm:$0xff] %v3583_v14   ;;  %v2889_v63 = vadd.f32 %v2888_v49, %v2691_v34  ;;  %v2960_v57 = vadd.f32 %v2959_v22, %v2929_v11 }
 0x232   : > { %v2890_v12 = vadd.f32 %v2889_v63, %v2692_v30  ;;  %v2961_v13 = vadd.f32 %v2960_v57, %v2930_v61 }
 0x234   : > { %v2891_v19 = vadd.f32 %v2890_v12, %v2693_v4  ;;  %v2962_v52 = vadd.f32 %v2961_v13, %v2931_v16 }
 0x236   : > { %v2892_v8 = vrot.slane %v2891_v19, 4  ;;  %v2963_v39 = vadd.f32 %v2962_v52, %v2932_v43 }
 0x238   : > { %v2893_v18 = vadd.f32 %v2892_v8, %v2891_v19  ;;  %v2964_v9 = vrot.slane %v2963_v39, 4 }
 0x23a   : > { %v2894_v55 = vrot.slane %v2893_v18, 2  ;;  %v2965_v48 = vadd.f32 %v2964_v9, %v2963_v39 }
 0x23c   : > { %v2895_v56 = vadd.f32 %v2894_v55, %v2893_v18  ;;  %v2966_v51 = vrot.slane %v2965_v48, 2 }
 0x23e   : > { %v2896_v26 = vrot.slane %v2895_v56, 1  ;;  %v2967_v3 = vadd.f32 %v2966_v51, %v2965_v48 }
 0x240   : > { %v2897_v6 = vadd.f32 %v2896_v26, %v2895_v56  ;;  %v2968_v20 = vrot.slane %v2967_v3, 1 }
 0x242   : > { %v2898_v58 = vadd.f32 %v2897_v6, %v2860_v25  ;;  %v2969_v1 = vadd.f32 %v2968_v20, %v2967_v3 }
 0x244   : > { %2899 = vst [vmem:[%s5155_s23] sm:$0x1] %v2898_v58  ;;  %v2970_v41 = vadd.f32 %v2969_v1, %v2900_v40 }
 0x246   : > { %2971 = vst [vmem:[%s5161_s26] sm:$0x1] %v2970_v41 }
 0x247 PF: > { %s20_s30 = sadd.s32 1, %s4303_s30   ;;  %s5472_s28 = smov %s4299_s29 }
 0x248   : > { %p17_p5 = scmp.ge.s32.totalorder %s20_s30, 4   ;;  %s5473_s29 = smov %s5475_s10 }
 0x24a   :  { %19 = sbr.rel (!%p17_p5) target bundleno = 2 (0x2), region = 114 }

</bundles_post_ra>
